<compile_context>
chip_gen: v5e
topology: v5e:2x2
jax: 0.10.0
libtpu: 0.0.40
codegen_flags: <defaults>
</compile_context>

<pallas_src>
import functools

import jax
import jax.numpy as jnp
from jax import lax
from jax.experimental import pallas as pl
from jax.experimental.pallas import tpu as pltpu


# ----------------------------------------------------------------------------
# Kernel-side helper (traced inside the Pallas kernel body)
# ----------------------------------------------------------------------------
def _fused_bilstm(proj, wh_ref, H, B, T, hf_ref=None, hb_ref=None):
    """Fused bidirectional LSTM recurrence, fully unrolled over time.

    proj   : (T*B, 4*GB) precomputed input projection (+bias), gate blocks of
             GB lanes each in order [i, f, g, o]; inside every block the first
             H lanes are the forward direction, the next H lanes the backward
             direction, remaining lanes are zero padding.
    wh_ref : (GB, 4*GB) hidden->gate weights (block-diagonal per direction,
             zero rows for padded lanes).
    hf_ref / hb_ref : optional (T*B, H) VMEM scratch refs receiving the
             forward / backward hidden state for every timestep.
    Returns (hf(T-1), hb(T-1)) -- the pieces needed for `output[-1]`.
    """
    GB = wh_ref.shape[0]
    G4 = wh_ref.shape[1]

    lane = lax.broadcasted_iota(jnp.int32, (1, G4), 1)
    fwd_lane = (lane % GB) < H           # forward-direction lanes of each block

    h = jnp.zeros((B, GB), jnp.float32)  # [h_fwd | h_bwd | 0-pad] lane-stacked
    c = jnp.zeros((B, GB), jnp.float32)
    hf_last = None
    hb_at_T = None

    for s in range(T):                   # fully unrolled (static T)
        pf = proj[s * B:(s + 1) * B, :]              # x[s]      for fwd lanes
        pb = proj[(T - 1 - s) * B:(T - s) * B, :]    # x[T-1-s]  for bwd lanes
        g = jnp.where(fwd_lane, pf, pb) + jnp.dot(
            h, wh_ref[...], preferred_element_type=jnp.float32)

        i_g = jax.nn.sigmoid(g[:, 0 * GB:1 * GB])
        f_g = jax.nn.sigmoid(g[:, 1 * GB:2 * GB])
        g_g = jnp.tanh(g[:, 2 * GB:3 * GB])
        o_g = jax.nn.sigmoid(g[:, 3 * GB:4 * GB])
        c = f_g * c + i_g * g_g
        h = o_g * jnp.tanh(c)

        if hf_ref is not None:
            hf_ref[s * B:(s + 1) * B, :] = h[:, :H]            # hf(s)
            hb_ref[(T - 1 - s) * B:(T - s) * B, :] = h[:, H:2 * H]  # hb(T-1-s)
        if s == T - 1:
            hf_last = h[:, :H]           # forward hidden at time T-1
        if s == 0:
            hb_at_T = h[:, H:2 * H]      # backward hidden at time T-1
    return hf_last, hb_at_T


def lstm_net_kernel(T, B,
                    x_ref, wx1_ref, wh1_ref, b1_ref,
                    wx2f_ref, wx2b_ref, wh2_ref, b2_ref,
                    fw1f_ref, fw1b_ref, fb1_ref, fw2_ref,
                    out_ref,
                    hf1_ref, hb1_ref):
    """Whole LSTMNet forward in one VMEM-resident kernel invocation."""
    H1 = hf1_ref.shape[1]
    H2 = fw1f_ref.shape[0]

    # ---- Layer 1: one matmul projects all T steps of BOTH directions ------
    proj1 = jnp.dot(x_ref[...], wx1_ref[...],
                    preferred_element_type=jnp.float32) + b1_ref[...]
    _fused_bilstm(proj1, wh1_ref, H1, B, T, hf_ref=hf1_ref, hb_ref=hb1_ref)

    # ---- Layer 2: input projection straight from the direction buffers ----
    proj2 = (jnp.dot(hf1_ref[...], wx2f_ref[...],
                     preferred_element_type=jnp.float32)
             + jnp.dot(hb1_ref[...], wx2b_ref[...],
                       preferred_element_type=jnp.float32)
             + b2_ref[...])
    hf2_T, hb2_T = _fused_bilstm(proj2, wh2_ref, H2, B, T)

    # ---- FC head on output[-1] = [hf2(T-1) | hb2(T-1)] (split weights) ----
    hid = jnp.tanh(jnp.dot(hf2_T, fw1f_ref[...],
                           preferred_element_type=jnp.float32)
                   + jnp.dot(hb2_T, fw1b_ref[...],
                             preferred_element_type=jnp.float32)
                   + fb1_ref[...])
    out_ref[...] = jnp.dot(hid, fw2_ref[...],
                           preferred_element_type=jnp.float32)


# ----------------------------------------------------------------------------
# Host-side wrapper
# ----------------------------------------------------------------------------
def lstm_net_forward(x, params):
    """x: (T, B, input_dim) -> (B, output_dim). Single fused pallas_call."""
    T, B, Din = x.shape
    H1 = params["wx2f"].shape[0]
    out_dim = params["fc2_wT"].shape[1]
    x_flat = x.reshape(T * B, Din)          # XLA-side no-op; no in-kernel reshape

    kernel = functools.partial(lstm_net_kernel, T, B)
    return pl.pallas_call(
        kernel,
        out_shape=jax.ShapeDtypeStruct((B, out_dim), jnp.float32),
        scratch_shapes=[pltpu.VMEM((T * B, H1), jnp.float32),   # hf buffer
                        pltpu.VMEM((T * B, H1), jnp.float32)],  # hb buffer
    )(x_flat,
      params["wx1"], params["wh1"], params["b1"],
      params["wx2f"], params["wx2b"], params["wh2"], params["b2"],
      params["fc1_wT_f"], params["fc1_wT_b"], params["fc1_b2"],
      params["fc2_wT"])
    # TODO(synk): for real batched serving, add a batch grid axis with
    # dimension_semantics=("parallel",) so v7x can split B across both TCs.


# ----------------------------------------------------------------------------
# Parameter init + packing (all transposes / padding hoisted out of forward)
# ----------------------------------------------------------------------------
def _pack_bilstm(w_ih_f, w_hh_f, b_f, w_ih_b, w_hh_b, b_b):
    """Pack PyTorch-layout per-direction LSTM weights into the fused layout.

    Gate block width GB = 2H rounded up to a multiple of 128 so every in-kernel
    gate slice is whole-vreg; padded columns / rows / biases are exactly zero.
    Column layout per gate block k in [i, f, g, o]:
      lanes [0:H]  -> forward direction, lanes [H:2H] -> backward, rest zero.
    """
    H = w_hh_f.shape[1]
    Din = w_ih_f.shape[1]
    GB = ((2 * H + 127) // 128) * 128

    def blkT(w, k):                       # gate-k block, transposed: (X, H)
        return w[k * H:(k + 1) * H, :].T

    wx = jnp.zeros((Din, 4 * GB), jnp.float32)
    wh = jnp.zeros((GB, 4 * GB), jnp.float32)
    b = jnp.zeros((1, 4 * GB), jnp.float32)
    for k in range(4):
        wx = wx.at[:, k * GB:k * GB + H].set(blkT(w_ih_f, k))
        wx = wx.at[:, k * GB + H:k * GB + 2 * H].set(blkT(w_ih_b, k))
        wh = wh.at[0:H, k * GB:k * GB + H].set(blkT(w_hh_f, k))
        wh = wh.at[H:2 * H, k * GB + H:k * GB + 2 * H].set(blkT(w_hh_b, k))
        b = b.at[0, k * GB:k * GB + H].set(b_f[k * H:(k + 1) * H])
        b = b.at[0, k * GB + H:k * GB + 2 * H].set(b_b[k * H:(k + 1) * H])
    return {"wx": wx, "wh": wh, "b": b}


def _init_lstm_raw(key, input_dim, hidden_dim):
    k = 1.0 / jnp.sqrt(jnp.float32(hidden_dim))
    keys = jax.random.split(key, 8)

    def u(k_, shape):
        return jax.random.uniform(k_, shape, jnp.float32, -k, k)

    return dict(
        w_ih_f=u(keys[0], (4 * hidden_dim, input_dim)),
        w_hh_f=u(keys[1], (4 * hidden_dim, hidden_dim)),
        b_f=u(keys[2], (4 * hidden_dim,)) + u(keys[3], (4 * hidden_dim,)),
        w_ih_b=u(keys[4], (4 * hidden_dim, input_dim)),
        w_hh_b=u(keys[5], (4 * hidden_dim, hidden_dim)),
        b_b=u(keys[6], (4 * hidden_dim,)) + u(keys[7], (4 * hidden_dim,)),
    )


def init_params(key, input_dim, hidden_dim, output_dim):
    H1, H2 = hidden_dim, 64
    k1, k2, k3, k4, k5 = jax.random.split(key, 5)
    p1 = _pack_bilstm(**_init_lstm_raw(k1, input_dim, H1))
    p2 = _pack_bilstm(**_init_lstm_raw(k2, 2 * H1, H2))

    kfc1 = 1.0 / jnp.sqrt(jnp.float32(2 * H2))
    kfc2 = 1.0 / jnp.sqrt(jnp.float32(32))
    fc1_w = jax.random.uniform(k3, (32, 2 * H2), jnp.float32, -kfc1, kfc1)
    fc1_b = jax.random.uniform(k4, (32,), jnp.float32, -kfc1, kfc1)
    fc2_w = jax.random.uniform(k5, (output_dim, 32), jnp.float32, -kfc2, kfc2)
    fc1_wT = fc1_w.T                       # (2*H2, 32)

    return {
        # Layer 1 (gate blocks padded to 128 lanes)
        "wx1": p1["wx"], "wh1": p1["wh"], "b1": p1["b"],
        # Layer 2, input weights pre-split per direction (no concat in kernel)
        "wx2f": p2["wx"][:H1, :], "wx2b": p2["wx"][H1:2 * H1, :],
        "wh2": p2["wh"], "b2": p2["b"],
        # FC head, fc1 weights pre-split per direction
        "fc1_wT_f": fc1_wT[:H2, :], "fc1_wT_b": fc1_wT[H2:, :],
        "fc1_b2": fc1_b.reshape(1, -1),
        "fc2_wT": fc2_w.T,
    }


# ----------------------------------------------------------------------------
if __name__ == "__main__":
    SEQ, BATCH = 8, 2
    INPUT_DIM, HIDDEN_DIM, OUTPUT_DIM = 16, 32, 8

    key = jax.random.PRNGKey(0)
    k_x, k_p = jax.random.split(key)

    x = jax.random.normal(k_x, (SEQ, BATCH, INPUT_DIM), dtype=jnp.float32)
    params = init_params(k_p, INPUT_DIM, HIDDEN_DIM, OUTPUT_DIM)

    out = jax.jit(lstm_net_forward)(x, params)
    out = jax.block_until_ready(out)
    assert out.shape == (BATCH, OUTPUT_DIM)
    assert jnp.all(jnp.isfinite(out))
    print("KERNEL_OK")
</pallas_src>

<mosaic_0001>
module attributes {stable_mosaic.version = 11 : i64} {
  func.func @lstm_net_kernel(%arg0: memref<16x16xf32, #tpu.memory_space<vmem>>, %arg1: memref<16x512xf32, #tpu.memory_space<vmem>>, %arg2: memref<128x512xf32, #tpu.memory_space<vmem>>, %arg3: memref<1x512xf32, #tpu.memory_space<vmem>>, %arg4: memref<32x512xf32, #tpu.memory_space<vmem>>, %arg5: memref<32x512xf32, #tpu.memory_space<vmem>>, %arg6: memref<128x512xf32, #tpu.memory_space<vmem>>, %arg7: memref<1x512xf32, #tpu.memory_space<vmem>>, %arg8: memref<64x32xf32, #tpu.memory_space<vmem>>, %arg9: memref<64x32xf32, #tpu.memory_space<vmem>>, %arg10: memref<1x32xf32, #tpu.memory_space<vmem>>, %arg11: memref<32x8xf32, #tpu.memory_space<vmem>>, %arg12: memref<2x8xf32, #tpu.memory_space<vmem>>, %arg13: memref<16x32xf32, #tpu.memory_space<vmem>>, %arg14: memref<16x32xf32, #tpu.memory_space<vmem>>) attributes {dimension_semantics = [], scalar_prefetch = 0 : i64, scratch_operands = 2 : i64, tpu.core_type = #tpu.core_type<tc>} {
    %c0 = arith.constant 0 : index
    %c0_0 = arith.constant 0 : index
    %0 = vector.load %arg0[%c0, %c0_0] : memref<16x16xf32, #tpu.memory_space<vmem>>, vector<16x16xf32>
    %c0_1 = arith.constant 0 : index
    %c0_2 = arith.constant 0 : index
    %1 = vector.load %arg1[%c0_1, %c0_2] : memref<16x512xf32, #tpu.memory_space<vmem>>, vector<16x512xf32>
    %cst = arith.constant dense<0.000000e+00> : vector<16x512xf32>
    %2 = tpu.matmul %0, %1, %cst {dimension_numbers = #tpu.dot_dimension_numbers<[1], [0], [0], [1], [0, 0, 1, 1], [], []>} : vector<16x16xf32>, vector<16x512xf32>, vector<16x512xf32> -> vector<16x512xf32>
    %c0_3 = arith.constant 0 : index
    %c0_4 = arith.constant 0 : index
    %3 = vector.load %arg3[%c0_3, %c0_4] : memref<1x512xf32, #tpu.memory_space<vmem>>, vector<1x512xf32>
    %4 = vector.broadcast %3 : vector<1x512xf32> to vector<16x512xf32>
    %5 = arith.addf %2, %4 : vector<16x512xf32>
    %6 = tpu.iota {dimensions = array<i32: 1>} : vector<1x512xi32>
    %c128_i32 = arith.constant 128 : i32
    %c0_i32 = arith.constant 0 : i32
    %7 = arith.cmpi eq, %c128_i32, %c0_i32 : i32
    %c1_i32 = arith.constant 1 : i32
    %8 = arith.select %7, %c1_i32, %c128_i32 : i32
    %9 = vector.broadcast %8 : i32 to vector<1x512xi32>
    %10 = arith.remsi %6, %9 : vector<1x512xi32>
    %c0_i32_5 = arith.constant 0 : i32
    %11 = vector.broadcast %c0_i32_5 : i32 to vector<1x512xi32>
    %12 = arith.cmpi ne, %10, %11 : vector<1x512xi32>
    %c0_i32_6 = arith.constant 0 : i32
    %13 = vector.broadcast %c0_i32_6 : i32 to vector<1x512xi32>
    %14 = arith.cmpi slt, %10, %13 : vector<1x512xi32>
    %c0_i32_7 = arith.constant 0 : i32
    %15 = arith.cmpi slt, %8, %c0_i32_7 : i32
    %16 = vector.broadcast %15 : i1 to vector<1x512xi1>
    %17 = vector.broadcast %16 : vector<1x512xi1> to vector<1x512xi1>
    %18 = arith.xori %14, %17 : vector<1x512xi1>
    %19 = arith.andi %18, %12 : vector<1x512xi1>
    %20 = vector.broadcast %8 : i32 to vector<1x512xi32>
    %21 = arith.addi %10, %20 : vector<1x512xi32>
    %22 = arith.select %19, %21, %10 : vector<1x512xi1>, vector<1x512xi32>
    %c32_i32 = arith.constant 32 : i32
    %23 = vector.broadcast %c32_i32 : i32 to vector<1x512xi32>
    %24 = arith.cmpi slt, %22, %23 : vector<1x512xi32>
    %cst_8 = arith.constant 0.000000e+00 : f32
    %25 = vector.broadcast %cst_8 : f32 to vector<2x128xf32>
    %cst_9 = arith.constant 0.000000e+00 : f32
    %26 = vector.broadcast %cst_9 : f32 to vector<2x128xf32>
    %27 = vector.extract_strided_slice %5 {offsets = [0, 0], sizes = [2, 512], strides = [1, 1]} : vector<16x512xf32> to vector<2x512xf32>
    %28 = vector.extract_strided_slice %5 {offsets = [14, 0], sizes = [2, 512], strides = [1, 1]} : vector<16x512xf32> to vector<2x512xf32>
    %29 = vector.shape_cast %24 : vector<1x512xi1> to vector<1x512xi1>
    %30 = vector.broadcast %29 : vector<1x512xi1> to vector<2x512xi1>
    %31 = arith.select %30, %27, %28 : vector<2x512xi1>, vector<2x512xf32>
    %c0_10 = arith.constant 0 : index
    %c0_11 = arith.constant 0 : index
    %32 = vector.load %arg2[%c0_10, %c0_11] : memref<128x512xf32, #tpu.memory_space<vmem>>, vector<128x512xf32>
    %cst_12 = arith.constant dense<0.000000e+00> : vector<2x512xf32>
    %33 = tpu.matmul %25, %32, %cst_12 {dimension_numbers = #tpu.dot_dimension_numbers<[1], [0], [0], [1], [0, 0, 1, 1], [], []>} : vector<2x128xf32>, vector<128x512xf32>, vector<2x512xf32> -> vector<2x512xf32>
    %34 = arith.addf %31, %33 : vector<2x512xf32>
    %35 = vector.extract_strided_slice %34 {offsets = [0, 0], sizes = [2, 128], strides = [1, 1]} : vector<2x512xf32> to vector<2x128xf32>
    %36 = arith.negf %35 : vector<2x128xf32>
    %37 = math.exp %36 : vector<2x128xf32>
    %cst_13 = arith.constant 1.000000e+00 : f32
    %38 = vector.broadcast %cst_13 : f32 to vector<2x128xf32>
    %39 = arith.addf %38, %37 : vector<2x128xf32>
    %40 = arith.divf %38, %39 : vector<2x128xf32>
    %41 = vector.extract_strided_slice %34 {offsets = [0, 128], sizes = [2, 128], strides = [1, 1]} : vector<2x512xf32> to vector<2x128xf32>
    %42 = arith.negf %41 : vector<2x128xf32>
    %43 = math.exp %42 : vector<2x128xf32>
    %cst_14 = arith.constant 1.000000e+00 : f32
    %44 = vector.broadcast %cst_14 : f32 to vector<2x128xf32>
    %45 = arith.addf %44, %43 : vector<2x128xf32>
    %46 = arith.divf %44, %45 : vector<2x128xf32>
    %47 = vector.extract_strided_slice %34 {offsets = [0, 256], sizes = [2, 128], strides = [1, 1]} : vector<2x512xf32> to vector<2x128xf32>
    %48 = math.tanh %47 : vector<2x128xf32>
    %49 = vector.extract_strided_slice %34 {offsets = [0, 384], sizes = [2, 128], strides = [1, 1]} : vector<2x512xf32> to vector<2x128xf32>
    %50 = arith.negf %49 : vector<2x128xf32>
    %51 = math.exp %50 : vector<2x128xf32>
    %cst_15 = arith.constant 1.000000e+00 : f32
    %52 = vector.broadcast %cst_15 : f32 to vector<2x128xf32>
    %53 = arith.addf %52, %51 : vector<2x128xf32>
    %54 = arith.divf %52, %53 : vector<2x128xf32>
    %55 = arith.mulf %46, %26 : vector<2x128xf32>
    %56 = arith.mulf %40, %48 : vector<2x128xf32>
    %57 = arith.addf %55, %56 : vector<2x128xf32>
    %58 = math.tanh %57 : vector<2x128xf32>
    %59 = arith.mulf %54, %58 : vector<2x128xf32>
    %60 = vector.extract_strided_slice %59 {offsets = [0, 0], sizes = [2, 32], strides = [1, 1]} : vector<2x128xf32> to vector<2x32xf32>
    %c0_16 = arith.constant 0 : index
    %c0_17 = arith.constant 0 : index
    %61 = vector.load %arg13[%c0_16, %c0_17] : memref<16x32xf32, #tpu.memory_space<vmem>>, vector<2x32xf32>
    tpu.vector_store %arg13[%c0_16, %c0_17], %60 {strides = array<i32>} : memref<16x32xf32, #tpu.memory_space<vmem>>, vector<2x32xf32>,
    %62 = vector.extract_strided_slice %59 {offsets = [0, 32], sizes = [2, 32], strides = [1, 1]} : vector<2x128xf32> to vector<2x32xf32>
    %c14 = arith.constant 14 : index
    %c0_18 = arith.constant 0 : index
    %63 = vector.load %arg14[%c14, %c0_18] : memref<16x32xf32, #tpu.memory_space<vmem>>, vector<2x32xf32>
    tpu.vector_store %arg14[%c14, %c0_18], %62 {strides = array<i32>} : memref<16x32xf32, #tpu.memory_space<vmem>>, vector<2x32xf32>,
    %64 = vector.extract_strided_slice %5 {offsets = [2, 0], sizes = [2, 512], strides = [1, 1]} : vector<16x512xf32> to vector<2x512xf32>
    %65 = vector.extract_strided_slice %5 {offsets = [12, 0], sizes = [2, 512], strides = [1, 1]} : vector<16x512xf32> to vector<2x512xf32>
    %66 = vector.shape_cast %24 : vector<1x512xi1> to vector<1x512xi1>
    %67 = vector.broadcast %66 : vector<1x512xi1> to vector<2x512xi1>
    %68 = arith.select %67, %64, %65 : vector<2x512xi1>, vector<2x512xf32>
    %c0_19 = arith.constant 0 : index
    %c0_20 = arith.constant 0 : index
    %69 = vector.load %arg2[%c0_19, %c0_20] : memref<128x512xf32, #tpu.memory_space<vmem>>, vector<128x512xf32>
    %cst_21 = arith.constant dense<0.000000e+00> : vector<2x512xf32>
    %70 = tpu.matmul %59, %69, %cst_21 {dimension_numbers = #tpu.dot_dimension_numbers<[1], [0], [0], [1], [0, 0, 1, 1], [], []>} : vector<2x128xf32>, vector<128x512xf32>, vector<2x512xf32> -> vector<2x512xf32>
    %71 = arith.addf %68, %70 : vector<2x512xf32>
    %72 = vector.extract_strided_slice %71 {offsets = [0, 0], sizes = [2, 128], strides = [1, 1]} : vector<2x512xf32> to vector<2x128xf32>
    %73 = arith.negf %72 : vector<2x128xf32>
    %74 = math.exp %73 : vector<2x128xf32>
    %cst_22 = arith.constant 1.000000e+00 : f32
    %75 = vector.broadcast %cst_22 : f32 to vector<2x128xf32>
    %76 = arith.addf %75, %74 : vector<2x128xf32>
    %77 = arith.divf %75, %76 : vector<2x128xf32>
    %78 = vector.extract_strided_slice %71 {offsets = [0, 128], sizes = [2, 128], strides = [1, 1]} : vector<2x512xf32> to vector<2x128xf32>
    %79 = arith.negf %78 : vector<2x128xf32>
    %80 = math.exp %79 : vector<2x128xf32>
    %cst_23 = arith.constant 1.000000e+00 : f32
    %81 = vector.broadcast %cst_23 : f32 to vector<2x128xf32>
    %82 = arith.addf %81, %80 : vector<2x128xf32>
    %83 = arith.divf %81, %82 : vector<2x128xf32>
    %84 = vector.extract_strided_slice %71 {offsets = [0, 256], sizes = [2, 128], strides = [1, 1]} : vector<2x512xf32> to vector<2x128xf32>
    %85 = math.tanh %84 : vector<2x128xf32>
    %86 = vector.extract_strided_slice %71 {offsets = [0, 384], sizes = [2, 128], strides = [1, 1]} : vector<2x512xf32> to vector<2x128xf32>
    %87 = arith.negf %86 : vector<2x128xf32>
    %88 = math.exp %87 : vector<2x128xf32>
    %cst_24 = arith.constant 1.000000e+00 : f32
    %89 = vector.broadcast %cst_24 : f32 to vector<2x128xf32>
    %90 = arith.addf %89, %88 : vector<2x128xf32>
    %91 = arith.divf %89, %90 : vector<2x128xf32>
    %92 = arith.mulf %83, %57 : vector<2x128xf32>
    %93 = arith.mulf %77, %85 : vector<2x128xf32>
    %94 = arith.addf %92, %93 : vector<2x128xf32>
    %95 = math.tanh %94 : vector<2x128xf32>
    %96 = arith.mulf %91, %95 : vector<2x128xf32>
    %97 = vector.extract_strided_slice %96 {offsets = [0, 0], sizes = [2, 32], strides = [1, 1]} : vector<2x128xf32> to vector<2x32xf32>
    %c2 = arith.constant 2 : index
    %c0_25 = arith.constant 0 : index
    %98 = vector.load %arg13[%c2, %c0_25] : memref<16x32xf32, #tpu.memory_space<vmem>>, vector<2x32xf32>
    tpu.vector_store %arg13[%c2, %c0_25], %97 {strides = array<i32>} : memref<16x32xf32, #tpu.memory_space<vmem>>, vector<2x32xf32>,
    %99 = vector.extract_strided_slice %96 {offsets = [0, 32], sizes = [2, 32], strides = [1, 1]} : vector<2x128xf32> to vector<2x32xf32>
    %c12 = arith.constant 12 : index
    %c0_26 = arith.constant 0 : index
    %100 = vector.load %arg14[%c12, %c0_26] : memref<16x32xf32, #tpu.memory_space<vmem>>, vector<2x32xf32>
    tpu.vector_store %arg14[%c12, %c0_26], %99 {strides = array<i32>} : memref<16x32xf32, #tpu.memory_space<vmem>>, vector<2x32xf32>,
    %101 = vector.extract_strided_slice %5 {offsets = [4, 0], sizes = [2, 512], strides = [1, 1]} : vector<16x512xf32> to vector<2x512xf32>
    %102 = vector.extract_strided_slice %5 {offsets = [10, 0], sizes = [2, 512], strides = [1, 1]} : vector<16x512xf32> to vector<2x512xf32>
    %103 = vector.shape_cast %24 : vector<1x512xi1> to vector<1x512xi1>
    %104 = vector.broadcast %103 : vector<1x512xi1> to vector<2x512xi1>
    %105 = arith.select %104, %101, %102 : vector<2x512xi1>, vector<2x512xf32>
    %c0_27 = arith.constant 0 : index
    %c0_28 = arith.constant 0 : index
    %106 = vector.load %arg2[%c0_27, %c0_28] : memref<128x512xf32, #tpu.memory_space<vmem>>, vector<128x512xf32>
    %cst_29 = arith.constant dense<0.000000e+00> : vector<2x512xf32>
    %107 = tpu.matmul %96, %106, %cst_29 {dimension_numbers = #tpu.dot_dimension_numbers<[1], [0], [0], [1], [0, 0, 1, 1], [], []>} : vector<2x128xf32>, vector<128x512xf32>, vector<2x512xf32> -> vector<2x512xf32>
    %108 = arith.addf %105, %107 : vector<2x512xf32>
    %109 = vector.extract_strided_slice %108 {offsets = [0, 0], sizes = [2, 128], strides = [1, 1]} : vector<2x512xf32> to vector<2x128xf32>
    %110 = arith.negf %109 : vector<2x128xf32>
    %111 = math.exp %110 : vector<2x128xf32>
    %cst_30 = arith.constant 1.000000e+00 : f32
    %112 = vector.broadcast %cst_30 : f32 to vector<2x128xf32>
    %113 = arith.addf %112, %111 : vector<2x128xf32>
    %114 = arith.divf %112, %113 : vector<2x128xf32>
    %115 = vector.extract_strided_slice %108 {offsets = [0, 128], sizes = [2, 128], strides = [1, 1]} : vector<2x512xf32> to vector<2x128xf32>
    %116 = arith.negf %115 : vector<2x128xf32>
    %117 = math.exp %116 : vector<2x128xf32>
    %cst_31 = arith.constant 1.000000e+00 : f32
    %118 = vector.broadcast %cst_31 : f32 to vector<2x128xf32>
    %119 = arith.addf %118, %117 : vector<2x128xf32>
    %120 = arith.divf %118, %119 : vector<2x128xf32>
    %121 = vector.extract_strided_slice %108 {offsets = [0, 256], sizes = [2, 128], strides = [1, 1]} : vector<2x512xf32> to vector<2x128xf32>
    %122 = math.tanh %121 : vector<2x128xf32>
    %123 = vector.extract_strided_slice %108 {offsets = [0, 384], sizes = [2, 128], strides = [1, 1]} : vector<2x512xf32> to vector<2x128xf32>
    %124 = arith.negf %123 : vector<2x128xf32>
    %125 = math.exp %124 : vector<2x128xf32>
    %cst_32 = arith.constant 1.000000e+00 : f32
    %126 = vector.broadcast %cst_32 : f32 to vector<2x128xf32>
    %127 = arith.addf %126, %125 : vector<2x128xf32>
    %128 = arith.divf %126, %127 : vector<2x128xf32>
    %129 = arith.mulf %120, %94 : vector<2x128xf32>
    %130 = arith.mulf %114, %122 : vector<2x128xf32>
    %131 = arith.addf %129, %130 : vector<2x128xf32>
    %132 = math.tanh %131 : vector<2x128xf32>
    %133 = arith.mulf %128, %132 : vector<2x128xf32>
    %134 = vector.extract_strided_slice %133 {offsets = [0, 0], sizes = [2, 32], strides = [1, 1]} : vector<2x128xf32> to vector<2x32xf32>
    %c4 = arith.constant 4 : index
    %c0_33 = arith.constant 0 : index
    %135 = vector.load %arg13[%c4, %c0_33] : memref<16x32xf32, #tpu.memory_space<vmem>>, vector<2x32xf32>
    tpu.vector_store %arg13[%c4, %c0_33], %134 {strides = array<i32>} : memref<16x32xf32, #tpu.memory_space<vmem>>, vector<2x32xf32>,
    %136 = vector.extract_strided_slice %133 {offsets = [0, 32], sizes = [2, 32], strides = [1, 1]} : vector<2x128xf32> to vector<2x32xf32>
    %c10 = arith.constant 10 : index
    %c0_34 = arith.constant 0 : index
    %137 = vector.load %arg14[%c10, %c0_34] : memref<16x32xf32, #tpu.memory_space<vmem>>, vector<2x32xf32>
    tpu.vector_store %arg14[%c10, %c0_34], %136 {strides = array<i32>} : memref<16x32xf32, #tpu.memory_space<vmem>>, vector<2x32xf32>,
    %138 = vector.extract_strided_slice %5 {offsets = [6, 0], sizes = [2, 512], strides = [1, 1]} : vector<16x512xf32> to vector<2x512xf32>
    %139 = vector.extract_strided_slice %5 {offsets = [8, 0], sizes = [2, 512], strides = [1, 1]} : vector<16x512xf32> to vector<2x512xf32>
    %140 = vector.shape_cast %24 : vector<1x512xi1> to vector<1x512xi1>
    %141 = vector.broadcast %140 : vector<1x512xi1> to vector<2x512xi1>
    %142 = arith.select %141, %138, %139 : vector<2x512xi1>, vector<2x512xf32>
    %c0_35 = arith.constant 0 : index
    %c0_36 = arith.constant 0 : index
    %143 = vector.load %arg2[%c0_35, %c0_36] : memref<128x512xf32, #tpu.memory_space<vmem>>, vector<128x512xf32>
    %cst_37 = arith.constant dense<0.000000e+00> : vector<2x512xf32>
    %144 = tpu.matmul %133, %143, %cst_37 {dimension_numbers = #tpu.dot_dimension_numbers<[1], [0], [0], [1], [0, 0, 1, 1], [], []>} : vector<2x128xf32>, vector<128x512xf32>, vector<2x512xf32> -> vector<2x512xf32>
    %145 = arith.addf %142, %144 : vector<2x512xf32>
    %146 = vector.extract_strided_slice %145 {offsets = [0, 0], sizes = [2, 128], strides = [1, 1]} : vector<2x512xf32> to vector<2x128xf32>
    %147 = arith.negf %146 : vector<2x128xf32>
    %148 = math.exp %147 : vector<2x128xf32>
    %cst_38 = arith.constant 1.000000e+00 : f32
    %149 = vector.broadcast %cst_38 : f32 to vector<2x128xf32>
    %150 = arith.addf %149, %148 : vector<2x128xf32>
    %151 = arith.divf %149, %150 : vector<2x128xf32>
    %152 = vector.extract_strided_slice %145 {offsets = [0, 128], sizes = [2, 128], strides = [1, 1]} : vector<2x512xf32> to vector<2x128xf32>
    %153 = arith.negf %152 : vector<2x128xf32>
    %154 = math.exp %153 : vector<2x128xf32>
    %cst_39 = arith.constant 1.000000e+00 : f32
    %155 = vector.broadcast %cst_39 : f32 to vector<2x128xf32>
    %156 = arith.addf %155, %154 : vector<2x128xf32>
    %157 = arith.divf %155, %156 : vector<2x128xf32>
    %158 = vector.extract_strided_slice %145 {offsets = [0, 256], sizes = [2, 128], strides = [1, 1]} : vector<2x512xf32> to vector<2x128xf32>
    %159 = math.tanh %158 : vector<2x128xf32>
    %160 = vector.extract_strided_slice %145 {offsets = [0, 384], sizes = [2, 128], strides = [1, 1]} : vector<2x512xf32> to vector<2x128xf32>
    %161 = arith.negf %160 : vector<2x128xf32>
    %162 = math.exp %161 : vector<2x128xf32>
    %cst_40 = arith.constant 1.000000e+00 : f32
    %163 = vector.broadcast %cst_40 : f32 to vector<2x128xf32>
    %164 = arith.addf %163, %162 : vector<2x128xf32>
    %165 = arith.divf %163, %164 : vector<2x128xf32>
    %166 = arith.mulf %157, %131 : vector<2x128xf32>
    %167 = arith.mulf %151, %159 : vector<2x128xf32>
    %168 = arith.addf %166, %167 : vector<2x128xf32>
    %169 = math.tanh %168 : vector<2x128xf32>
    %170 = arith.mulf %165, %169 : vector<2x128xf32>
    %171 = vector.extract_strided_slice %170 {offsets = [0, 0], sizes = [2, 32], strides = [1, 1]} : vector<2x128xf32> to vector<2x32xf32>
    %c6 = arith.constant 6 : index
    %c0_41 = arith.constant 0 : index
    %172 = vector.load %arg13[%c6, %c0_41] : memref<16x32xf32, #tpu.memory_space<vmem>>, vector<2x32xf32>
    tpu.vector_store %arg13[%c6, %c0_41], %171 {strides = array<i32>} : memref<16x32xf32, #tpu.memory_space<vmem>>, vector<2x32xf32>,
    %173 = vector.extract_strided_slice %170 {offsets = [0, 32], sizes = [2, 32], strides = [1, 1]} : vector<2x128xf32> to vector<2x32xf32>
    %c8 = arith.constant 8 : index
    %c0_42 = arith.constant 0 : index
    %174 = vector.load %arg14[%c8, %c0_42] : memref<16x32xf32, #tpu.memory_space<vmem>>, vector<2x32xf32>
    tpu.vector_store %arg14[%c8, %c0_42], %173 {strides = array<i32>} : memref<16x32xf32, #tpu.memory_space<vmem>>, vector<2x32xf32>,
    %175 = vector.extract_strided_slice %5 {offsets = [8, 0], sizes = [2, 512], strides = [1, 1]} : vector<16x512xf32> to vector<2x512xf32>
    %176 = vector.extract_strided_slice %5 {offsets = [6, 0], sizes = [2, 512], strides = [1, 1]} : vector<16x512xf32> to vector<2x512xf32>
    %177 = vector.shape_cast %24 : vector<1x512xi1> to vector<1x512xi1>
    %178 = vector.broadcast %177 : vector<1x512xi1> to vector<2x512xi1>
    %179 = arith.select %178, %175, %176 : vector<2x512xi1>, vector<2x512xf32>
    %c0_43 = arith.constant 0 : index
    %c0_44 = arith.constant 0 : index
    %180 = vector.load %arg2[%c0_43, %c0_44] : memref<128x512xf32, #tpu.memory_space<vmem>>, vector<128x512xf32>
    %cst_45 = arith.constant dense<0.000000e+00> : vector<2x512xf32>
    %181 = tpu.matmul %170, %180, %cst_45 {dimension_numbers = #tpu.dot_dimension_numbers<[1], [0], [0], [1], [0, 0, 1, 1], [], []>} : vector<2x128xf32>, vector<128x512xf32>, vector<2x512xf32> -> vector<2x512xf32>
    %182 = arith.addf %179, %181 : vector<2x512xf32>
    %183 = vector.extract_strided_slice %182 {offsets = [0, 0], sizes = [2, 128], strides = [1, 1]} : vector<2x512xf32> to vector<2x128xf32>
    %184 = arith.negf %183 : vector<2x128xf32>
    %185 = math.exp %184 : vector<2x128xf32>
    %cst_46 = arith.constant 1.000000e+00 : f32
    %186 = vector.broadcast %cst_46 : f32 to vector<2x128xf32>
    %187 = arith.addf %186, %185 : vector<2x128xf32>
    %188 = arith.divf %186, %187 : vector<2x128xf32>
    %189 = vector.extract_strided_slice %182 {offsets = [0, 128], sizes = [2, 128], strides = [1, 1]} : vector<2x512xf32> to vector<2x128xf32>
    %190 = arith.negf %189 : vector<2x128xf32>
    %191 = math.exp %190 : vector<2x128xf32>
    %cst_47 = arith.constant 1.000000e+00 : f32
    %192 = vector.broadcast %cst_47 : f32 to vector<2x128xf32>
    %193 = arith.addf %192, %191 : vector<2x128xf32>
    %194 = arith.divf %192, %193 : vector<2x128xf32>
    %195 = vector.extract_strided_slice %182 {offsets = [0, 256], sizes = [2, 128], strides = [1, 1]} : vector<2x512xf32> to vector<2x128xf32>
    %196 = math.tanh %195 : vector<2x128xf32>
    %197 = vector.extract_strided_slice %182 {offsets = [0, 384], sizes = [2, 128], strides = [1, 1]} : vector<2x512xf32> to vector<2x128xf32>
    %198 = arith.negf %197 : vector<2x128xf32>
    %199 = math.exp %198 : vector<2x128xf32>
    %cst_48 = arith.constant 1.000000e+00 : f32
    %200 = vector.broadcast %cst_48 : f32 to vector<2x128xf32>
    %201 = arith.addf %200, %199 : vector<2x128xf32>
    %202 = arith.divf %200, %201 : vector<2x128xf32>
    %203 = arith.mulf %194, %168 : vector<2x128xf32>
    %204 = arith.mulf %188, %196 : vector<2x128xf32>
    %205 = arith.addf %203, %204 : vector<2x128xf32>
    %206 = math.tanh %205 : vector<2x128xf32>
    %207 = arith.mulf %202, %206 : vector<2x128xf32>
    %208 = vector.extract_strided_slice %207 {offsets = [0, 0], sizes = [2, 32], strides = [1, 1]} : vector<2x128xf32> to vector<2x32xf32>
    %c8_49 = arith.constant 8 : index
    %c0_50 = arith.constant 0 : index
    %209 = vector.load %arg13[%c8_49, %c0_50] : memref<16x32xf32, #tpu.memory_space<vmem>>, vector<2x32xf32>
    tpu.vector_store %arg13[%c8_49, %c0_50], %208 {strides = array<i32>} : memref<16x32xf32, #tpu.memory_space<vmem>>, vector<2x32xf32>,
    %210 = vector.extract_strided_slice %207 {offsets = [0, 32], sizes = [2, 32], strides = [1, 1]} : vector<2x128xf32> to vector<2x32xf32>
    %c6_51 = arith.constant 6 : index
    %c0_52 = arith.constant 0 : index
    %211 = vector.load %arg14[%c6_51, %c0_52] : memref<16x32xf32, #tpu.memory_space<vmem>>, vector<2x32xf32>
    tpu.vector_store %arg14[%c6_51, %c0_52], %210 {strides = array<i32>} : memref<16x32xf32, #tpu.memory_space<vmem>>, vector<2x32xf32>,
    %212 = vector.extract_strided_slice %5 {offsets = [10, 0], sizes = [2, 512], strides = [1, 1]} : vector<16x512xf32> to vector<2x512xf32>
    %213 = vector.extract_strided_slice %5 {offsets = [4, 0], sizes = [2, 512], strides = [1, 1]} : vector<16x512xf32> to vector<2x512xf32>
    %214 = vector.shape_cast %24 : vector<1x512xi1> to vector<1x512xi1>
    %215 = vector.broadcast %214 : vector<1x512xi1> to vector<2x512xi1>
    %216 = arith.select %215, %212, %213 : vector<2x512xi1>, vector<2x512xf32>
    %c0_53 = arith.constant 0 : index
    %c0_54 = arith.constant 0 : index
    %217 = vector.load %arg2[%c0_53, %c0_54] : memref<128x512xf32, #tpu.memory_space<vmem>>, vector<128x512xf32>
    %cst_55 = arith.constant dense<0.000000e+00> : vector<2x512xf32>
    %218 = tpu.matmul %207, %217, %cst_55 {dimension_numbers = #tpu.dot_dimension_numbers<[1], [0], [0], [1], [0, 0, 1, 1], [], []>} : vector<2x128xf32>, vector<128x512xf32>, vector<2x512xf32> -> vector<2x512xf32>
    %219 = arith.addf %216, %218 : vector<2x512xf32>
    %220 = vector.extract_strided_slice %219 {offsets = [0, 0], sizes = [2, 128], strides = [1, 1]} : vector<2x512xf32> to vector<2x128xf32>
    %221 = arith.negf %220 : vector<2x128xf32>
    %222 = math.exp %221 : vector<2x128xf32>
    %cst_56 = arith.constant 1.000000e+00 : f32
    %223 = vector.broadcast %cst_56 : f32 to vector<2x128xf32>
    %224 = arith.addf %223, %222 : vector<2x128xf32>
    %225 = arith.divf %223, %224 : vector<2x128xf32>
    %226 = vector.extract_strided_slice %219 {offsets = [0, 128], sizes = [2, 128], strides = [1, 1]} : vector<2x512xf32> to vector<2x128xf32>
    %227 = arith.negf %226 : vector<2x128xf32>
    %228 = math.exp %227 : vector<2x128xf32>
    %cst_57 = arith.constant 1.000000e+00 : f32
    %229 = vector.broadcast %cst_57 : f32 to vector<2x128xf32>
    %230 = arith.addf %229, %228 : vector<2x128xf32>
    %231 = arith.divf %229, %230 : vector<2x128xf32>
    %232 = vector.extract_strided_slice %219 {offsets = [0, 256], sizes = [2, 128], strides = [1, 1]} : vector<2x512xf32> to vector<2x128xf32>
    %233 = math.tanh %232 : vector<2x128xf32>
    %234 = vector.extract_strided_slice %219 {offsets = [0, 384], sizes = [2, 128], strides = [1, 1]} : vector<2x512xf32> to vector<2x128xf32>
    %235 = arith.negf %234 : vector<2x128xf32>
    %236 = math.exp %235 : vector<2x128xf32>
    %cst_58 = arith.constant 1.000000e+00 : f32
    %237 = vector.broadcast %cst_58 : f32 to vector<2x128xf32>
    %238 = arith.addf %237, %236 : vector<2x128xf32>
    %239 = arith.divf %237, %238 : vector<2x128xf32>
    %240 = arith.mulf %231, %205 : vector<2x128xf32>
    %241 = arith.mulf %225, %233 : vector<2x128xf32>
    %242 = arith.addf %240, %241 : vector<2x128xf32>
    %243 = math.tanh %242 : vector<2x128xf32>
    %244 = arith.mulf %239, %243 : vector<2x128xf32>
    %245 = vector.extract_strided_slice %244 {offsets = [0, 0], sizes = [2, 32], strides = [1, 1]} : vector<2x128xf32> to vector<2x32xf32>
    %c10_59 = arith.constant 10 : index
    %c0_60 = arith.constant 0 : index
    %246 = vector.load %arg13[%c10_59, %c0_60] : memref<16x32xf32, #tpu.memory_space<vmem>>, vector<2x32xf32>
    tpu.vector_store %arg13[%c10_59, %c0_60], %245 {strides = array<i32>} : memref<16x32xf32, #tpu.memory_space<vmem>>, vector<2x32xf32>,
    %247 = vector.extract_strided_slice %244 {offsets = [0, 32], sizes = [2, 32], strides = [1, 1]} : vector<2x128xf32> to vector<2x32xf32>
    %c4_61 = arith.constant 4 : index
    %c0_62 = arith.constant 0 : index
    %248 = vector.load %arg14[%c4_61, %c0_62] : memref<16x32xf32, #tpu.memory_space<vmem>>, vector<2x32xf32>
    tpu.vector_store %arg14[%c4_61, %c0_62], %247 {strides = array<i32>} : memref<16x32xf32, #tpu.memory_space<vmem>>, vector<2x32xf32>,
    %249 = vector.extract_strided_slice %5 {offsets = [12, 0], sizes = [2, 512], strides = [1, 1]} : vector<16x512xf32> to vector<2x512xf32>
    %250 = vector.extract_strided_slice %5 {offsets = [2, 0], sizes = [2, 512], strides = [1, 1]} : vector<16x512xf32> to vector<2x512xf32>
    %251 = vector.shape_cast %24 : vector<1x512xi1> to vector<1x512xi1>
    %252 = vector.broadcast %251 : vector<1x512xi1> to vector<2x512xi1>
    %253 = arith.select %252, %249, %250 : vector<2x512xi1>, vector<2x512xf32>
    %c0_63 = arith.constant 0 : index
    %c0_64 = arith.constant 0 : index
    %254 = vector.load %arg2[%c0_63, %c0_64] : memref<128x512xf32, #tpu.memory_space<vmem>>, vector<128x512xf32>
    %cst_65 = arith.constant dense<0.000000e+00> : vector<2x512xf32>
    %255 = tpu.matmul %244, %254, %cst_65 {dimension_numbers = #tpu.dot_dimension_numbers<[1], [0], [0], [1], [0, 0, 1, 1], [], []>} : vector<2x128xf32>, vector<128x512xf32>, vector<2x512xf32> -> vector<2x512xf32>
    %256 = arith.addf %253, %255 : vector<2x512xf32>
    %257 = vector.extract_strided_slice %256 {offsets = [0, 0], sizes = [2, 128], strides = [1, 1]} : vector<2x512xf32> to vector<2x128xf32>
    %258 = arith.negf %257 : vector<2x128xf32>
    %259 = math.exp %258 : vector<2x128xf32>
    %cst_66 = arith.constant 1.000000e+00 : f32
    %260 = vector.broadcast %cst_66 : f32 to vector<2x128xf32>
    %261 = arith.addf %260, %259 : vector<2x128xf32>
    %262 = arith.divf %260, %261 : vector<2x128xf32>
    %263 = vector.extract_strided_slice %256 {offsets = [0, 128], sizes = [2, 128], strides = [1, 1]} : vector<2x512xf32> to vector<2x128xf32>
    %264 = arith.negf %263 : vector<2x128xf32>
    %265 = math.exp %264 : vector<2x128xf32>
    %cst_67 = arith.constant 1.000000e+00 : f32
    %266 = vector.broadcast %cst_67 : f32 to vector<2x128xf32>
    %267 = arith.addf %266, %265 : vector<2x128xf32>
    %268 = arith.divf %266, %267 : vector<2x128xf32>
    %269 = vector.extract_strided_slice %256 {offsets = [0, 256], sizes = [2, 128], strides = [1, 1]} : vector<2x512xf32> to vector<2x128xf32>
    %270 = math.tanh %269 : vector<2x128xf32>
    %271 = vector.extract_strided_slice %256 {offsets = [0, 384], sizes = [2, 128], strides = [1, 1]} : vector<2x512xf32> to vector<2x128xf32>
    %272 = arith.negf %271 : vector<2x128xf32>
    %273 = math.exp %272 : vector<2x128xf32>
    %cst_68 = arith.constant 1.000000e+00 : f32
    %274 = vector.broadcast %cst_68 : f32 to vector<2x128xf32>
    %275 = arith.addf %274, %273 : vector<2x128xf32>
    %276 = arith.divf %274, %275 : vector<2x128xf32>
    %277 = arith.mulf %268, %242 : vector<2x128xf32>
    %278 = arith.mulf %262, %270 : vector<2x128xf32>
    %279 = arith.addf %277, %278 : vector<2x128xf32>
    %280 = math.tanh %279 : vector<2x128xf32>
    %281 = arith.mulf %276, %280 : vector<2x128xf32>
    %282 = vector.extract_strided_slice %281 {offsets = [0, 0], sizes = [2, 32], strides = [1, 1]} : vector<2x128xf32> to vector<2x32xf32>
    %c12_69 = arith.constant 12 : index
    %c0_70 = arith.constant 0 : index
    %283 = vector.load %arg13[%c12_69, %c0_70] : memref<16x32xf32, #tpu.memory_space<vmem>>, vector<2x32xf32>
    tpu.vector_store %arg13[%c12_69, %c0_70], %282 {strides = array<i32>} : memref<16x32xf32, #tpu.memory_space<vmem>>, vector<2x32xf32>,
    %284 = vector.extract_strided_slice %281 {offsets = [0, 32], sizes = [2, 32], strides = [1, 1]} : vector<2x128xf32> to vector<2x32xf32>
    %c2_71 = arith.constant 2 : index
    %c0_72 = arith.constant 0 : index
    %285 = vector.load %arg14[%c2_71, %c0_72] : memref<16x32xf32, #tpu.memory_space<vmem>>, vector<2x32xf32>
    tpu.vector_store %arg14[%c2_71, %c0_72], %284 {strides = array<i32>} : memref<16x32xf32, #tpu.memory_space<vmem>>, vector<2x32xf32>,
    %286 = vector.extract_strided_slice %5 {offsets = [14, 0], sizes = [2, 512], strides = [1, 1]} : vector<16x512xf32> to vector<2x512xf32>
    %287 = vector.extract_strided_slice %5 {offsets = [0, 0], sizes = [2, 512], strides = [1, 1]} : vector<16x512xf32> to vector<2x512xf32>
    %288 = vector.shape_cast %24 : vector<1x512xi1> to vector<1x512xi1>
    %289 = vector.broadcast %288 : vector<1x512xi1> to vector<2x512xi1>
    %290 = arith.select %289, %286, %287 : vector<2x512xi1>, vector<2x512xf32>
    %c0_73 = arith.constant 0 : index
    %c0_74 = arith.constant 0 : index
    %291 = vector.load %arg2[%c0_73, %c0_74] : memref<128x512xf32, #tpu.memory_space<vmem>>, vector<128x512xf32>
    %cst_75 = arith.constant dense<0.000000e+00> : vector<2x512xf32>
    %292 = tpu.matmul %281, %291, %cst_75 {dimension_numbers = #tpu.dot_dimension_numbers<[1], [0], [0], [1], [0, 0, 1, 1], [], []>} : vector<2x128xf32>, vector<128x512xf32>, vector<2x512xf32> -> vector<2x512xf32>
    %293 = arith.addf %290, %292 : vector<2x512xf32>
    %294 = vector.extract_strided_slice %293 {offsets = [0, 0], sizes = [2, 128], strides = [1, 1]} : vector<2x512xf32> to vector<2x128xf32>
    %295 = arith.negf %294 : vector<2x128xf32>
    %296 = math.exp %295 : vector<2x128xf32>
    %cst_76 = arith.constant 1.000000e+00 : f32
    %297 = vector.broadcast %cst_76 : f32 to vector<2x128xf32>
    %298 = arith.addf %297, %296 : vector<2x128xf32>
    %299 = arith.divf %297, %298 : vector<2x128xf32>
    %300 = vector.extract_strided_slice %293 {offsets = [0, 128], sizes = [2, 128], strides = [1, 1]} : vector<2x512xf32> to vector<2x128xf32>
    %301 = arith.negf %300 : vector<2x128xf32>
    %302 = math.exp %301 : vector<2x128xf32>
    %cst_77 = arith.constant 1.000000e+00 : f32
    %303 = vector.broadcast %cst_77 : f32 to vector<2x128xf32>
    %304 = arith.addf %303, %302 : vector<2x128xf32>
    %305 = arith.divf %303, %304 : vector<2x128xf32>
    %306 = vector.extract_strided_slice %293 {offsets = [0, 256], sizes = [2, 128], strides = [1, 1]} : vector<2x512xf32> to vector<2x128xf32>
    %307 = math.tanh %306 : vector<2x128xf32>
    %308 = vector.extract_strided_slice %293 {offsets = [0, 384], sizes = [2, 128], strides = [1, 1]} : vector<2x512xf32> to vector<2x128xf32>
    %309 = arith.negf %308 : vector<2x128xf32>
    %310 = math.exp %309 : vector<2x128xf32>
    %cst_78 = arith.constant 1.000000e+00 : f32
    %311 = vector.broadcast %cst_78 : f32 to vector<2x128xf32>
    %312 = arith.addf %311, %310 : vector<2x128xf32>
    %313 = arith.divf %311, %312 : vector<2x128xf32>
    %314 = arith.mulf %305, %279 : vector<2x128xf32>
    %315 = arith.mulf %299, %307 : vector<2x128xf32>
    %316 = arith.addf %314, %315 : vector<2x128xf32>
    %317 = math.tanh %316 : vector<2x128xf32>
    %318 = arith.mulf %313, %317 : vector<2x128xf32>
    %319 = vector.extract_strided_slice %318 {offsets = [0, 0], sizes = [2, 32], strides = [1, 1]} : vector<2x128xf32> to vector<2x32xf32>
    %c14_79 = arith.constant 14 : index
    %c0_80 = arith.constant 0 : index
    %320 = vector.load %arg13[%c14_79, %c0_80] : memref<16x32xf32, #tpu.memory_space<vmem>>, vector<2x32xf32>
    tpu.vector_store %arg13[%c14_79, %c0_80], %319 {strides = array<i32>} : memref<16x32xf32, #tpu.memory_space<vmem>>, vector<2x32xf32>,
    %321 = vector.extract_strided_slice %318 {offsets = [0, 32], sizes = [2, 32], strides = [1, 1]} : vector<2x128xf32> to vector<2x32xf32>
    %c0_81 = arith.constant 0 : index
    %c0_82 = arith.constant 0 : index
    %322 = vector.load %arg14[%c0_81, %c0_82] : memref<16x32xf32, #tpu.memory_space<vmem>>, vector<2x32xf32>
    tpu.vector_store %arg14[%c0_81, %c0_82], %321 {strides = array<i32>} : memref<16x32xf32, #tpu.memory_space<vmem>>, vector<2x32xf32>,
    %c0_83 = arith.constant 0 : index
    %c0_84 = arith.constant 0 : index
    %323 = vector.load %arg13[%c0_83, %c0_84] : memref<16x32xf32, #tpu.memory_space<vmem>>, vector<16x32xf32>
    %c0_85 = arith.constant 0 : index
    %c0_86 = arith.constant 0 : index
    %324 = vector.load %arg4[%c0_85, %c0_86] : memref<32x512xf32, #tpu.memory_space<vmem>>, vector<32x512xf32>
    %cst_87 = arith.constant dense<0.000000e+00> : vector<16x512xf32>
    %325 = tpu.matmul %323, %324, %cst_87 {dimension_numbers = #tpu.dot_dimension_numbers<[1], [0], [0], [1], [0, 0, 1, 1], [], []>} : vector<16x32xf32>, vector<32x512xf32>, vector<16x512xf32> -> vector<16x512xf32>
    %c0_88 = arith.constant 0 : index
    %c0_89 = arith.constant 0 : index
    %326 = vector.load %arg14[%c0_88, %c0_89] : memref<16x32xf32, #tpu.memory_space<vmem>>, vector<16x32xf32>
    %c0_90 = arith.constant 0 : index
    %c0_91 = arith.constant 0 : index
    %327 = vector.load %arg5[%c0_90, %c0_91] : memref<32x512xf32, #tpu.memory_space<vmem>>, vector<32x512xf32>
    %cst_92 = arith.constant dense<0.000000e+00> : vector<16x512xf32>
    %328 = tpu.matmul %326, %327, %cst_92 {dimension_numbers = #tpu.dot_dimension_numbers<[1], [0], [0], [1], [0, 0, 1, 1], [], []>} : vector<16x32xf32>, vector<32x512xf32>, vector<16x512xf32> -> vector<16x512xf32>
    %329 = arith.addf %325, %328 : vector<16x512xf32>
    %c0_93 = arith.constant 0 : index
    %c0_94 = arith.constant 0 : index
    %330 = vector.load %arg7[%c0_93, %c0_94] : memref<1x512xf32, #tpu.memory_space<vmem>>, vector<1x512xf32>
    %331 = vector.broadcast %330 : vector<1x512xf32> to vector<16x512xf32>
    %332 = arith.addf %329, %331 : vector<16x512xf32>
    %333 = tpu.iota {dimensions = array<i32: 1>} : vector<1x512xi32>
    %c128_i32_95 = arith.constant 128 : i32
    %c0_i32_96 = arith.constant 0 : i32
    %334 = arith.cmpi eq, %c128_i32_95, %c0_i32_96 : i32
    %c1_i32_97 = arith.constant 1 : i32
    %335 = arith.select %334, %c1_i32_97, %c128_i32_95 : i32
    %336 = vector.broadcast %335 : i32 to vector<1x512xi32>
    %337 = arith.remsi %333, %336 : vector<1x512xi32>
    %c0_i32_98 = arith.constant 0 : i32
    %338 = vector.broadcast %c0_i32_98 : i32 to vector<1x512xi32>
    %339 = arith.cmpi ne, %337, %338 : vector<1x512xi32>
    %c0_i32_99 = arith.constant 0 : i32
    %340 = vector.broadcast %c0_i32_99 : i32 to vector<1x512xi32>
    %341 = arith.cmpi slt, %337, %340 : vector<1x512xi32>
    %c0_i32_100 = arith.constant 0 : i32
    %342 = arith.cmpi slt, %335, %c0_i32_100 : i32
    %343 = vector.broadcast %342 : i1 to vector<1x512xi1>
    %344 = vector.broadcast %343 : vector<1x512xi1> to vector<1x512xi1>
    %345 = arith.xori %341, %344 : vector<1x512xi1>
    %346 = arith.andi %345, %339 : vector<1x512xi1>
    %347 = vector.broadcast %335 : i32 to vector<1x512xi32>
    %348 = arith.addi %337, %347 : vector<1x512xi32>
    %349 = arith.select %346, %348, %337 : vector<1x512xi1>, vector<1x512xi32>
    %c64_i32 = arith.constant 64 : i32
    %350 = vector.broadcast %c64_i32 : i32 to vector<1x512xi32>
    %351 = arith.cmpi slt, %349, %350 : vector<1x512xi32>
    %cst_101 = arith.constant 0.000000e+00 : f32
    %352 = vector.broadcast %cst_101 : f32 to vector<2x128xf32>
    %cst_102 = arith.constant 0.000000e+00 : f32
    %353 = vector.broadcast %cst_102 : f32 to vector<2x128xf32>
    %354 = vector.extract_strided_slice %332 {offsets = [0, 0], sizes = [2, 512], strides = [1, 1]} : vector<16x512xf32> to vector<2x512xf32>
    %355 = vector.extract_strided_slice %332 {offsets = [14, 0], sizes = [2, 512], strides = [1, 1]} : vector<16x512xf32> to vector<2x512xf32>
    %356 = vector.shape_cast %351 : vector<1x512xi1> to vector<1x512xi1>
    %357 = vector.broadcast %356 : vector<1x512xi1> to vector<2x512xi1>
    %358 = arith.select %357, %354, %355 : vector<2x512xi1>, vector<2x512xf32>
    %c0_103 = arith.constant 0 : index
    %c0_104 = arith.constant 0 : index
    %359 = vector.load %arg6[%c0_103, %c0_104] : memref<128x512xf32, #tpu.memory_space<vmem>>, vector<128x512xf32>
    %cst_105 = arith.constant dense<0.000000e+00> : vector<2x512xf32>
    %360 = tpu.matmul %352, %359, %cst_105 {dimension_numbers = #tpu.dot_dimension_numbers<[1], [0], [0], [1], [0, 0, 1, 1], [], []>} : vector<2x128xf32>, vector<128x512xf32>, vector<2x512xf32> -> vector<2x512xf32>
    %361 = arith.addf %358, %360 : vector<2x512xf32>
    %362 = vector.extract_strided_slice %361 {offsets = [0, 0], sizes = [2, 128], strides = [1, 1]} : vector<2x512xf32> to vector<2x128xf32>
    %363 = arith.negf %362 : vector<2x128xf32>
    %364 = math.exp %363 : vector<2x128xf32>
    %cst_106 = arith.constant 1.000000e+00 : f32
    %365 = vector.broadcast %cst_106 : f32 to vector<2x128xf32>
    %366 = arith.addf %365, %364 : vector<2x128xf32>
    %367 = arith.divf %365, %366 : vector<2x128xf32>
    %368 = vector.extract_strided_slice %361 {offsets = [0, 128], sizes = [2, 128], strides = [1, 1]} : vector<2x512xf32> to vector<2x128xf32>
    %369 = arith.negf %368 : vector<2x128xf32>
    %370 = math.exp %369 : vector<2x128xf32>
    %cst_107 = arith.constant 1.000000e+00 : f32
    %371 = vector.broadcast %cst_107 : f32 to vector<2x128xf32>
    %372 = arith.addf %371, %370 : vector<2x128xf32>
    %373 = arith.divf %371, %372 : vector<2x128xf32>
    %374 = vector.extract_strided_slice %361 {offsets = [0, 256], sizes = [2, 128], strides = [1, 1]} : vector<2x512xf32> to vector<2x128xf32>
    %375 = math.tanh %374 : vector<2x128xf32>
    %376 = vector.extract_strided_slice %361 {offsets = [0, 384], sizes = [2, 128], strides = [1, 1]} : vector<2x512xf32> to vector<2x128xf32>
    %377 = arith.negf %376 : vector<2x128xf32>
    %378 = math.exp %377 : vector<2x128xf32>
    %cst_108 = arith.constant 1.000000e+00 : f32
    %379 = vector.broadcast %cst_108 : f32 to vector<2x128xf32>
    %380 = arith.addf %379, %378 : vector<2x128xf32>
    %381 = arith.divf %379, %380 : vector<2x128xf32>
    %382 = arith.mulf %373, %353 : vector<2x128xf32>
    %383 = arith.mulf %367, %375 : vector<2x128xf32>
    %384 = arith.addf %382, %383 : vector<2x128xf32>
    %385 = math.tanh %384 : vector<2x128xf32>
    %386 = arith.mulf %381, %385 : vector<2x128xf32>
    %387 = vector.extract_strided_slice %386 {offsets = [0, 64], sizes = [2, 64], strides = [1, 1]} : vector<2x128xf32> to vector<2x64xf32>
    %388 = vector.extract_strided_slice %332 {offsets = [2, 0], sizes = [2, 512], strides = [1, 1]} : vector<16x512xf32> to vector<2x512xf32>
    %389 = vector.extract_strided_slice %332 {offsets = [12, 0], sizes = [2, 512], strides = [1, 1]} : vector<16x512xf32> to vector<2x512xf32>
    %390 = vector.shape_cast %351 : vector<1x512xi1> to vector<1x512xi1>
    %391 = vector.broadcast %390 : vector<1x512xi1> to vector<2x512xi1>
    %392 = arith.select %391, %388, %389 : vector<2x512xi1>, vector<2x512xf32>
    %c0_109 = arith.constant 0 : index
    %c0_110 = arith.constant 0 : index
    %393 = vector.load %arg6[%c0_109, %c0_110] : memref<128x512xf32, #tpu.memory_space<vmem>>, vector<128x512xf32>
    %cst_111 = arith.constant dense<0.000000e+00> : vector<2x512xf32>
    %394 = tpu.matmul %386, %393, %cst_111 {dimension_numbers = #tpu.dot_dimension_numbers<[1], [0], [0], [1], [0, 0, 1, 1], [], []>} : vector<2x128xf32>, vector<128x512xf32>, vector<2x512xf32> -> vector<2x512xf32>
    %395 = arith.addf %392, %394 : vector<2x512xf32>
    %396 = vector.extract_strided_slice %395 {offsets = [0, 0], sizes = [2, 128], strides = [1, 1]} : vector<2x512xf32> to vector<2x128xf32>
    %397 = arith.negf %396 : vector<2x128xf32>
    %398 = math.exp %397 : vector<2x128xf32>
    %cst_112 = arith.constant 1.000000e+00 : f32
    %399 = vector.broadcast %cst_112 : f32 to vector<2x128xf32>
    %400 = arith.addf %399, %398 : vector<2x128xf32>
    %401 = arith.divf %399, %400 : vector<2x128xf32>
    %402 = vector.extract_strided_slice %395 {offsets = [0, 128], sizes = [2, 128], strides = [1, 1]} : vector<2x512xf32> to vector<2x128xf32>
    %403 = arith.negf %402 : vector<2x128xf32>
    %404 = math.exp %403 : vector<2x128xf32>
    %cst_113 = arith.constant 1.000000e+00 : f32
    %405 = vector.broadcast %cst_113 : f32 to vector<2x128xf32>
    %406 = arith.addf %405, %404 : vector<2x128xf32>
    %407 = arith.divf %405, %406 : vector<2x128xf32>
    %408 = vector.extract_strided_slice %395 {offsets = [0, 256], sizes = [2, 128], strides = [1, 1]} : vector<2x512xf32> to vector<2x128xf32>
    %409 = math.tanh %408 : vector<2x128xf32>
    %410 = vector.extract_strided_slice %395 {offsets = [0, 384], sizes = [2, 128], strides = [1, 1]} : vector<2x512xf32> to vector<2x128xf32>
    %411 = arith.negf %410 : vector<2x128xf32>
    %412 = math.exp %411 : vector<2x128xf32>
    %cst_114 = arith.constant 1.000000e+00 : f32
    %413 = vector.broadcast %cst_114 : f32 to vector<2x128xf32>
    %414 = arith.addf %413, %412 : vector<2x128xf32>
    %415 = arith.divf %413, %414 : vector<2x128xf32>
    %416 = arith.mulf %407, %384 : vector<2x128xf32>
    %417 = arith.mulf %401, %409 : vector<2x128xf32>
    %418 = arith.addf %416, %417 : vector<2x128xf32>
    %419 = math.tanh %418 : vector<2x128xf32>
    %420 = arith.mulf %415, %419 : vector<2x128xf32>
    %421 = vector.extract_strided_slice %332 {offsets = [4, 0], sizes = [2, 512], strides = [1, 1]} : vector<16x512xf32> to vector<2x512xf32>
    %422 = vector.extract_strided_slice %332 {offsets = [10, 0], sizes = [2, 512], strides = [1, 1]} : vector<16x512xf32> to vector<2x512xf32>
    %423 = vector.shape_cast %351 : vector<1x512xi1> to vector<1x512xi1>
    %424 = vector.broadcast %423 : vector<1x512xi1> to vector<2x512xi1>
    %425 = arith.select %424, %421, %422 : vector<2x512xi1>, vector<2x512xf32>
    %c0_115 = arith.constant 0 : index
    %c0_116 = arith.constant 0 : index
    %426 = vector.load %arg6[%c0_115, %c0_116] : memref<128x512xf32, #tpu.memory_space<vmem>>, vector<128x512xf32>
    %cst_117 = arith.constant dense<0.000000e+00> : vector<2x512xf32>
    %427 = tpu.matmul %420, %426, %cst_117 {dimension_numbers = #tpu.dot_dimension_numbers<[1], [0], [0], [1], [0, 0, 1, 1], [], []>} : vector<2x128xf32>, vector<128x512xf32>, vector<2x512xf32> -> vector<2x512xf32>
    %428 = arith.addf %425, %427 : vector<2x512xf32>
    %429 = vector.extract_strided_slice %428 {offsets = [0, 0], sizes = [2, 128], strides = [1, 1]} : vector<2x512xf32> to vector<2x128xf32>
    %430 = arith.negf %429 : vector<2x128xf32>
    %431 = math.exp %430 : vector<2x128xf32>
    %cst_118 = arith.constant 1.000000e+00 : f32
    %432 = vector.broadcast %cst_118 : f32 to vector<2x128xf32>
    %433 = arith.addf %432, %431 : vector<2x128xf32>
    %434 = arith.divf %432, %433 : vector<2x128xf32>
    %435 = vector.extract_strided_slice %428 {offsets = [0, 128], sizes = [2, 128], strides = [1, 1]} : vector<2x512xf32> to vector<2x128xf32>
    %436 = arith.negf %435 : vector<2x128xf32>
    %437 = math.exp %436 : vector<2x128xf32>
    %cst_119 = arith.constant 1.000000e+00 : f32
    %438 = vector.broadcast %cst_119 : f32 to vector<2x128xf32>
    %439 = arith.addf %438, %437 : vector<2x128xf32>
    %440 = arith.divf %438, %439 : vector<2x128xf32>
    %441 = vector.extract_strided_slice %428 {offsets = [0, 256], sizes = [2, 128], strides = [1, 1]} : vector<2x512xf32> to vector<2x128xf32>
    %442 = math.tanh %441 : vector<2x128xf32>
    %443 = vector.extract_strided_slice %428 {offsets = [0, 384], sizes = [2, 128], strides = [1, 1]} : vector<2x512xf32> to vector<2x128xf32>
    %444 = arith.negf %443 : vector<2x128xf32>
    %445 = math.exp %444 : vector<2x128xf32>
    %cst_120 = arith.constant 1.000000e+00 : f32
    %446 = vector.broadcast %cst_120 : f32 to vector<2x128xf32>
    %447 = arith.addf %446, %445 : vector<2x128xf32>
    %448 = arith.divf %446, %447 : vector<2x128xf32>
    %449 = arith.mulf %440, %418 : vector<2x128xf32>
    %450 = arith.mulf %434, %442 : vector<2x128xf32>
    %451 = arith.addf %449, %450 : vector<2x128xf32>
    %452 = math.tanh %451 : vector<2x128xf32>
    %453 = arith.mulf %448, %452 : vector<2x128xf32>
    %454 = vector.extract_strided_slice %332 {offsets = [6, 0], sizes = [2, 512], strides = [1, 1]} : vector<16x512xf32> to vector<2x512xf32>
    %455 = vector.extract_strided_slice %332 {offsets = [8, 0], sizes = [2, 512], strides = [1, 1]} : vector<16x512xf32> to vector<2x512xf32>
    %456 = vector.shape_cast %351 : vector<1x512xi1> to vector<1x512xi1>
    %457 = vector.broadcast %456 : vector<1x512xi1> to vector<2x512xi1>
    %458 = arith.select %457, %454, %455 : vector<2x512xi1>, vector<2x512xf32>
    %c0_121 = arith.constant 0 : index
    %c0_122 = arith.constant 0 : index
    %459 = vector.load %arg6[%c0_121, %c0_122] : memref<128x512xf32, #tpu.memory_space<vmem>>, vector<128x512xf32>
    %cst_123 = arith.constant dense<0.000000e+00> : vector<2x512xf32>
    %460 = tpu.matmul %453, %459, %cst_123 {dimension_numbers = #tpu.dot_dimension_numbers<[1], [0], [0], [1], [0, 0, 1, 1], [], []>} : vector<2x128xf32>, vector<128x512xf32>, vector<2x512xf32> -> vector<2x512xf32>
    %461 = arith.addf %458, %460 : vector<2x512xf32>
    %462 = vector.extract_strided_slice %461 {offsets = [0, 0], sizes = [2, 128], strides = [1, 1]} : vector<2x512xf32> to vector<2x128xf32>
    %463 = arith.negf %462 : vector<2x128xf32>
    %464 = math.exp %463 : vector<2x128xf32>
    %cst_124 = arith.constant 1.000000e+00 : f32
    %465 = vector.broadcast %cst_124 : f32 to vector<2x128xf32>
    %466 = arith.addf %465, %464 : vector<2x128xf32>
    %467 = arith.divf %465, %466 : vector<2x128xf32>
    %468 = vector.extract_strided_slice %461 {offsets = [0, 128], sizes = [2, 128], strides = [1, 1]} : vector<2x512xf32> to vector<2x128xf32>
    %469 = arith.negf %468 : vector<2x128xf32>
    %470 = math.exp %469 : vector<2x128xf32>
    %cst_125 = arith.constant 1.000000e+00 : f32
    %471 = vector.broadcast %cst_125 : f32 to vector<2x128xf32>
    %472 = arith.addf %471, %470 : vector<2x128xf32>
    %473 = arith.divf %471, %472 : vector<2x128xf32>
    %474 = vector.extract_strided_slice %461 {offsets = [0, 256], sizes = [2, 128], strides = [1, 1]} : vector<2x512xf32> to vector<2x128xf32>
    %475 = math.tanh %474 : vector<2x128xf32>
    %476 = vector.extract_strided_slice %461 {offsets = [0, 384], sizes = [2, 128], strides = [1, 1]} : vector<2x512xf32> to vector<2x128xf32>
    %477 = arith.negf %476 : vector<2x128xf32>
    %478 = math.exp %477 : vector<2x128xf32>
    %cst_126 = arith.constant 1.000000e+00 : f32
    %479 = vector.broadcast %cst_126 : f32 to vector<2x128xf32>
    %480 = arith.addf %479, %478 : vector<2x128xf32>
    %481 = arith.divf %479, %480 : vector<2x128xf32>
    %482 = arith.mulf %473, %451 : vector<2x128xf32>
    %483 = arith.mulf %467, %475 : vector<2x128xf32>
    %484 = arith.addf %482, %483 : vector<2x128xf32>
    %485 = math.tanh %484 : vector<2x128xf32>
    %486 = arith.mulf %481, %485 : vector<2x128xf32>
    %487 = vector.extract_strided_slice %332 {offsets = [8, 0], sizes = [2, 512], strides = [1, 1]} : vector<16x512xf32> to vector<2x512xf32>
    %488 = vector.extract_strided_slice %332 {offsets = [6, 0], sizes = [2, 512], strides = [1, 1]} : vector<16x512xf32> to vector<2x512xf32>
    %489 = vector.shape_cast %351 : vector<1x512xi1> to vector<1x512xi1>
    %490 = vector.broadcast %489 : vector<1x512xi1> to vector<2x512xi1>
    %491 = arith.select %490, %487, %488 : vector<2x512xi1>, vector<2x512xf32>
    %c0_127 = arith.constant 0 : index
    %c0_128 = arith.constant 0 : index
    %492 = vector.load %arg6[%c0_127, %c0_128] : memref<128x512xf32, #tpu.memory_space<vmem>>, vector<128x512xf32>
    %cst_129 = arith.constant dense<0.000000e+00> : vector<2x512xf32>
    %493 = tpu.matmul %486, %492, %cst_129 {dimension_numbers = #tpu.dot_dimension_numbers<[1], [0], [0], [1], [0, 0, 1, 1], [], []>} : vector<2x128xf32>, vector<128x512xf32>, vector<2x512xf32> -> vector<2x512xf32>
    %494 = arith.addf %491, %493 : vector<2x512xf32>
    %495 = vector.extract_strided_slice %494 {offsets = [0, 0], sizes = [2, 128], strides = [1, 1]} : vector<2x512xf32> to vector<2x128xf32>
    %496 = arith.negf %495 : vector<2x128xf32>
    %497 = math.exp %496 : vector<2x128xf32>
    %cst_130 = arith.constant 1.000000e+00 : f32
    %498 = vector.broadcast %cst_130 : f32 to vector<2x128xf32>
    %499 = arith.addf %498, %497 : vector<2x128xf32>
    %500 = arith.divf %498, %499 : vector<2x128xf32>
    %501 = vector.extract_strided_slice %494 {offsets = [0, 128], sizes = [2, 128], strides = [1, 1]} : vector<2x512xf32> to vector<2x128xf32>
    %502 = arith.negf %501 : vector<2x128xf32>
    %503 = math.exp %502 : vector<2x128xf32>
    %cst_131 = arith.constant 1.000000e+00 : f32
    %504 = vector.broadcast %cst_131 : f32 to vector<2x128xf32>
    %505 = arith.addf %504, %503 : vector<2x128xf32>
    %506 = arith.divf %504, %505 : vector<2x128xf32>
    %507 = vector.extract_strided_slice %494 {offsets = [0, 256], sizes = [2, 128], strides = [1, 1]} : vector<2x512xf32> to vector<2x128xf32>
    %508 = math.tanh %507 : vector<2x128xf32>
    %509 = vector.extract_strided_slice %494 {offsets = [0, 384], sizes = [2, 128], strides = [1, 1]} : vector<2x512xf32> to vector<2x128xf32>
    %510 = arith.negf %509 : vector<2x128xf32>
    %511 = math.exp %510 : vector<2x128xf32>
    %cst_132 = arith.constant 1.000000e+00 : f32
    %512 = vector.broadcast %cst_132 : f32 to vector<2x128xf32>
    %513 = arith.addf %512, %511 : vector<2x128xf32>
    %514 = arith.divf %512, %513 : vector<2x128xf32>
    %515 = arith.mulf %506, %484 : vector<2x128xf32>
    %516 = arith.mulf %500, %508 : vector<2x128xf32>
    %517 = arith.addf %515, %516 : vector<2x128xf32>
    %518 = math.tanh %517 : vector<2x128xf32>
    %519 = arith.mulf %514, %518 : vector<2x128xf32>
    %520 = vector.extract_strided_slice %332 {offsets = [10, 0], sizes = [2, 512], strides = [1, 1]} : vector<16x512xf32> to vector<2x512xf32>
    %521 = vector.extract_strided_slice %332 {offsets = [4, 0], sizes = [2, 512], strides = [1, 1]} : vector<16x512xf32> to vector<2x512xf32>
    %522 = vector.shape_cast %351 : vector<1x512xi1> to vector<1x512xi1>
    %523 = vector.broadcast %522 : vector<1x512xi1> to vector<2x512xi1>
    %524 = arith.select %523, %520, %521 : vector<2x512xi1>, vector<2x512xf32>
    %c0_133 = arith.constant 0 : index
    %c0_134 = arith.constant 0 : index
    %525 = vector.load %arg6[%c0_133, %c0_134] : memref<128x512xf32, #tpu.memory_space<vmem>>, vector<128x512xf32>
    %cst_135 = arith.constant dense<0.000000e+00> : vector<2x512xf32>
    %526 = tpu.matmul %519, %525, %cst_135 {dimension_numbers = #tpu.dot_dimension_numbers<[1], [0], [0], [1], [0, 0, 1, 1], [], []>} : vector<2x128xf32>, vector<128x512xf32>, vector<2x512xf32> -> vector<2x512xf32>
    %527 = arith.addf %524, %526 : vector<2x512xf32>
    %528 = vector.extract_strided_slice %527 {offsets = [0, 0], sizes = [2, 128], strides = [1, 1]} : vector<2x512xf32> to vector<2x128xf32>
    %529 = arith.negf %528 : vector<2x128xf32>
    %530 = math.exp %529 : vector<2x128xf32>
    %cst_136 = arith.constant 1.000000e+00 : f32
    %531 = vector.broadcast %cst_136 : f32 to vector<2x128xf32>
    %532 = arith.addf %531, %530 : vector<2x128xf32>
    %533 = arith.divf %531, %532 : vector<2x128xf32>
    %534 = vector.extract_strided_slice %527 {offsets = [0, 128], sizes = [2, 128], strides = [1, 1]} : vector<2x512xf32> to vector<2x128xf32>
    %535 = arith.negf %534 : vector<2x128xf32>
    %536 = math.exp %535 : vector<2x128xf32>
    %cst_137 = arith.constant 1.000000e+00 : f32
    %537 = vector.broadcast %cst_137 : f32 to vector<2x128xf32>
    %538 = arith.addf %537, %536 : vector<2x128xf32>
    %539 = arith.divf %537, %538 : vector<2x128xf32>
    %540 = vector.extract_strided_slice %527 {offsets = [0, 256], sizes = [2, 128], strides = [1, 1]} : vector<2x512xf32> to vector<2x128xf32>
    %541 = math.tanh %540 : vector<2x128xf32>
    %542 = vector.extract_strided_slice %527 {offsets = [0, 384], sizes = [2, 128], strides = [1, 1]} : vector<2x512xf32> to vector<2x128xf32>
    %543 = arith.negf %542 : vector<2x128xf32>
    %544 = math.exp %543 : vector<2x128xf32>
    %cst_138 = arith.constant 1.000000e+00 : f32
    %545 = vector.broadcast %cst_138 : f32 to vector<2x128xf32>
    %546 = arith.addf %545, %544 : vector<2x128xf32>
    %547 = arith.divf %545, %546 : vector<2x128xf32>
    %548 = arith.mulf %539, %517 : vector<2x128xf32>
    %549 = arith.mulf %533, %541 : vector<2x128xf32>
    %550 = arith.addf %548, %549 : vector<2x128xf32>
    %551 = math.tanh %550 : vector<2x128xf32>
    %552 = arith.mulf %547, %551 : vector<2x128xf32>
    %553 = vector.extract_strided_slice %332 {offsets = [12, 0], sizes = [2, 512], strides = [1, 1]} : vector<16x512xf32> to vector<2x512xf32>
    %554 = vector.extract_strided_slice %332 {offsets = [2, 0], sizes = [2, 512], strides = [1, 1]} : vector<16x512xf32> to vector<2x512xf32>
    %555 = vector.shape_cast %351 : vector<1x512xi1> to vector<1x512xi1>
    %556 = vector.broadcast %555 : vector<1x512xi1> to vector<2x512xi1>
    %557 = arith.select %556, %553, %554 : vector<2x512xi1>, vector<2x512xf32>
    %c0_139 = arith.constant 0 : index
    %c0_140 = arith.constant 0 : index
    %558 = vector.load %arg6[%c0_139, %c0_140] : memref<128x512xf32, #tpu.memory_space<vmem>>, vector<128x512xf32>
    %cst_141 = arith.constant dense<0.000000e+00> : vector<2x512xf32>
    %559 = tpu.matmul %552, %558, %cst_141 {dimension_numbers = #tpu.dot_dimension_numbers<[1], [0], [0], [1], [0, 0, 1, 1], [], []>} : vector<2x128xf32>, vector<128x512xf32>, vector<2x512xf32> -> vector<2x512xf32>
    %560 = arith.addf %557, %559 : vector<2x512xf32>
    %561 = vector.extract_strided_slice %560 {offsets = [0, 0], sizes = [2, 128], strides = [1, 1]} : vector<2x512xf32> to vector<2x128xf32>
    %562 = arith.negf %561 : vector<2x128xf32>
    %563 = math.exp %562 : vector<2x128xf32>
    %cst_142 = arith.constant 1.000000e+00 : f32
    %564 = vector.broadcast %cst_142 : f32 to vector<2x128xf32>
    %565 = arith.addf %564, %563 : vector<2x128xf32>
    %566 = arith.divf %564, %565 : vector<2x128xf32>
    %567 = vector.extract_strided_slice %560 {offsets = [0, 128], sizes = [2, 128], strides = [1, 1]} : vector<2x512xf32> to vector<2x128xf32>
    %568 = arith.negf %567 : vector<2x128xf32>
    %569 = math.exp %568 : vector<2x128xf32>
    %cst_143 = arith.constant 1.000000e+00 : f32
    %570 = vector.broadcast %cst_143 : f32 to vector<2x128xf32>
    %571 = arith.addf %570, %569 : vector<2x128xf32>
    %572 = arith.divf %570, %571 : vector<2x128xf32>
    %573 = vector.extract_strided_slice %560 {offsets = [0, 256], sizes = [2, 128], strides = [1, 1]} : vector<2x512xf32> to vector<2x128xf32>
    %574 = math.tanh %573 : vector<2x128xf32>
    %575 = vector.extract_strided_slice %560 {offsets = [0, 384], sizes = [2, 128], strides = [1, 1]} : vector<2x512xf32> to vector<2x128xf32>
    %576 = arith.negf %575 : vector<2x128xf32>
    %577 = math.exp %576 : vector<2x128xf32>
    %cst_144 = arith.constant 1.000000e+00 : f32
    %578 = vector.broadcast %cst_144 : f32 to vector<2x128xf32>
    %579 = arith.addf %578, %577 : vector<2x128xf32>
    %580 = arith.divf %578, %579 : vector<2x128xf32>
    %581 = arith.mulf %572, %550 : vector<2x128xf32>
    %582 = arith.mulf %566, %574 : vector<2x128xf32>
    %583 = arith.addf %581, %582 : vector<2x128xf32>
    %584 = math.tanh %583 : vector<2x128xf32>
    %585 = arith.mulf %580, %584 : vector<2x128xf32>
    %586 = vector.extract_strided_slice %332 {offsets = [14, 0], sizes = [2, 512], strides = [1, 1]} : vector<16x512xf32> to vector<2x512xf32>
    %587 = vector.extract_strided_slice %332 {offsets = [0, 0], sizes = [2, 512], strides = [1, 1]} : vector<16x512xf32> to vector<2x512xf32>
    %588 = vector.shape_cast %351 : vector<1x512xi1> to vector<1x512xi1>
    %589 = vector.broadcast %588 : vector<1x512xi1> to vector<2x512xi1>
    %590 = arith.select %589, %586, %587 : vector<2x512xi1>, vector<2x512xf32>
    %c0_145 = arith.constant 0 : index
    %c0_146 = arith.constant 0 : index
    %591 = vector.load %arg6[%c0_145, %c0_146] : memref<128x512xf32, #tpu.memory_space<vmem>>, vector<128x512xf32>
    %cst_147 = arith.constant dense<0.000000e+00> : vector<2x512xf32>
    %592 = tpu.matmul %585, %591, %cst_147 {dimension_numbers = #tpu.dot_dimension_numbers<[1], [0], [0], [1], [0, 0, 1, 1], [], []>} : vector<2x128xf32>, vector<128x512xf32>, vector<2x512xf32> -> vector<2x512xf32>
    %593 = arith.addf %590, %592 : vector<2x512xf32>
    %594 = vector.extract_strided_slice %593 {offsets = [0, 0], sizes = [2, 128], strides = [1, 1]} : vector<2x512xf32> to vector<2x128xf32>
    %595 = arith.negf %594 : vector<2x128xf32>
    %596 = math.exp %595 : vector<2x128xf32>
    %cst_148 = arith.constant 1.000000e+00 : f32
    %597 = vector.broadcast %cst_148 : f32 to vector<2x128xf32>
    %598 = arith.addf %597, %596 : vector<2x128xf32>
    %599 = arith.divf %597, %598 : vector<2x128xf32>
    %600 = vector.extract_strided_slice %593 {offsets = [0, 128], sizes = [2, 128], strides = [1, 1]} : vector<2x512xf32> to vector<2x128xf32>
    %601 = arith.negf %600 : vector<2x128xf32>
    %602 = math.exp %601 : vector<2x128xf32>
    %cst_149 = arith.constant 1.000000e+00 : f32
    %603 = vector.broadcast %cst_149 : f32 to vector<2x128xf32>
    %604 = arith.addf %603, %602 : vector<2x128xf32>
    %605 = arith.divf %603, %604 : vector<2x128xf32>
    %606 = vector.extract_strided_slice %593 {offsets = [0, 256], sizes = [2, 128], strides = [1, 1]} : vector<2x512xf32> to vector<2x128xf32>
    %607 = math.tanh %606 : vector<2x128xf32>
    %608 = vector.extract_strided_slice %593 {offsets = [0, 384], sizes = [2, 128], strides = [1, 1]} : vector<2x512xf32> to vector<2x128xf32>
    %609 = arith.negf %608 : vector<2x128xf32>
    %610 = math.exp %609 : vector<2x128xf32>
    %cst_150 = arith.constant 1.000000e+00 : f32
    %611 = vector.broadcast %cst_150 : f32 to vector<2x128xf32>
    %612 = arith.addf %611, %610 : vector<2x128xf32>
    %613 = arith.divf %611, %612 : vector<2x128xf32>
    %614 = arith.mulf %605, %583 : vector<2x128xf32>
    %615 = arith.mulf %599, %607 : vector<2x128xf32>
    %616 = arith.addf %614, %615 : vector<2x128xf32>
    %617 = math.tanh %616 : vector<2x128xf32>
    %618 = arith.mulf %613, %617 : vector<2x128xf32>
    %619 = vector.extract_strided_slice %618 {offsets = [0, 0], sizes = [2, 64], strides = [1, 1]} : vector<2x128xf32> to vector<2x64xf32>
    %c0_151 = arith.constant 0 : index
    %c0_152 = arith.constant 0 : index
    %620 = vector.load %arg8[%c0_151, %c0_152] : memref<64x32xf32, #tpu.memory_space<vmem>>, vector<64x32xf32>
    %cst_153 = arith.constant dense<0.000000e+00> : vector<2x32xf32>
    %621 = tpu.matmul %619, %620, %cst_153 {dimension_numbers = #tpu.dot_dimension_numbers<[1], [0], [0], [1], [0, 0, 1, 1], [], []>} : vector<2x64xf32>, vector<64x32xf32>, vector<2x32xf32> -> vector<2x32xf32>
    %c0_154 = arith.constant 0 : index
    %c0_155 = arith.constant 0 : index
    %622 = vector.load %arg9[%c0_154, %c0_155] : memref<64x32xf32, #tpu.memory_space<vmem>>, vector<64x32xf32>
    %cst_156 = arith.constant dense<0.000000e+00> : vector<2x32xf32>
    %623 = tpu.matmul %387, %622, %cst_156 {dimension_numbers = #tpu.dot_dimension_numbers<[1], [0], [0], [1], [0, 0, 1, 1], [], []>} : vector<2x64xf32>, vector<64x32xf32>, vector<2x32xf32> -> vector<2x32xf32>
    %624 = arith.addf %621, %623 : vector<2x32xf32>
    %c0_157 = arith.constant 0 : index
    %c0_158 = arith.constant 0 : index
    %625 = vector.load %arg10[%c0_157, %c0_158] : memref<1x32xf32, #tpu.memory_space<vmem>>, vector<1x32xf32>
    %626 = vector.broadcast %625 : vector<1x32xf32> to vector<2x32xf32>
    %627 = arith.addf %624, %626 : vector<2x32xf32>
    %628 = math.tanh %627 : vector<2x32xf32>
    %c0_159 = arith.constant 0 : index
    %c0_160 = arith.constant 0 : index
    %629 = vector.load %arg11[%c0_159, %c0_160] : memref<32x8xf32, #tpu.memory_space<vmem>>, vector<32x8xf32>
    %cst_161 = arith.constant dense<0.000000e+00> : vector<2x8xf32>
    %630 = tpu.matmul %628, %629, %cst_161 {dimension_numbers = #tpu.dot_dimension_numbers<[1], [0], [0], [1], [0, 0, 1, 1], [], []>} : vector<2x32xf32>, vector<32x8xf32>, vector<2x8xf32> -> vector<2x8xf32>
    %c0_162 = arith.constant 0 : index
    %c0_163 = arith.constant 0 : index
    %631 = vector.load %arg12[%c0_162, %c0_163] : memref<2x8xf32, #tpu.memory_space<vmem>>, vector<2x8xf32>
    tpu.vector_store %arg12[%c0_162, %c0_163], %630 {strides = array<i32>} : memref<2x8xf32, #tpu.memory_space<vmem>>, vector<2x8xf32>,
    return
  }
}

</mosaic_0001>

<bundles_post_ra>
// kernel: lstm_net_forward.1
= control target key start
LH: loop header
LB: loop body
LE: loop exit
PB: predicated region body
PF: predicated region fallthrough
CT: control target
= control target key end

     0   :  { %17 = vsyncpa [#allocation5], 0  ;;  %s6816_s0 = inlined_call_operand.vmem [shape: f32[16,16], index: 0, kind: input, shape index: {}]   ;;  %s6817_s1 = inlined_call_operand.hbm [shape: f32[16,512], index: 1, kind: input, shape index: {}]   ;;  %s6818_s2 = inlined_call_operand.hbm [shape: f32[128,512], index: 2, kind: input, shape index: {}]   ;;  %s6819_s3 = inlined_call_operand.vmem [shape: f32[1,512], index: 3, kind: input, shape index: {}]   ;;  %s6820_s4 = inlined_call_operand.vmem [shape: f32[32,512], index: 4, kind: input, shape index: {}]   ;;  %s6821_s5 = inlined_call_operand.hbm [shape: f32[32,512], index: 5, kind: input, shape index: {}]   ;;  %s6822_s6 = inlined_call_operand.hbm [shape: f32[128,512], index: 6, kind: input, shape index: {}]   ;;  %s6823_s7 = inlined_call_operand.vmem [shape: f32[1,512], index: 7, kind: input, shape index: {}]   ;;  %s6824_s8 = inlined_call_operand.vmem [shape: f32[64,32], index: 8, kind: input, shape index: {}]   ;;  %s6825_s9 = inlined_call_operand.vmem [shape: f32[64,32], index: 9, kind: input, shape index: {}]   ;;  %s6826_s10 = inlined_call_operand.vmem [shape: f32[1,32], index: 10, kind: input, shape index: {}]   ;;  %s6827_s11 = inlined_call_operand.vmem [shape: f32[32,8], index: 11, kind: input, shape index: {}]   ;;  %s6828_s12 = inlined_call_operand.hbm [shape: f32[2,8], index: 12, kind: output, shape index: {}]  }
   0x1   :  { %18 = vsyncpa [#allocation8], 0 }
   0x2   :  { %19 = vsyncpa [#allocation11], 0 }
   0x3   :  { %20 = vsyncpa [#allocation6], 0  ;;  %s40_s23 = sshll.u32 %s6818_s2, 4  ;;  %s4515_s24 = smov [#allocation7]   ;;  %s41_s23 = int_to_ptr.hbm [resolvable:$true] %s40_s23 }
   0x4   :  { %s42_s25 = sshll.u32 %s4515_s24, 4  ;;  %s27_s28 = sshll.u32 %s6817_s1, 4  ;;  %s43_s25 = int_to_ptr.vmem [resolvable:$true] %s42_s25  ;;  %s28_s28 = int_to_ptr.hbm [resolvable:$true] %s27_s28 }
   0x5   :  { %s4516_s29 = smov 512   ;;  %s4517_s30 = smov 32  }
   0x6   :  { %48 = dma.hbm_to_vmem [thread:$0]  %s41_s23, 8192, %s43_s25, [#allocation8], %s4516_s29, %s4516_s29, %s4517_s30  }
   0x7   :  { %s4518_s13 = smov [#allocation4]   ;;  %s57_s17 = sshll.u32 %s6821_s5, 4  ;;  %s58_s17 = int_to_ptr.hbm [resolvable:$true] %s57_s17 }
   0x8   :  { %s29_s14 = sshll.u32 %s4518_s13, 4  ;;  %s70_s19 = sshll.u32 %s6822_s6, 4  ;;  %s30_s14 = int_to_ptr.vmem [resolvable:$true] %s29_s14  ;;  %s71_s19 = int_to_ptr.hbm [resolvable:$true] %s70_s19 }
   0x9   :  { %35 = dma.hbm_to_vmem [thread:$0]  %s28_s28, 1024, %s30_s14, [#allocation5], %s4516_s29, %s4516_s29, %s4517_s30  }
   0xa   :  { %s4519_s20 = smov [#allocation9]   ;;  %s4520_s1 = smov [#allocation10]  }
   0xb   :  { %s59_s21 = sshll.u32 %s4519_s20, 4  ;;  %s72_s22 = sshll.u32 %s4520_s1, 4  ;;  %s60_s21 = int_to_ptr.vmem [resolvable:$true] %s59_s21  ;;  %s73_s22 = int_to_ptr.vmem [resolvable:$true] %s72_s22 }
   0xc   :  { %65 = dma.hbm_to_vmem [thread:$0]  %s58_s17, 2048, %s60_s21, [#allocation8], %s4516_s29, %s4516_s29, %s4517_s30  }
   0xd   :  { %78 = dma.hbm_to_vmem [thread:$0]  %s71_s19, 8192, %s73_s22, [#allocation11], %s4516_s29, %s4516_s29, %s4517_s30  }
   0xe   :  { %4507 = dma.done.wait [#allocation5], 1024  }
   0xf   :  { %4508 = vsyncadd [#allocation5], 4294966272 }
  0x10   :  { %4509 = dma.done.wait [#allocation8], 10240  }
  0x11   :  { %4510 = vsyncadd [#allocation8], 4294957056 }
  0x12   :  { %4511 = dma.done.wait [#allocation11], 8192  }
  0x13   :  { %4512 = vsyncadd [#allocation11], 4294959104  ;;  %v111_v0 = vld [vmem:[#allocation4 + $0x20] sm:$0xff]  ;;  %v112_v1 = vld [vmem:[#allocation4 + $0x28] sm:$0xff]  ;;  %vm125_vm0 = vcmask 130048  }
  0x14   :  { %v114_v2 = vld [vmem:[#allocation4 + $0x38] sm:$0xff]  ;;  %146 = vmatpush.msra.mxu0 %v111_v0  ;;  %169 = vmatpush.msra.mxu1 %v112_v1  ;;  %v107_v3 = vld [vmem:[#allocation4] sm:$0xff]  ;;  %v108_v4 = vld [vmem:[#allocation4 + $0x8] sm:$0xff] }
  0x15   :  { %v113_v5 = vld [vmem:[#allocation4 + $0x30] sm:$0xff]  ;;  %215 = vmatpush.msra.mxu3 %v114_v2  ;;  %v110_v6 = vld [vmem:[#allocation4 + $0x18] sm:$0xff]  ;;  %v4602_v7 = vld [vmem:[#allocation7 + $0x1e0] sm:$0xff] }
  0x16   :  { %192 = vmatpush.msra.mxu2 %v113_v5  ;;  %v4604_v8 = vld [vmem:[#allocation7 + $0x1e8] sm:$0xff]  ;;  %147 = vmatpush.msra.mxu0 %v107_v3  ;;  %v4606_v9 = vld [vmem:[#allocation7 + $0x1f8] sm:$0xff]  ;;  %v109_v10 = vld [vmem:[#allocation4 + $0x10] sm:$0xff] }
  0x17   :  { %170 = vmatpush.msra.mxu1 %v108_v4  ;;  %v4608_v11 = vld [vmem:[#allocation7 + $0x1c0] sm:$0xff]  ;;  %216 = vmatpush.msra.mxu3 %v110_v6  ;;  %v4611_v12 = vld [vmem:[#allocation7 + $0x1c8] sm:$0xff]  ;;  %v4613_v13 = vld [vmem:[#allocation7 + $0x1f0] sm:$0xff] }
  0x18   :  { %369 = vmatpush.msrb.mxu0 %v4602_v7  ;;  %v4617_v14 = vld [vmem:[#allocation7 + $0x1d8] sm:$0xff]  ;;  %v4619_v15 = vld [vmem:[#allocation7 + $0x1a0] sm:$0xff]  ;;  %193 = vmatpush.msra.mxu2 %v109_v10  ;;  %v4622_v16 = vld [vmem:[#allocation7 + $0x1a8] sm:$0xff] }
  0x19   :  { %389 = vmatpush.msrb.mxu1 %v4604_v8  ;;  %429 = vmatpush.msrb.mxu3 %v4606_v9  ;;  %v4624_v17 = vld [vmem:[#allocation7 + $0x1d0] sm:$0xff]  ;;  %v4628_v18 = vld [vmem:[#allocation7 + $0x1b8] sm:$0xff]  ;;  %v4633_v19 = vld [vmem:[%s6816_s0] sm:$0xff] }
  0x1a   :  { %370 = vmatpush.msrb.mxu0 %v4608_v11  ;;  %409 = vmatpush.msrb.mxu2 %v4613_v13  ;;  %v4637_v20 = vld [vmem:[#allocation7 + $0x180] sm:$0xff]  ;;  %v4641_v21 = vld [vmem:[#allocation7 + $0x188] sm:$0xff]  ;;  %v4643_v22 = vld [vmem:[#allocation7 + $0x1b0] sm:$0xff] }
  0x1b   :  { %390 = vmatpush.msrb.mxu1 %v4611_v12  ;;  %430 = vmatpush.msrb.mxu3 %v4617_v14  ;;  %v4648_v23 = vld [vmem:[#allocation7 + $0x198] sm:$0xff]  ;;  %v4650_v24 = vld [vmem:[#allocation7 + $0x160] sm:$0xff]  ;;  %v4655_v25 = vld [vmem:[#allocation7 + $0x168] sm:$0xff] }
  0x1c   :  { %371 = vmatpush.msrb.mxu0 %v4619_v15  ;;  %410 = vmatpush.msrb.mxu2 %v4624_v17  ;;  %v4657_v26 = vld [vmem:[#allocation7 + $0x190] sm:$0xff]  ;;  %v4661_v27 = vld [vmem:[#allocation7 + $0x178] sm:$0xff]  ;;  %v4663_v28 = vld [vmem:[#allocation7 + $0x140] sm:$0xff] }
  0x1d   :  { %391 = vmatpush.msrb.mxu1 %v4622_v16  ;;  %431 = vmatpush.msrb.mxu3 %v4628_v18  ;;  %v4667_v29 = vld [vmem:[#allocation7 + $0x148] sm:$0xff]  ;;  %v4671_v30 = vld [vmem:[#allocation7 + $0x170] sm:$0xff]  ;;  %v4673_v31 = vld [vmem:[#allocation7 + $0x158] sm:$0xff] }
  0x1e   :  { %3975 = vmatmul.msk.f32.vlgmr.msra.gmra.mxu0 %vm125_vm0, %v4633_v19  ;;  %3977 = vmatmul.msk.f32.vlgmr.msra.gmra.mxu1 %vm125_vm0, %v4633_v19  ;;  %v4677_v32 = vld [vmem:[#allocation7 + $0x120] sm:$0xff]  ;;  %v4679_v33 = vld [vmem:[#allocation7 + $0x128] sm:$0xff]  ;;  %v4684_v34 = vld [vmem:[#allocation7 + $0x150] sm:$0xff] }
  0x1f   :  { %372 = vmatpush.msrb.mxu0 %v4637_v20  ;;  %392 = vmatpush.msrb.mxu1 %v4641_v21  ;;  %v4686_v35 = vld [vmem:[#allocation7 + $0x138] sm:$0xff]  ;;  %v106_v36 = vld [vmem:[%s6816_s0 + $0x8] sm:$0xff]  ;;  %v4695_v37 = vld [vmem:[#allocation7 + $0x100] sm:$0xff] }
  0x20   :  { %411 = vmatpush.msrb.mxu2 %v4643_v22  ;;  %432 = vmatpush.msrb.mxu3 %v4648_v23  ;;  %v4697_v38 = vld [vmem:[#allocation7 + $0x108] sm:$0xff]  ;;  %v4701_v39 = vld [vmem:[#allocation7 + $0x130] sm:$0xff]  ;;  %v4703_v40 = vld [vmem:[#allocation7 + $0x118] sm:$0xff] }
  0x21   :  { %373 = vmatpush.msrb.mxu0 %v4650_v24  ;;  %393 = vmatpush.msrb.mxu1 %v4655_v25  ;;  %v4707_v41 = vld [vmem:[#allocation7 + $0xe0] sm:$0xff]  ;;  %v4709_v42 = vld [vmem:[#allocation7 + $0xe8] sm:$0xff]  ;;  %v4713_v43 = vld [vmem:[#allocation7 + $0x110] sm:$0xff] }
  0x22   :  { %412 = vmatpush.msrb.mxu2 %v4657_v26  ;;  %433 = vmatpush.msrb.mxu3 %v4661_v27  ;;  %v4715_v44 = vld [vmem:[#allocation7 + $0xf8] sm:$0xff]  ;;  %v4721_v45 = vld [vmem:[#allocation7 + $0xc0] sm:$0xff]  ;;  %v4723_v46 = vld [vmem:[#allocation7 + $0xc8] sm:$0xff] }
  0x23   :  { %374 = vmatpush.msrb.mxu0 %v4663_v28  ;;  %3981 = vmatmul.msk.f32.vlgmr.msra.gmra.mxu3 %vm125_vm0, %v4633_v19  ;;  %v4727_v47 = vld [vmem:[#allocation7 + $0xf0] sm:$0xff]  ;;  %v4729_v48 = vld [vmem:[#allocation7 + $0xd8] sm:$0xff]  ;;  %v4734_v49 = vld [vmem:[#allocation7 + $0xa0] sm:$0xff] }
  0x24   :  { %394 = vmatpush.msrb.mxu1 %v4667_v29  ;;  %413 = vmatpush.msrb.mxu2 %v4671_v30  ;;  %v4736_v50 = vld [vmem:[#allocation7 + $0xa8] sm:$0xff]  ;;  %v4740_v51 = vld [vmem:[#allocation7 + $0xd0] sm:$0xff]  ;;  %v4742_v52 = vld [vmem:[#allocation7 + $0xb8] sm:$0xff] }
  0x25   :  { %434 = vmatpush.msrb.mxu3 %v4673_v31  ;;  %375 = vmatpush.msrb.mxu0 %v4677_v32  ;;  %v4746_v53 = vld [vmem:[#allocation7 + $0x80] sm:$0xff]  ;;  %v4748_v54 = vld [vmem:[#allocation7 + $0x88] sm:$0xff]  ;;  %v4752_v55 = vld [vmem:[#allocation7 + $0xb0] sm:$0xff] }
  0x26   :  { %395 = vmatpush.msrb.mxu1 %v4679_v33  ;;  %414 = vmatpush.msrb.mxu2 %v4684_v34  ;;  %v4754_v56 = vld [vmem:[#allocation7 + $0x98] sm:$0xff]  ;;  %v4758_v57 = vld [vmem:[#allocation7 + $0x60] sm:$0xff]  ;;  %v4760_v58 = vld [vmem:[#allocation7 + $0x68] sm:$0xff] }
  0x27   :  { %435 = vmatpush.msrb.mxu3 %v4686_v35  ;;  %3976 = vmatmul.msk.f32.gmra.mxu0 %vm125_vm0, %v106_v36  ;;  %v4764_v59 = vld [vmem:[#allocation7 + $0x90] sm:$0xff]  ;;  %v4766_v60 = vld [vmem:[#allocation7 + $0x78] sm:$0xff]  ;;  %v4770_v61 = vld [vmem:[#allocation7 + $0x40] sm:$0xff] }
  0x28   :  { %3978 = vmatmul.msk.f32.gmra.mxu1 %vm125_vm0, %v106_v36  ;;  %376 = vmatpush.msrb.mxu0 %v4695_v37  ;;  %v4774_v62 = vld [vmem:[#allocation7 + $0x48] sm:$0xff]  ;;  %v4776_v63 = vld [vmem:[#allocation7 + $0x70] sm:$0xff]  ;;  %v4780_v0 = vld [vmem:[#allocation7 + $0x58] sm:$0xff] }
  0x29   :  { %396 = vmatpush.msrb.mxu1 %v4697_v38  ;;  %415 = vmatpush.msrb.mxu2 %v4701_v39  ;;  %v4782_v1 = vld [vmem:[#allocation7 + $0x20] sm:$0xff]  ;;  %v4786_v2 = vld [vmem:[#allocation7 + $0x28] sm:$0xff]  ;;  %v4788_v3 = vld [vmem:[#allocation7 + $0x50] sm:$0xff] }
  0x2a   :  { %436 = vmatpush.msrb.mxu3 %v4703_v40  ;;  %377 = vmatpush.msrb.mxu0 %v4707_v41  ;;  %7000 = vst [vmem:[#allocation17_spill] sm:$0xff] %v4782_v1  ;;  %v4792_v4 = vld [vmem:[#allocation7 + $0x38] sm:$0xff]  ;;  %v4794_v5 = vld [vmem:[#allocation7] sm:$0xff]  ;;  %v4798_v6 = vld [vmem:[#allocation7 + $0x8] sm:$0xff] }
  0x2b   :  { %397 = vmatpush.msrb.mxu1 %v4709_v42  ;;  %416 = vmatpush.msrb.mxu2 %v4713_v43  ;;  %v4800_v10 = vld [vmem:[#allocation7 + $0x30] sm:$0xff] }
  0x2c   :  { %437 = vmatpush.msrb.mxu3 %v4715_v44  ;;  %3979 = vmatmul.msk.f32.vlgmr.msra.gmra.mxu2 %vm125_vm0, %v4633_v19  ;;  %v4804_v19 = vld [vmem:[#allocation7 + $0x18] sm:$0xff] }
  0x2d   :  { %3982 = vmatmul.msk.f32.gmra.mxu3 %vm125_vm0, %v106_v36  ;;  %378 = vmatpush.msrb.mxu0 %v4721_v45 }
  0x2e   :  { %398 = vmatpush.msrb.mxu1 %v4723_v46  ;;  %417 = vmatpush.msrb.mxu2 %v4727_v47 }
  0x2f   :  { %438 = vmatpush.msrb.mxu3 %v4729_v48  ;;  %379 = vmatpush.msrb.mxu0 %v4734_v49 }
  0x30   :  { %399 = vmatpush.msrb.mxu1 %v4736_v50  ;;  %418 = vmatpush.msrb.mxu2 %v4740_v51 }
  0x31   :  { %439 = vmatpush.msrb.mxu3 %v4742_v52  ;;  %380 = vmatpush.msrb.mxu0 %v4746_v53 }
  0x32   :  { %400 = vmatpush.msrb.mxu1 %v4748_v54  ;;  %419 = vmatpush.msrb.mxu2 %v4752_v55 }
  0x33   :  { %440 = vmatpush.msrb.mxu3 %v4754_v56  ;;  %381 = vmatpush.msrb.mxu0 %v4758_v57 }
  0x34   :  { %401 = vmatpush.msrb.mxu1 %v4760_v58  ;;  %420 = vmatpush.msrb.mxu2 %v4764_v59 }
  0x35   :  { %441 = vmatpush.msrb.mxu3 %v4766_v60  ;;  %3980 = vmatmul.msk.f32.gmra.mxu2 %vm125_vm0, %v106_v36  ;;  %v4810_v36 = vld [vmem:[#allocation7 + $0x10] sm:$0xff] }
  0x36   :  { %382 = vmatpush.msrb.mxu0 %v4770_v61  ;;  %402 = vmatpush.msrb.mxu1 %v4774_v62 }
  0x37   :  { %421 = vmatpush.msrb.mxu2 %v4776_v63  ;;  %442 = vmatpush.msrb.mxu3 %v4780_v0 }
  0x38   :  { %383 = vmatpush.msrb.mxu0 %v4782_v1  ;;  %403 = vmatpush.msrb.mxu1 %v4786_v2  ;;  %v6831_v1 = vmov 0.0  }
  0x39   :  { %422 = vmatpush.msrb.mxu2 %v4788_v3  ;;  %443 = vmatpush.msrb.mxu3 %v4792_v4 }
  0x3a   :  { %384 = vmatpush.msrb.mxu0 %v4794_v5  ;;  %404 = vmatpush.msrb.mxu1 %v4798_v6 }
  0x3b   :  { %423 = vmatpush.msrb.mxu2 %v4800_v10  ;;  %444 = vmatpush.msrb.mxu3 %v4804_v19 }
  0x3c   :  { %385 = vmatmul.f32.vlgmr.msrb.gmra.mxu0 %v6831_v1  ;;  %405 = vmatmul.f32.vlgmr.msrb.gmra.mxu1 %v6831_v1 }
  0x3d   :  { %445 = vmatmul.f32.vlgmr.msrb.gmra.mxu3 %v6831_v1  ;;  %424 = vmatpush.msrb.mxu2 %v4810_v36 }
  0x3e   :  { %599 = vmatpush.msra.mxu0 %v4602_v7  ;;  %425 = vmatmul.f32.vlgmr.msrb.gmra.mxu2 %v6831_v1  ;;  %v7001_v1 = vld [vmem:[#allocation17_spill] sm:$0xff] }
  0x3f   :  { %619 = vmatpush.msra.mxu1 %v4604_v8  ;;  %639 = vmatpush.msra.mxu2 %v4613_v13 }
  0x40   :  { %659 = vmatpush.msra.mxu3 %v4606_v9  ;;  %600 = vmatpush.msra.mxu0 %v4608_v11 }
  0x41   :  { %620 = vmatpush.msra.mxu1 %v4611_v12  ;;  %640 = vmatpush.msra.mxu2 %v4624_v17 }
  0x42   :  { %660 = vmatpush.msra.mxu3 %v4617_v14  ;;  %601 = vmatpush.msra.mxu0 %v4619_v15 }
  0x43   :  { %621 = vmatpush.msra.mxu1 %v4622_v16  ;;  %641 = vmatpush.msra.mxu2 %v4643_v22 }
  0x44   :  { %661 = vmatpush.msra.mxu3 %v4628_v18  ;;  %602 = vmatpush.msra.mxu0 %v4637_v20 }
  0x45   :  { %622 = vmatpush.msra.mxu1 %v4641_v21  ;;  %642 = vmatpush.msra.mxu2 %v4657_v26 }
  0x46   :  { %662 = vmatpush.msra.mxu3 %v4648_v23  ;;  %603 = vmatpush.msra.mxu0 %v4650_v24 }
  0x47   :  { %623 = vmatpush.msra.mxu1 %v4655_v25  ;;  %643 = vmatpush.msra.mxu2 %v4671_v30 }
  0x48   :  { %663 = vmatpush.msra.mxu3 %v4661_v27  ;;  %604 = vmatpush.msra.mxu0 %v4663_v28 }
  0x49   :  { %624 = vmatpush.msra.mxu1 %v4667_v29  ;;  %644 = vmatpush.msra.mxu2 %v4684_v34 }
  0x4a   :  { %664 = vmatpush.msra.mxu3 %v4673_v31  ;;  %605 = vmatpush.msra.mxu0 %v4677_v32 }
  0x4b   :  { %625 = vmatpush.msra.mxu1 %v4679_v33  ;;  %645 = vmatpush.msra.mxu2 %v4701_v39 }
  0x4c   :  { %665 = vmatpush.msra.mxu3 %v4686_v35  ;;  %606 = vmatpush.msra.mxu0 %v4695_v37 }
  0x4d   :  { %626 = vmatpush.msra.mxu1 %v4697_v38  ;;  %646 = vmatpush.msra.mxu2 %v4713_v43 }
  0x4e   :  { %666 = vmatpush.msra.mxu3 %v4703_v40  ;;  %607 = vmatpush.msra.mxu0 %v4707_v41 }
  0x4f   :  { %627 = vmatpush.msra.mxu1 %v4709_v42  ;;  %647 = vmatpush.msra.mxu2 %v4727_v47 }
  0x50   :  { %667 = vmatpush.msra.mxu3 %v4715_v44  ;;  %608 = vmatpush.msra.mxu0 %v4721_v45 }
  0x51   :  { %628 = vmatpush.msra.mxu1 %v4723_v46  ;;  %648 = vmatpush.msra.mxu2 %v4740_v51 }
  0x52   :  { %668 = vmatpush.msra.mxu3 %v4729_v48  ;;  %609 = vmatpush.msra.mxu0 %v4734_v49 }
  0x53   :  { %629 = vmatpush.msra.mxu1 %v4736_v50  ;;  %649 = vmatpush.msra.mxu2 %v4752_v55 }
  0x54   :  { %669 = vmatpush.msra.mxu3 %v4742_v52  ;;  %610 = vmatpush.msra.mxu0 %v4746_v53 }
  0x55   :  { %630 = vmatpush.msra.mxu1 %v4748_v54  ;;  %650 = vmatpush.msra.mxu2 %v4764_v59 }
  0x56   :  { %670 = vmatpush.msra.mxu3 %v4754_v56  ;;  %611 = vmatpush.msra.mxu0 %v4758_v57 }
  0x57   :  { %631 = vmatpush.msra.mxu1 %v4760_v58  ;;  %651 = vmatpush.msra.mxu2 %v4776_v63 }
  0x58   :  { %671 = vmatpush.msra.mxu3 %v4766_v60  ;;  %612 = vmatpush.msra.mxu0 %v4770_v61 }
  0x59   :  { %632 = vmatpush.msra.mxu1 %v4774_v62  ;;  %652 = vmatpush.msra.mxu2 %v4788_v3 }
  0x5a   :  { %672 = vmatpush.msra.mxu3 %v4780_v0  ;;  %613 = vmatpush.msra.mxu0 %v7001_v1 }
  0x5b   :  { %633 = vmatpush.msra.mxu1 %v4786_v2  ;;  %653 = vmatpush.msra.mxu2 %v4800_v10 }
  0x5c   :  { %673 = vmatpush.msra.mxu3 %v4792_v4  ;;  %614 = vmatpush.msra.mxu0 %v4794_v5 }
  0x5d   :  { %634 = vmatpush.msra.mxu1 %v4798_v6  ;;  %654 = vmatpush.msra.mxu2 %v4810_v36 }
  0x5e   :  { %674 = vmatpush.msra.mxu3 %v4804_v19  ;;  %834 = vmatpush.msrb.mxu0 %v4602_v7  ;;  %v224_v7 = vlaneseq }
  0x5f   :  { %854 = vmatpush.msrb.mxu1 %v4604_v8  ;;  %874 = vmatpush.msrb.mxu2 %v4613_v13 }
  0x60   :  { %894 = vmatpush.msrb.mxu3 %v4606_v9  ;;  %835 = vmatpush.msrb.mxu0 %v4608_v11  ;;  %v115_v9 = vld [vmem:[%s6819_s3] sm:$0xf]  ;;  %s4522_s3 = smov 96  }
  0x61   :  { %855 = vmatpush.msrb.mxu1 %v4611_v12  ;;  %875 = vmatpush.msrb.mxu2 %v4624_v17  ;;  %v4949_v12 = vand.u32 127, %v224_v7  ;;  %v117_v13 = vperm.slane %v115_v9, 0 }
  0x62   :  { %895 = vmatpush.msrb.mxu3 %v4617_v14  ;;  %836 = vmatpush.msrb.mxu0 %v4619_v15  ;;  %v118_v14 = vperm.slane %v115_v9, 1 }
  0x63   :  { %856 = vmatpush.msrb.mxu1 %v4622_v16  ;;  %876 = vmatpush.msrb.mxu2 %v4643_v22  ;;  %7002 = vst [vmem:[#allocation17_spill] sm:$0xff] %v4949_v12  ;;  %v4952_v15 = vadd.s32 128, %v4949_v12  ;;  %vm277_vm1 = vcmp.lt.s32.totalorder %v4949_v12, 32 }
  0x64   :  { %896 = vmatpush.msrb.mxu3 %v4628_v18  ;;  %837 = vmatpush.msrb.mxu0 %v4637_v20 }
  0x65   :  { %857 = vmatpush.msrb.mxu1 %v4641_v21  ;;  %877 = vmatpush.msrb.mxu2 %v4657_v26  ;;  %7003 = vst [vmem:[#allocation18_spill] sm:$0xff] %v4952_v15  ;;  %v6835_v18 = vand.u32 127, %v4952_v15 }
  0x66   :  { %897 = vmatpush.msrb.mxu3 %v4648_v23  ;;  %838 = vmatpush.msrb.mxu0 %v4650_v24 }
  0x67   :  { %858 = vmatpush.msrb.mxu1 %v4655_v25  ;;  %878 = vmatpush.msrb.mxu2 %v4671_v30  ;;  %vm4958_vm2 = vcmp.lt.s32.totalorder %v6835_v18, 32  ;;  %v5181_v18 = vld [vmem:[#allocation7 + $0xd0] sm:$0xff] }
  0x68   :  { %898 = vmatpush.msrb.mxu3 %v4661_v27  ;;  %839 = vmatpush.msrb.mxu0 %v4663_v28 }
  0x69   :  { %859 = vmatpush.msrb.mxu1 %v4667_v29  ;;  %879 = vmatpush.msrb.mxu2 %v4684_v34  ;;  %v120_v29 = vperm.slane %v115_v9, 3 }
  0x6a   :  { %899 = vmatpush.msrb.mxu3 %v4673_v31  ;;  %840 = vmatpush.msrb.mxu0 %v4677_v32 }
  0x6b   :  { %860 = vmatpush.msrb.mxu1 %v4679_v33  ;;  %880 = vmatpush.msrb.mxu2 %v4701_v39 }
  0x6c   :  { %900 = vmatpush.msrb.mxu3 %v4686_v35  ;;  %841 = vmatpush.msrb.mxu0 %v4695_v37  ;;  %v4975_v37 = vadd.s32 384, %v4949_v12 }
  0x6d   :  { %861 = vmatpush.msrb.mxu1 %v4697_v38  ;;  %881 = vmatpush.msrb.mxu2 %v4713_v43 }
  0x6e   :  { %901 = vmatpush.msrb.mxu3 %v4703_v40  ;;  %842 = vmatpush.msrb.mxu0 %v4707_v41  ;;  %7009 = vst [vmem:[#allocation22_spill] sm:$0xff] %v4975_v37 }
  0x6f   :  { %862 = vmatpush.msrb.mxu1 %v4709_v42  ;;  %882 = vmatpush.msrb.mxu2 %v4727_v47  ;;  %v6833_v42 = vand.u32 127, %v4975_v37 }
  0x70   :  { %902 = vmatpush.msrb.mxu3 %v4715_v44  ;;  %843 = vmatpush.msrb.mxu0 %v4721_v45 }
  0x71   :  { %863 = vmatpush.msrb.mxu1 %v4723_v46  ;;  %883 = vmatpush.msrb.mxu2 %v4740_v51  ;;  %vm4992_vm3 = vcmp.lt.s32.totalorder %v6833_v42, 32  ;;  %v5177_v42 = vld [vmem:[#allocation7 + $0xc0] sm:$0xff] }
  0x72   :  { %903 = vmatpush.msrb.mxu3 %v4729_v48  ;;  %844 = vmatpush.msrb.mxu0 %v4734_v49  ;;  %v119_v48 = vperm.slane %v115_v9, 2 }
  0x73   :  { %864 = vmatpush.msrb.mxu1 %v4736_v50  ;;  %884 = vmatpush.msrb.mxu2 %v4752_v55  ;;  %v4997_v50 = vadd.s32 256, %v4949_v12  ;;  %v5201_v12 = vld [vmem:[#allocation7 + $0x88] sm:$0xff] }
  0x74   :  { %904 = vmatpush.msrb.mxu3 %v4742_v52  ;;  %845 = vmatpush.msrb.mxu0 %v4746_v53 }
  0x75   :  { %865 = vmatpush.msrb.mxu1 %v4748_v54  ;;  %885 = vmatpush.msrb.mxu2 %v4764_v59  ;;  %7015 = vst [vmem:[#allocation26_spill] sm:$0xff] %v4997_v50 }
  0x76   :  { %905 = vmatpush.msrb.mxu3 %v4754_v56  ;;  %846 = vmatpush.msrb.mxu0 %v4758_v57 }
  0x77   :  { %866 = vmatpush.msrb.mxu1 %v4760_v58  ;;  %886 = vmatpush.msrb.mxu2 %v4776_v63  ;;  %v6834_v58 = vand.u32 127, %v4997_v50  ;;  %v5193_v50 = vld [vmem:[#allocation7 + $0xb0] sm:$0xff] }
  0x78   :  { %906 = vmatpush.msrb.mxu3 %v4766_v60  ;;  %847 = vmatpush.msrb.mxu0 %v4770_v61 }
  0x79   :  { %867 = vmatpush.msrb.mxu1 %v4774_v62  ;;  %887 = vmatpush.msrb.mxu2 %v4788_v3  ;;  %vm5024_vm4 = vcmp.lt.s32.totalorder %v6834_v58, 32  ;;  %v5179_v58 = vld [vmem:[#allocation7 + $0xc8] sm:$0xff] }
  0x7a   :  { %907 = vmatpush.msrb.mxu3 %v4780_v0  ;;  %848 = vmatpush.msrb.mxu0 %v7001_v1 }
  0x7b   :  { %868 = vmatpush.msrb.mxu1 %v4786_v2  ;;  %888 = vmatpush.msrb.mxu2 %v4800_v10 }
  0x7c   :  { %908 = vmatpush.msrb.mxu3 %v4792_v4  ;;  %849 = vmatpush.msrb.mxu0 %v4794_v5 }
  0x7d   :  { %869 = vmatpush.msrb.mxu1 %v4798_v6  ;;  %889 = vmatpush.msrb.mxu2 %v4810_v36 }
  0x7e   :  { %909 = vmatpush.msrb.mxu3 %v4804_v19 }
  0x9b   :  { %v149_v8 = vpop.f32.mrf.mxu0  ;;  %v172_v11 = vpop.f32.mrf.mxu1 }
  0x9c   :  { %v150_v16 = vadd.f32 %v149_v8, %v117_v13  ;;  %v173_v17 = vadd.f32 %v172_v11, %v118_v14 }
  0x9e   :  { %v1242_v22 = vrot.slane %v150_v16, 6  ;;  %v1243_v23 = vrot.slane %v173_v17, 6  ;;  %v1476_v24 = vrot.slane %v150_v16, 2  ;;  %v1477_v28 = vrot.slane %v173_v17, 2 }
  0xa4   :  { %v152_v20 = vpop.f32.mrf.mxu0 }
  0xa5   :  { %v175_v21 = vpop.f32.mrf.mxu1  ;;  %v153_v25 = vadd.f32 %v152_v20, %v117_v13 }
  0xa6   :  { %v176_v26 = vadd.f32 %v175_v21, %v118_v14  ;;  %v218_v27 = vpop.f32.mrf.mxu3 }
  0xa7   :  { %v523_v31 = vrot.slane %v153_v25, 2  ;;  %v4964_v33 = vsel %vm277_vm1, %v153_v25, %v1242_v22  ;;  %v4972_v35 = vsel %vm277_vm1, %v153_v25, %v1476_v24  ;;  %v219_v39 = vadd.f32 %v218_v27, %v120_v29 }
  0xa8   :  { %v524_v32 = vrot.slane %v176_v26, 2  ;;  %7006 = vst [vmem:[#allocation19_spill] sm:$0xff] %v4964_v33  ;;  %v4968_v34 = vsel %vm4958_vm2, %v176_v26, %v1243_v23  ;;  %v4987_v41 = vsel %vm4958_vm2, %v176_v26, %v1477_v28  ;;  %v293_v55 = vrot.slane %v153_v25, 6  ;;  %v5228_v33 = vld [vmem:[#allocation7 + $0x50] sm:$0xff] }
  0xa9   :  { %7007 = vst [vmem:[#allocation20_spill] sm:$0xff] %v4968_v34  ;;  %v4979_v38 = vsel %vm277_vm1, %v150_v16, %v523_v31  ;;  %v1245_v43 = vrot.slane %v219_v39, 6  ;;  %v1479_v46 = vrot.slane %v219_v39, 2  ;;  %v294_v57 = vrot.slane %v176_v26, 6  ;;  %v5224_v34 = vld [vmem:[#allocation7 + $0x48] sm:$0xff] }
  0xaa   :  { %7008 = vst [vmem:[#allocation21_spill] sm:$0xff] %v4972_v35  ;;  %v4983_v40 = vsel %vm4958_vm2, %v173_v17, %v524_v32  ;;  %v5014_v61 = vsel %vm277_vm1, %v150_v16, %v293_v55  ;;  %vm516_vm1 = vcmask 254976   ;;  %v5213_v35 = vld [vmem:[#allocation7 + $0x68] sm:$0xff] }
  0xab   :  { %7010 = vst [vmem:[#allocation23_spill] sm:$0xff] %v4979_v38  ;;  %v5019_v2 = vsel %vm4958_vm2, %v173_v17, %v294_v57 }
  0xac   :  { %7011 = vst [vmem:[#allocation24_spill] sm:$0xff] %v4983_v40 }
  0xad   :  { %7012 = vst [vmem:[#allocation25_spill] sm:$0xff] %v4987_v41  ;;  %v5209_v41 = vld [vmem:[#allocation7 + $0x60] sm:$0xff] }
  0xae   :  { %7036 = vst [vmem:[#allocation45_spill] sm:$0xff] %v5209_v41 }
  0xaf   :  { %v195_v44 = vpop.f32.mrf.mxu2  ;;  %7037 = vst [vmem:[#allocation46_spill] sm:$0xff] %v5213_v35 }
  0xb0   :  { %v221_v45 = vpop.f32.mrf.mxu3  ;;  %v196_v53 = vadd.f32 %v195_v44, %v119_v48  ;;  %7041 = vst [vmem:[#allocation50_spill] sm:$0xff] %v5224_v34 }
  0xb1   :  { %v222_v47 = vadd.f32 %v221_v45, %v120_v29 }
  0xb2   :  { %v1244_v59 = vrot.slane %v196_v53, 6  ;;  %v1478_v63 = vrot.slane %v196_v53, 2 }
  0xb3   :  { %v526_v51 = vrot.slane %v222_v47, 2  ;;  %v5001_v52 = vsel %vm4992_vm3, %v222_v47, %v1245_v43  ;;  %v5005_v54 = vsel %vm4992_vm3, %v222_v47, %v1479_v46  ;;  %v296_v10 = vrot.slane %v222_v47, 6 }
  0xb4   :  { %7016 = vst [vmem:[#allocation27_spill] sm:$0xff] %v5001_v52  ;;  %v5222_v52 = vld [vmem:[#allocation7 + $0x40] sm:$0xff] }
  0xb5   :  { %7017 = vst [vmem:[#allocation28_spill] sm:$0xff] %v5005_v54  ;;  %v5009_v56 = vsel %vm4992_vm3, %v219_v39, %v526_v51  ;;  %v5042_v11 = vsel %vm4992_vm3, %v219_v39, %v296_v10  ;;  %v5205_v54 = vld [vmem:[#allocation7 + $0x90] sm:$0xff] }
  0xb6   :  { %7018 = vst [vmem:[#allocation29_spill] sm:$0xff] %v5009_v56 }
  0xb7   :  { %7040 = vst [vmem:[#allocation49_spill] sm:$0xff] %v5222_v52 }
  0xb8   :  { %v198_v60 = vpop.f32.mrf.mxu2 }
  0xb9   :  { %v386_v62 = vpop.f32.mrf.mxu0  ;;  %v199_v0 = vadd.f32 %v198_v60, %v119_v48  ;;  %v406_v3 = vpop.f32.mrf.mxu1 }
  0xba   :  { %v449_v1 = vadd.f32 %v386_v62, %v5014_v61  ;;  %v450_v4 = vadd.f32 %v406_v3, %v5019_v2 }
  0xbb   :  { %v525_v19 = vrot.slane %v199_v0, 2  ;;  %v5030_v36 = vsel %vm5024_vm4, %v199_v0, %v1244_v59  ;;  %v5034_v8 = vsel %vm5024_vm4, %v199_v0, %v1478_v63  ;;  %v295_v23 = vrot.slane %v199_v0, 6 }
  0xbc   :  { %v3983_v6 = vmul.f32 -1.442695, %v449_v1  ;;  %7021 = vst [vmem:[#allocation30_spill] sm:$0xff] %v5030_v36  ;;  %v3984_v7 = vmul.f32 -1.442695, %v450_v4  ;;  %v5215_v36 = vld [vmem:[#allocation7 + $0x70] sm:$0xff] }
  0xbd   :  { %7022 = vst [vmem:[#allocation31_spill] sm:$0xff] %v5034_v8  ;;  %v5038_v9 = vsel %vm5024_vm4, %v196_v53, %v525_v19  ;;  %v5047_v24 = vsel %vm5024_vm4, %v196_v53, %v295_v23 }
  0xbe   :  { %4065 = vpow2.f32 %v3983_v6  ;;  %7023 = vst [vmem:[#allocation32_spill] sm:$0xff] %v5038_v9 }
  0xbf   :  { %4067 = vpow2.f32 %v3984_v7  ;;  %7038 = vst [vmem:[#allocation47_spill] sm:$0xff] %v5215_v36 }
  0xc0   :  { %v446_v13 = vpop.f32.mrf.mxu3 }
  0xc1   :  { %v452_v14 = vadd.f32 %v446_v13, %v5042_v11  ;;  %v426_v25 = vpop.f32.mrf.mxu2 }
  0xc2   :  { %v451_v29 = vadd.f32 %v426_v25, %v5047_v24 }
  0xc3   :  { %v3985_v16 = vmul.f32 -1.442695, %v452_v14 }
  0xc4   :  { %v4066_v17 = vpop.eup %4065 }
  0xc5   :  { %v4068_v20 = vpop.eup %4067  ;;  %v456_v21 = vadd.f32 1.0, %v4066_v17  ;;  %4069 = vpow2.f32 %v3985_v16 }
  0xc6   :  { %v475_v22 = vadd.f32 1.0, %v4068_v20 }
  0xc7   :  { %4071 = vrcp.f32 %v456_v21  ;;  %v468_v44 = vand.u32 2147483648, %v456_v21  ;;  %v466_v47 = vand.u32 2147483647, %v456_v21  ;;  %vm462_vm7 = vweird.f32 %v456_v21 }
  0xc8   :  { %4073 = vrcp.f32 %v475_v22  ;;  %v487_v45 = vand.u32 2147483648, %v475_v22  ;;  %v485_v49 = vand.u32 2147483647, %v475_v22  ;;  %vm481_vm8 = vweird.f32 %v475_v22 }
  0xc9   :  { %v469_v57 = vor.u32 1.1754944e-38, %v468_v44  ;;  %vm467_vm10 = vcmp.eq.f32.partialorder %v466_v47, 8.507059e+37 }
  0xca   :  { %v488_v60 = vor.u32 1.1754944e-38, %v487_v45  ;;  %vm486_vm12 = vcmp.eq.f32.partialorder %v485_v49, 8.507059e+37 }
  0xcb   :  { %v4070_v26 = vpop.eup %4069 }
  0xcc   :  { %v495_v27 = vadd.f32 1.0, %v4070_v26 }
  0xcd   :  { %v4072_v28 = vpop.eup %4071 }
  0xce   :  { %v4074_v30 = vpop.eup %4073  ;;  %v458_v31 = vmul.f32 %v4072_v28, %v456_v21  ;;  %4075 = vrcp.f32 %v495_v27  ;;  %vm463_vm5 = vweird.f32 %v4072_v28  ;;  %v507_v13 = vand.u32 2147483648, %v495_v27 }
  0xcf   :  { %v477_v32 = vmul.f32 %v4074_v30, %v475_v22  ;;  %4077 = vtanh.f32 %v451_v29  ;;  %vm482_vm6 = vweird.f32 %v4074_v30  ;;  %vm464_vm9 = vmor %vm462_vm7, %vm463_vm5  ;;  %vm501_vm14 = vweird.f32 %v495_v27 }
  0xd0   :  { %v459_v39 = vsub.f32 1.0, %v458_v31  ;;  %vm483_vm11 = vmor %vm481_vm8, %vm482_vm6  ;;  %v505_v14 = vand.u32 2147483647, %v495_v27  ;;  %v508_v17 = vor.u32 1.1754944e-38, %v507_v13 }
  0xd1   :  { %v478_v43 = vsub.f32 1.0, %v477_v32 }
  0xd2   :  { %v460_v46 = vmul.f32 %v4072_v28, %v459_v39  ;;  %vm506_vm0 = vcmp.eq.f32.partialorder %v505_v14, 8.507059e+37 }
  0xd3   :  { %v479_v48 = vmul.f32 %v4074_v30, %v478_v43 }
  0xd4   :  { %v4076_v51 = vpop.eup %4075  ;;  %v461_v53 = vadd.f32 %v4072_v28, %v460_v46 }
  0xd5   :  { %v497_v55 = vmul.f32 %v4076_v51, %v495_v27  ;;  %v480_v59 = vadd.f32 %v4074_v30, %v479_v48  ;;  %v4078_v63 = vpop.eup %4077  ;;  %vm502_vm13 = vweird.f32 %v4076_v51 }
  0xd6   :  { %v465_v62 = vsel %vm464_vm9, %v4072_v28, %v461_v53  ;;  %vm503_vm15 = vmor %vm501_vm14, %vm502_vm13  ;;  %vm761_vm14 = vcmask 257026  }
  0xd7   :  { %v498_v0 = vsub.f32 1.0, %v497_v55  ;;  %v470_v1 = vsel %vm467_vm10, %v469_v57, %v465_v62  ;;  %v484_v3 = vsel %vm483_vm11, %v4074_v30, %v480_v59 }
  0xd8   :  { %v489_v4 = vsel %vm486_vm12, %v488_v60, %v484_v3  ;;  %v512_v5 = vmul.f32 %v4078_v63, %v470_v1 }
  0xd9   :  { %v499_v6 = vmul.f32 %v4076_v51, %v498_v0  ;;  %v511_v10 = vmul.f32 0.0, %v489_v4 }
  0xdb   :  { %v5050_v19 = vadd.f32 %v512_v5, %v511_v10  ;;  %v500_v7 = vadd.f32 %v4076_v51, %v499_v6 }
  0xdd   :  { %4079 = vtanh.f32 %v5050_v19  ;;  %v504_v16 = vsel %vm503_vm15, %v4076_v51, %v500_v7 }
  0xde   :  { %v509_v21 = vsel %vm506_vm0, %v508_v17, %v504_v16 }
  0xe3   :  { %v4080_v20 = vpop.eup %4079 }
  0xe4   :  { %v515_v22 = vmul.f32 %v4080_v20, %v509_v21 }
  0xe6   :  { %519 = vrot.lane.b32.xlu0 %v515_v22, %s4522_s3  ;;  %615 = vmatmul.f32.vlgmr.msra.gmra.mxu0 %v515_v22  ;;  %517 = vst.msk [vmem:[#allocation2] sm:$0x3] %vm516_vm1, %v515_v22 }
  0xe7   :  { %635 = vmatmul.f32.vlgmr.msra.gmra.mxu1 %v515_v22  ;;  %655 = vmatmul.f32.vlgmr.msra.gmra.mxu2 %v515_v22 }
  0xe8   :  { %675 = vmatmul.f32.vlgmr.msra.gmra.mxu3 %v515_v22 }
 0x158   :  { %v520_v23 = vpop.permute.xlu0 %519 }
 0x159   :  { %522 = vst.msk [vmem:[#allocation3 + $0xe] sm:$0x3] %vm516_vm1, %v520_v23 }
 0x163   :  { %v616_v25 = vpop.f32.mrf.mxu0 }
 0x164   :  { %v683_v26 = vrot.slane %v616_v25, 6  ;;  %v636_v27 = vpop.f32.mrf.mxu1 }
 0x165   :  { %v684_v28 = vrot.slane %v636_v27, 6 }
 0x166   :  { %v691_v29 = vadd.f32 %v683_v26, %v4979_v38  ;;  %v754_v26 = vrot.slane %v5050_v19, 6  ;;  %v5240_v38 = vld [vmem:[#allocation7 + $0x30] sm:$0xff] }
 0x167   :  { %v692_v30 = vadd.f32 %v684_v28, %v4983_v40 }
 0x168   :  { %v3986_v31 = vmul.f32 -1.442695, %v691_v29 }
 0x169   :  { %v3987_v32 = vmul.f32 -1.442695, %v692_v30 }
 0x16a   :  { %4081 = vpow2.f32 %v3986_v31  ;;  %v656_v51 = vpop.f32.mrf.mxu2 }
 0x16b   :  { %4083 = vpow2.f32 %v3987_v32  ;;  %v676_v39 = vpop.f32.mrf.mxu3  ;;  %v685_v53 = vrot.slane %v656_v51, 6 }
 0x16c   :  { %v686_v43 = vrot.slane %v676_v39, 6 }
 0x16d   :  { %v693_v59 = vadd.f32 %v685_v53, %v5038_v9  ;;  %v5230_v9 = vld [vmem:[#allocation7 + $0x58] sm:$0xff] }
 0x16e   :  { %v694_v44 = vadd.f32 %v686_v43, %v5009_v56 }
 0x170   :  { %v4082_v45 = vpop.eup %4081  ;;  %v3988_v46 = vmul.f32 -1.442695, %v694_v44 }
 0x171   :  { %v4084_v47 = vpop.eup %4083  ;;  %v698_v48 = vadd.f32 1.0, %v4082_v45 }
 0x172   :  { %v717_v49 = vadd.f32 1.0, %v4084_v47  ;;  %4085 = vpow2.f32 %v3988_v46 }
 0x173   :  { %4087 = vrcp.f32 %v698_v48  ;;  %v710_v4 = vand.u32 2147483648, %v698_v48  ;;  %v708_v10 = vand.u32 2147483647, %v698_v48  ;;  %vm704_vm4 = vweird.f32 %v698_v48 }
 0x174   :  { %4089 = vrcp.f32 %v717_v49  ;;  %v729_v5 = vand.u32 2147483648, %v717_v49  ;;  %v727_v13 = vand.u32 2147483647, %v717_v49  ;;  %vm723_vm5 = vweird.f32 %v717_v49 }
 0x175   :  { %v711_v17 = vor.u32 1.1754944e-38, %v710_v4  ;;  %vm709_vm8 = vcmp.eq.f32.partialorder %v708_v10, 8.507059e+37  ;;  %v5091_v4 = vld [vmem:[#allocation7 + $0x1a0] sm:$0xff]  ;;  %v5099_v10 = vld [vmem:[#allocation7 + $0x1b8] sm:$0xff] }
 0x176   :  { %v730_v21 = vor.u32 1.1754944e-38, %v729_v5  ;;  %vm728_vm9 = vcmp.eq.f32.partialorder %v727_v13, 8.507059e+37  ;;  %7027 = vst [vmem:[#allocation36_spill] sm:$0xff] %v5091_v4  ;;  %v5093_v5 = vld [vmem:[#allocation7 + $0x1a8] sm:$0xff] }
 0x177   :  { %7028 = vst [vmem:[#allocation37_spill] sm:$0xff] %v5093_v5  ;;  %v5105_v13 = vld [vmem:[#allocation7 + $0x188] sm:$0xff] }
 0x178   :  { %v4086_v55 = vpop.eup %4085 }
 0x179   :  { %v4088_v57 = vpop.eup %4087  ;;  %v737_v60 = vadd.f32 1.0, %v4086_v55  ;;  %v5066_v55 = vld [vmem:[#allocation7 + $0x1e0] sm:$0xff] }
 0x17a   :  { %v4090_v62 = vpop.eup %4089  ;;  %v700_v63 = vmul.f32 %v4088_v57, %v698_v48  ;;  %vm705_vm2 = vweird.f32 %v4088_v57  ;;  %7024 = vst [vmem:[#allocation33_spill] sm:$0xff] %v5066_v55  ;;  %1069 = vmatpush.msra.mxu0 %v5066_v55 }
 0x17b   :  { %v719_v0 = vmul.f32 %v4090_v62, %v717_v49  ;;  %4091 = vrcp.f32 %v737_v60  ;;  %vm724_vm3 = vweird.f32 %v4090_v62  ;;  %vm706_vm6 = vmor %vm704_vm4, %vm705_vm2  ;;  %v749_v45 = vand.u32 2147483648, %v737_v60 }
 0x17c   :  { %v701_v1 = vsub.f32 1.0, %v700_v63  ;;  %4093 = vtanh.f32 %v693_v59  ;;  %vm725_vm7 = vmor %vm723_vm5, %vm724_vm3  ;;  %vm743_vm11 = vweird.f32 %v737_v60  ;;  %v747_v46 = vand.u32 2147483647, %v737_v60  ;;  %v5070_v59 = vld [vmem:[#allocation7 + $0x1f0] sm:$0xff]  ;;  %v5079_v63 = vld [vmem:[#allocation7 + $0x1c0] sm:$0xff] }
 0x17d   :  { %v720_v3 = vsub.f32 1.0, %v719_v0  ;;  %v750_v19 = vor.u32 1.1754944e-38, %v749_v45  ;;  %1109 = vmatpush.msra.mxu2 %v5070_v59  ;;  %v5081_v0 = vld [vmem:[#allocation7 + $0x1c8] sm:$0xff]  ;;  %1070 = vmatpush.msra.mxu0 %v5079_v63 }
 0x17e   :  { %v702_v6 = vmul.f32 %v4088_v57, %v701_v1  ;;  %vm748_vm13 = vcmp.eq.f32.partialorder %v747_v46, 8.507059e+37  ;;  %v5083_v1 = vld [vmem:[#allocation7 + $0x1d0] sm:$0xff]  ;;  %v5153_v45 = vld [vmem:[#allocation7 + $0x108] sm:$0xff] }
 0x17f   :  { %v721_v7 = vmul.f32 %v4090_v62, %v720_v3  ;;  %v5087_v3 = vld [vmem:[#allocation7 + $0x1d8] sm:$0xff]  ;;  %1110 = vmatpush.msra.mxu2 %v5083_v1  ;;  %1071 = vmatpush.msra.mxu0 %v5091_v4  ;;  %v5155_v46 = vld [vmem:[#allocation7 + $0x110] sm:$0xff] }
 0x180   :  { %v703_v14 = vadd.f32 %v4088_v57, %v702_v6  ;;  %7026 = vst [vmem:[#allocation35_spill] sm:$0xff] %v5087_v3  ;;  %v5095_v6 = vld [vmem:[#allocation7 + $0x1b0] sm:$0xff] }
 0x181   :  { %v4092_v16 = vpop.eup %4091  ;;  %v722_v20 = vadd.f32 %v4090_v62, %v721_v7  ;;  %7029 = vst [vmem:[#allocation38_spill] sm:$0xff] %v5095_v6  ;;  %1111 = vmatpush.msra.mxu2 %v5095_v6  ;;  %v5103_v7 = vld [vmem:[#allocation7 + $0x180] sm:$0xff] }
 0x182   :  { %v707_v22 = vsel %vm706_vm6, %v4088_v57, %v703_v14  ;;  %v739_v23 = vmul.f32 %v4092_v16, %v737_v60  ;;  %v4094_v25 = vpop.eup %4093  ;;  %vm744_vm10 = vweird.f32 %v4092_v16  ;;  %v5068_v57 = vld [vmem:[#allocation7 + $0x1e8] sm:$0xff]  ;;  %v5107_v14 = vld [vmem:[#allocation7 + $0x190] sm:$0xff]  ;;  %1072 = vmatpush.msra.mxu0 %v5103_v7 }
 0x183   :  { %v712_v27 = vsel %vm709_vm8, %v711_v17, %v707_v22  ;;  %v726_v28 = vsel %vm725_vm7, %v4090_v62, %v722_v20  ;;  %vm745_vm12 = vmor %vm743_vm11, %vm744_vm10  ;;  %7025 = vst [vmem:[#allocation34_spill] sm:$0xff] %v5068_v57  ;;  %1089 = vmatpush.msra.mxu1 %v5068_v57  ;;  %v5074_v62 = vld [vmem:[#allocation7 + $0x1f8] sm:$0xff]  ;;  %1112 = vmatpush.msra.mxu2 %v5107_v14  ;;  %v5115_v17 = vld [vmem:[#allocation7 + $0x160] sm:$0xff] }
 0x184   :  { %v731_v29 = vsel %vm728_vm9, %v730_v21, %v726_v28  ;;  %v757_v30 = vmul.f32 %v4094_v25, %v712_v27  ;;  %v740_v31 = vsub.f32 1.0, %v739_v23  ;;  %1129 = vmatpush.msra.mxu3 %v5074_v62  ;;  %v5117_v20 = vld [vmem:[#allocation7 + $0x168] sm:$0xff]  ;;  %v5119_v21 = vld [vmem:[#allocation7 + $0x170] sm:$0xff]  ;;  %1073 = vmatpush.msra.mxu0 %v5115_v17  ;;  %v5123_v22 = vld [vmem:[#allocation7 + $0x178] sm:$0xff] }
 0x185   :  { %v756_v32 = vmul.f32 %v754_v26, %v731_v29  ;;  %1090 = vmatpush.msra.mxu1 %v5081_v0  ;;  %7031 = vst [vmem:[#allocation40_spill] sm:$0xff] %v5119_v21  ;;  %1113 = vmatpush.msra.mxu2 %v5119_v21  ;;  %v5127_v23 = vld [vmem:[#allocation7 + $0x140] sm:$0xff]  ;;  %v5129_v25 = vld [vmem:[#allocation7 + $0x148] sm:$0xff]  ;;  %v5131_v26 = vld [vmem:[#allocation7 + $0x150] sm:$0xff] }
 0x186   :  { %v741_v39 = vmul.f32 %v4092_v16, %v740_v31  ;;  %1130 = vmatpush.msra.mxu3 %v5087_v3  ;;  %7032 = vst [vmem:[#allocation41_spill] sm:$0xff] %v5127_v23  ;;  %1074 = vmatpush.msra.mxu0 %v5127_v23  ;;  %v5135_v27 = vld [vmem:[#allocation7 + $0x158] sm:$0xff]  ;;  %v5139_v28 = vld [vmem:[#allocation7 + $0x120] sm:$0xff]  ;;  %v5141_v29 = vld [vmem:[#allocation7 + $0x128] sm:$0xff] }
 0x187   :  { %v5061_v43 = vadd.f32 %v757_v30, %v756_v32  ;;  %1091 = vmatpush.msra.mxu1 %v5093_v5  ;;  %7033 = vst [vmem:[#allocation42_spill] sm:$0xff] %v5129_v25  ;;  %1114 = vmatpush.msra.mxu2 %v5131_v26  ;;  %v5143_v30 = vld [vmem:[#allocation7 + $0x130] sm:$0xff]  ;;  %v5147_v31 = vld [vmem:[#allocation7 + $0x138] sm:$0xff] }
 0x188   :  { %v742_v44 = vadd.f32 %v4092_v16, %v741_v39  ;;  %1131 = vmatpush.msra.mxu3 %v5099_v10  ;;  %7034 = vst [vmem:[#allocation43_spill] sm:$0xff] %v5135_v27  ;;  %1075 = vmatpush.msra.mxu0 %v5139_v28 }
 0x189   :  { %4095 = vtanh.f32 %v5061_v43  ;;  %1092 = vmatpush.msra.mxu1 %v5105_v13  ;;  %1115 = vmatpush.msra.mxu2 %v5143_v30 }
 0x18a   :  { %v746_v47 = vsel %vm745_vm12, %v4092_v16, %v742_v44  ;;  %v5111_v16 = vld [vmem:[#allocation7 + $0x198] sm:$0xff]  ;;  %v5151_v44 = vld [vmem:[#allocation7 + $0x100] sm:$0xff]  ;;  %vm996_vm12 = vcmask 259076  }
 0x18b   :  { %v751_v49 = vsel %vm748_vm13, %v750_v19, %v746_v47  ;;  %7030 = vst [vmem:[#allocation39_spill] sm:$0xff] %v5111_v16  ;;  %1132 = vmatpush.msra.mxu3 %v5111_v16  ;;  %1093 = vmatpush.msra.mxu1 %v5117_v20 }
 0x18c   :  { %1076 = vmatpush.msra.mxu0 %v5151_v44  ;;  %1116 = vmatpush.msra.mxu2 %v5155_v46 }
 0x18d   :  { %1133 = vmatpush.msra.mxu3 %v5123_v22  ;;  %1094 = vmatpush.msra.mxu1 %v5129_v25 }
 0x18f   :  { %v4096_v48 = vpop.eup %4095  ;;  %1134 = vmatpush.msra.mxu3 %v5135_v27  ;;  %1095 = vmatpush.msra.mxu1 %v5141_v29 }
 0x190   :  { %v760_v51 = vmul.f32 %v4096_v48, %v751_v49  ;;  %v5159_v48 = vld [vmem:[#allocation7 + $0x118] sm:$0xff]  ;;  %v5163_v49 = vld [vmem:[#allocation7 + $0xe0] sm:$0xff] }
 0x191   :  { %1135 = vmatpush.msra.mxu3 %v5147_v31  ;;  %1096 = vmatpush.msra.mxu1 %v5153_v45 }
 0x192   :  { %764 = vrot.lane.b32.xlu0 %v760_v51, %s4522_s3  ;;  %v832_v53 = vrot.slane %v760_v51, 2  ;;  %762 = vst.msk [vmem:[#allocation2] sm:$0xc] %vm761_vm14, %v760_v51  ;;  %v5165_v51 = vld [vmem:[#allocation7 + $0xe8] sm:$0xff]  ;;  %1077 = vmatpush.msra.mxu0 %v5163_v49 }
 0x193   :  { %1136 = vmatpush.msra.mxu3 %v5159_v48  ;;  %1097 = vmatpush.msra.mxu1 %v5165_v51 }
 0x194   :  { %850 = vmatmul.f32.vlgmr.msrb.gmra.mxu0 %v832_v53  ;;  %870 = vmatmul.f32.vlgmr.msrb.gmra.mxu1 %v832_v53 }
 0x195   :  { %890 = vmatmul.f32.vlgmr.msrb.gmra.mxu2 %v832_v53  ;;  %910 = vmatmul.f32.vlgmr.msrb.gmra.mxu3 %v832_v53  ;;  %v5167_v53 = vld [vmem:[#allocation7 + $0xf0] sm:$0xff] }
 0x196   :  { %1117 = vmatpush.msra.mxu2 %v5167_v53  ;;  %1078 = vmatpush.msra.mxu0 %v5177_v42 }
 0x197   :  { %1098 = vmatpush.msra.mxu1 %v5179_v58 }
 0x198   :  { %1118 = vmatpush.msra.mxu2 %v5181_v18 }
 0x19a   :  { %1119 = vmatpush.msra.mxu2 %v5193_v50 }
 0x19c   :  { %1120 = vmatpush.msra.mxu2 %v5205_v54 }
 0x19e   :  { %1121 = vmatpush.msra.mxu2 %v5215_v36  ;;  %v5256_v36 = vld [vmem:[#allocation7 + $0x10] sm:$0xff] }
 0x19f   :  { %7043 = vst [vmem:[#allocation52_spill] sm:$0xff] %v5256_v36 }
 0x1a0   :  { %1122 = vmatpush.msra.mxu2 %v5228_v33 }
 0x1a2   :  { %1123 = vmatpush.msra.mxu2 %v5240_v38 }
 0x1a4   :  { %1124 = vmatpush.msra.mxu2 %v5256_v36 }
 0x1a6   :  { %1360 = vmatpush.msrb.mxu2 %v5070_v59 }
 0x1a8   :  { %1361 = vmatpush.msrb.mxu2 %v5083_v1 }
 0x1aa   :  { %1362 = vmatpush.msrb.mxu2 %v5095_v6 }
 0x1ac   :  { %1363 = vmatpush.msrb.mxu2 %v5107_v14 }
 0x1ae   :  { %1364 = vmatpush.msrb.mxu2 %v5119_v21 }
 0x1b0   :  { %1365 = vmatpush.msrb.mxu2 %v5131_v26 }
 0x1b2   :  { %1366 = vmatpush.msrb.mxu2 %v5143_v30 }
 0x1b4   :  { %1367 = vmatpush.msrb.mxu2 %v5155_v46 }
 0x1b6   :  { %1368 = vmatpush.msrb.mxu2 %v5167_v53 }
 0x1b8   :  { %1369 = vmatpush.msrb.mxu2 %v5181_v18 }
 0x1ba   :  { %1370 = vmatpush.msrb.mxu2 %v5193_v50 }
 0x1bc   :  { %1371 = vmatpush.msrb.mxu2 %v5205_v54 }
 0x204   :  { %v765_v60 = vpop.permute.xlu0 %764 }
 0x205   :  { %767 = vst.msk [vmem:[#allocation3 + $0xa] sm:$0xc] %vm761_vm14, %v765_v60 }
 0x211   :  { %v851_v32 = vpop.f32.mrf.mxu0  ;;  %v871_v39 = vpop.f32.mrf.mxu1 }
 0x212   :  { %v918_v47 = vrot.slane %v851_v32, 4  ;;  %v919_v19 = vrot.slane %v871_v39, 4  ;;  %v5173_v39 = vld [vmem:[#allocation7 + $0xf8] sm:$0xff] }
 0x213   :  { %1137 = vmatpush.msra.mxu3 %v5173_v39 }
 0x214   :  { %v926_v60 = vadd.f32 %v918_v47, %v5014_v61  ;;  %v927_v32 = vadd.f32 %v919_v19, %v5019_v2  ;;  %v5185_v2 = vld [vmem:[#allocation7 + $0xd8] sm:$0xff]  ;;  %v5189_v47 = vld [vmem:[#allocation7 + $0xa0] sm:$0xff]  ;;  %v5191_v19 = vld [vmem:[#allocation7 + $0xa8] sm:$0xff] }
 0x215   :  { %1138 = vmatpush.msra.mxu3 %v5185_v2  ;;  %1079 = vmatpush.msra.mxu0 %v5189_v47 }
 0x216   :  { %v3989_v37 = vmul.f32 -1.442695, %v926_v60  ;;  %v3990_v61 = vmul.f32 -1.442695, %v927_v32  ;;  %1099 = vmatpush.msra.mxu1 %v5191_v19  ;;  %v5197_v60 = vld [vmem:[#allocation7 + $0xb8] sm:$0xff]  ;;  %v5199_v32 = vld [vmem:[#allocation7 + $0x80] sm:$0xff] }
 0x217   :  { %1139 = vmatpush.msra.mxu3 %v5197_v60  ;;  %1080 = vmatpush.msra.mxu0 %v5199_v32 }
 0x218   :  { %4097 = vpow2.f32 %v3989_v37  ;;  %v911_v15 = vpop.f32.mrf.mxu3  ;;  %v5207_v37 = vld [vmem:[#allocation7 + $0x98] sm:$0xff]  ;;  %1100 = vmatpush.msra.mxu1 %v5201_v12 }
 0x219   :  { %4099 = vpow2.f32 %v3990_v61  ;;  %v921_v8 = vrot.slane %v911_v15, 4  ;;  %7035 = vst [vmem:[#allocation44_spill] sm:$0xff] %v5207_v37  ;;  %v5217_v61 = vld [vmem:[#allocation7 + $0x78] sm:$0xff]  ;;  %1140 = vmatpush.msra.mxu3 %v5207_v37  ;;  %1081 = vmatpush.msra.mxu0 %v5209_v41 }
 0x21a   :  { %7039 = vst [vmem:[#allocation48_spill] sm:$0xff] %v5217_v61  ;;  %1101 = vmatpush.msra.mxu1 %v5213_v35  ;;  %v5242_v35 = vld [vmem:[#allocation7 + $0x38] sm:$0xff] }
 0x21b   :  { %v929_v15 = vadd.f32 %v921_v8, %v5042_v11  ;;  %1141 = vmatpush.msra.mxu3 %v5217_v61  ;;  %v5234_v8 = vld [vmem:[#allocation7 + $0x20] sm:$0xff]  ;;  %v5236_v11 = vld [vmem:[#allocation7 + $0x28] sm:$0xff]  ;;  %1082 = vmatpush.msra.mxu0 %v5222_v52  ;;  %7042 = vst [vmem:[#allocation51_spill] sm:$0xff] %v5242_v35  ;;  %v891_v61 = vpop.f32.mrf.mxu2 }
 0x21c   :  { %1102 = vmatpush.msra.mxu1 %v5224_v34  ;;  %v5252_v34 = vld [vmem:[#allocation7] sm:$0xff]  ;;  %v5254_v52 = vld [vmem:[#allocation7 + $0x8] sm:$0xff] }
 0x21d   :  { %v3991_v56 = vmul.f32 -1.442695, %v929_v15  ;;  %1142 = vmatpush.msra.mxu3 %v5230_v9  ;;  %1083 = vmatpush.msra.mxu0 %v5234_v8 }
 0x21e   :  { %v4098_v40 = vpop.eup %4097  ;;  %1103 = vmatpush.msra.mxu1 %v5236_v11 }
 0x21f   :  { %v4100_v41 = vpop.eup %4099  ;;  %v5244_v37 = vadd.f32 1.0, %v4098_v40  ;;  %4101 = vpow2.f32 %v3991_v56  ;;  %1143 = vmatpush.msra.mxu3 %v5242_v35  ;;  %v5261_v40 = vld [vmem:[#allocation7 + $0x18] sm:$0xff]  ;;  %1084 = vmatpush.msra.mxu0 %v5252_v34 }
 0x220   :  { %v5248_v15 = vadd.f32 1.0, %v4100_v41  ;;  %1104 = vmatpush.msra.mxu1 %v5254_v52  ;;  %v920_v41 = vrot.slane %v891_v61, 4 }
 0x221   :  { %4103 = vrcp.f32 %v5244_v37  ;;  %1144 = vmatpush.msra.mxu3 %v5261_v40  ;;  %1320 = vmatpush.msrb.mxu0 %v5066_v55  ;;  %v943_v6 = vand.u32 2147483647, %v5244_v37  ;;  %vm939_vm2 = vweird.f32 %v5244_v37 }
 0x222   :  { %4105 = vrcp.f32 %v5248_v15  ;;  %1340 = vmatpush.msrb.mxu1 %v5068_v57  ;;  %v928_v36 = vadd.f32 %v920_v41, %v5047_v24  ;;  %vm958_vm3 = vweird.f32 %v5248_v15 }
 0x223   :  { %1380 = vmatpush.msrb.mxu3 %v5074_v62  ;;  %1321 = vmatpush.msrb.mxu0 %v5079_v63  ;;  %vm944_vm6 = vcmp.eq.f32.partialorder %v943_v6, 8.507059e+37 }
 0x224   :  { %1341 = vmatpush.msrb.mxu1 %v5081_v0 }
 0x225   :  { %v4102_v56 = vpop.eup %4101  ;;  %1381 = vmatpush.msrb.mxu3 %v5087_v3  ;;  %1322 = vmatpush.msrb.mxu0 %v5091_v4  ;;  %v945_v3 = vand.u32 2147483648, %v5244_v37 }
 0x226   :  { %v5272_v35 = vadd.f32 1.0, %v4102_v56  ;;  %1342 = vmatpush.msrb.mxu1 %v5093_v5  ;;  %v964_v5 = vand.u32 2147483648, %v5248_v15 }
 0x227   :  { %v4104_v61 = vpop.eup %4103  ;;  %1382 = vmatpush.msrb.mxu3 %v5099_v10  ;;  %1323 = vmatpush.msrb.mxu0 %v5103_v7 }
 0x228   :  { %v4106_v55 = vpop.eup %4105  ;;  %v935_v57 = vmul.f32 %v4104_v61, %v5244_v37  ;;  %4107 = vrcp.f32 %v5272_v35  ;;  %1343 = vmatpush.msrb.mxu1 %v5105_v13  ;;  %vm940_vm15 = vweird.f32 %v4104_v61  ;;  %v965_v37 = vor.u32 1.1754944e-38, %v964_v5 }
 0x229   :  { %v954_v56 = vmul.f32 %v4106_v55, %v5248_v15  ;;  %4109 = vtanh.f32 %v928_v36  ;;  %1383 = vmatpush.msrb.mxu3 %v5111_v16  ;;  %1324 = vmatpush.msrb.mxu0 %v5115_v17  ;;  %vm959_vm0 = vweird.f32 %v4106_v55  ;;  %vm941_vm4 = vmor %vm939_vm2, %vm940_vm15  ;;  %vm978_vm9 = vweird.f32 %v5272_v35 }
 0x22a   :  { %v936_v24 = vsub.f32 1.0, %v935_v57  ;;  %1344 = vmatpush.msrb.mxu1 %v5117_v20  ;;  %vm960_vm5 = vmor %vm958_vm3, %vm959_vm0 }
 0x22b   :  { %v955_v41 = vsub.f32 1.0, %v954_v56  ;;  %v962_v56 = vand.u32 2147483647, %v5248_v15  ;;  %1384 = vmatpush.msrb.mxu3 %v5123_v22  ;;  %1325 = vmatpush.msrb.mxu0 %v5127_v23 }
 0x22c   :  { %v937_v4 = vmul.f32 %v4104_v61, %v936_v24  ;;  %1345 = vmatpush.msrb.mxu1 %v5129_v25  ;;  %v946_v24 = vor.u32 1.1754944e-38, %v945_v3 }
 0x22d   :  { %v956_v57 = vmul.f32 %v4106_v55, %v955_v41  ;;  %1385 = vmatpush.msrb.mxu3 %v5135_v27  ;;  %1326 = vmatpush.msrb.mxu0 %v5139_v28  ;;  %vm963_vm7 = vcmp.eq.f32.partialorder %v962_v56, 8.507059e+37  ;;  %v7046_v56 = vld [vmem:[#allocation46_spill] sm:$0xff] }
 0x22e   :  { %v5298_v36 = vpop.eup %4107  ;;  %v938_v16 = vadd.f32 %v4104_v61, %v937_v4  ;;  %v989_v4 = vrot.slane %v5061_v43, 6  ;;  %1346 = vmatpush.msrb.mxu1 %v5141_v29 }
 0x22f   :  { %v957_v41 = vadd.f32 %v4106_v55, %v956_v57  ;;  %v974_v21 = vmul.f32 %v5298_v36, %v5272_v35  ;;  %v4110_v3 = vpop.eup %4109  ;;  %1386 = vmatpush.msrb.mxu3 %v5147_v31  ;;  %1327 = vmatpush.msrb.mxu0 %v5151_v44  ;;  %vm979_vm8 = vweird.f32 %v5298_v36 }
 0x230   :  { %v942_v23 = vsel %vm941_vm4, %v4104_v61, %v938_v16  ;;  %1347 = vmatpush.msrb.mxu1 %v5153_v45  ;;  %vm980_vm10 = vmor %vm978_vm9, %vm979_vm8  ;;  %v7044_v61 = vld [vmem:[#allocation44_spill] sm:$0xff] }
 0x231   :  { %v947_v15 = vsel %vm944_vm6, %v946_v24, %v942_v23  ;;  %v961_v57 = vsel %vm960_vm5, %v4106_v55, %v957_v41  ;;  %v975_v25 = vsub.f32 1.0, %v974_v21  ;;  %1387 = vmatpush.msrb.mxu3 %v5159_v48  ;;  %1328 = vmatpush.msrb.mxu0 %v5163_v49  ;;  %v984_v21 = vand.u32 2147483648, %v5272_v35 }
 0x232   :  { %v966_v27 = vsel %vm963_vm7, %v965_v37, %v961_v57  ;;  %v992_v43 = vmul.f32 %v4110_v3, %v947_v15  ;;  %1348 = vmatpush.msrb.mxu1 %v5165_v51  ;;  %v982_v23 = vand.u32 2147483647, %v5272_v35  ;;  %v7045_v35 = vld [vmem:[#allocation45_spill] sm:$0xff]  ;;  %v7050_v15 = vld [vmem:[#allocation50_spill] sm:$0xff] }
 0x233   :  { %v991_v5 = vmul.f32 %v989_v4, %v966_v27  ;;  %v976_v6 = vmul.f32 %v5298_v36, %v975_v25  ;;  %1388 = vmatpush.msrb.mxu3 %v5173_v39  ;;  %1329 = vmatpush.msrb.mxu0 %v5177_v42  ;;  %v985_v27 = vor.u32 1.1754944e-38, %v984_v21  ;;  %v7047_v4 = vld [vmem:[#allocation47_spill] sm:$0xff]  ;;  %v7049_v3 = vld [vmem:[#allocation49_spill] sm:$0xff] }
 0x234   :  { %1349 = vmatpush.msrb.mxu1 %v5179_v58  ;;  %vm983_vm11 = vcmp.eq.f32.partialorder %v982_v23, 8.507059e+37  ;;  %1372 = vmatpush.msrb.mxu2 %v7047_v4  ;;  %v7055_v21 = vld [vmem:[#allocation35_spill] sm:$0xff]  ;;  %v7056_v23 = vld [vmem:[#allocation36_spill] sm:$0xff] }
 0x235   :  { %v5322_v55 = vadd.f32 %v992_v43, %v991_v5  ;;  %v977_v16 = vadd.f32 %v5298_v36, %v976_v6  ;;  %1389 = vmatpush.msrb.mxu3 %v5185_v2  ;;  %1330 = vmatpush.msrb.mxu0 %v5189_v47  ;;  %v7051_v43 = vld [vmem:[#allocation51_spill] sm:$0xff]  ;;  %v7052_v5 = vld [vmem:[#allocation52_spill] sm:$0xff]  ;;  %v7053_v6 = vld [vmem:[#allocation33_spill] sm:$0xff] }
 0x236   :  { %1350 = vmatpush.msrb.mxu1 %v5191_v19  ;;  %1373 = vmatpush.msrb.mxu2 %v5228_v33 }
 0x237   :  { %4111 = vtanh.f32 %v5322_v55  ;;  %1390 = vmatpush.msrb.mxu3 %v5197_v60  ;;  %v981_v25 = vsel %vm980_vm10, %v5298_v36, %v977_v16  ;;  %1331 = vmatpush.msrb.mxu0 %v5199_v32  ;;  %v7048_v36 = vld [vmem:[#allocation48_spill] sm:$0xff]  ;;  %v7054_v16 = vld [vmem:[#allocation34_spill] sm:$0xff] }
 0x238   :  { %1351 = vmatpush.msrb.mxu1 %v5201_v12  ;;  %v986_v41 = vsel %vm983_vm11, %v985_v27, %v981_v25  ;;  %1374 = vmatpush.msrb.mxu2 %v5240_v38  ;;  %v7057_v25 = vld [vmem:[#allocation37_spill] sm:$0xff]  ;;  %v7058_v27 = vld [vmem:[#allocation38_spill] sm:$0xff]  ;;  %vm1231_vm11 = vcmask 261126  }
 0x239   :  { %1391 = vmatpush.msrb.mxu3 %v7044_v61  ;;  %1332 = vmatpush.msrb.mxu0 %v7045_v35 }
 0x23a   :  { %1352 = vmatpush.msrb.mxu1 %v7046_v56  ;;  %1375 = vmatpush.msrb.mxu2 %v7052_v5 }
 0x23b   :  { %1392 = vmatpush.msrb.mxu3 %v7048_v36  ;;  %1333 = vmatpush.msrb.mxu0 %v7049_v3 }
 0x23c   :  { %1353 = vmatpush.msrb.mxu1 %v7050_v15 }
 0x23d   :  { %v4112_v24 = vpop.eup %4111  ;;  %1393 = vmatpush.msrb.mxu3 %v5230_v9  ;;  %1334 = vmatpush.msrb.mxu0 %v5234_v8 }
 0x23e   :  { %v995_v37 = vmul.f32 %v4112_v24, %v986_v41  ;;  %1354 = vmatpush.msrb.mxu1 %v5236_v11  ;;  %v1224_v41 = vrot.slane %v5322_v55, 6 }
 0x23f   :  { %1394 = vmatpush.msrb.mxu3 %v7051_v43  ;;  %1335 = vmatpush.msrb.mxu0 %v5252_v34 }
 0x240   :  { %999 = vrot.lane.b32.xlu1 %v995_v37, %s4522_s3  ;;  %v1067_v57 = vrot.slane %v995_v37, 4  ;;  %997 = vst.msk [vmem:[#allocation2] sm:$0x30] %vm996_vm12, %v995_v37  ;;  %1355 = vmatpush.msrb.mxu1 %v5254_v52 }
 0x241   :  { %1395 = vmatpush.msrb.mxu3 %v5261_v40 }
 0x242   :  { %1085 = vmatmul.f32.vlgmr.msra.gmra.mxu0 %v1067_v57  ;;  %1105 = vmatmul.f32.vlgmr.msra.gmra.mxu1 %v1067_v57 }
 0x243   :  { %1125 = vmatmul.f32.vlgmr.msra.gmra.mxu2 %v1067_v57  ;;  %1145 = vmatmul.f32.vlgmr.msra.gmra.mxu3 %v1067_v57 }
 0x244   :  { %1552 = vmatpush.msra.mxu0 %v7053_v6  ;;  %1572 = vmatpush.msra.mxu1 %v7054_v16 }
 0x245   :  { %1592 = vmatpush.msra.mxu2 %v5070_v59  ;;  %1612 = vmatpush.msra.mxu3 %v5074_v62  ;;  %v7059_v59 = vld [vmem:[#allocation39_spill] sm:$0xff]  ;;  %v7060_v62 = vld [vmem:[#allocation40_spill] sm:$0xff] }
 0x246   :  { %1553 = vmatpush.msra.mxu0 %v5079_v63  ;;  %1573 = vmatpush.msra.mxu1 %v5081_v0  ;;  %v7061_v63 = vld [vmem:[#allocation41_spill] sm:$0xff]  ;;  %v7062_v0 = vld [vmem:[#allocation42_spill] sm:$0xff] }
 0x247   :  { %1593 = vmatpush.msra.mxu2 %v5083_v1  ;;  %1613 = vmatpush.msra.mxu3 %v7055_v21  ;;  %v7063_v1 = vld [vmem:[#allocation43_spill] sm:$0xff] }
 0x248   :  { %1554 = vmatpush.msra.mxu0 %v7056_v23  ;;  %1574 = vmatpush.msra.mxu1 %v7057_v25 }
 0x249   :  { %1594 = vmatpush.msra.mxu2 %v7058_v27  ;;  %1614 = vmatpush.msra.mxu3 %v5099_v10 }
 0x24a   :  { %1555 = vmatpush.msra.mxu0 %v5103_v7  ;;  %1575 = vmatpush.msra.mxu1 %v5105_v13  ;;  %v7066_v13 = vld [vmem:[#allocation29_spill] sm:$0xff] }
 0x24b   :  { %1595 = vmatpush.msra.mxu2 %v5107_v14  ;;  %1615 = vmatpush.msra.mxu3 %v7059_v59 }
 0x24c   :  { %1556 = vmatpush.msra.mxu0 %v5115_v17  ;;  %1576 = vmatpush.msra.mxu1 %v5117_v20 }
 0x24d   :  { %1596 = vmatpush.msra.mxu2 %v7060_v62  ;;  %1616 = vmatpush.msra.mxu3 %v5123_v22 }
 0x24e   :  { %1557 = vmatpush.msra.mxu0 %v7061_v63  ;;  %1577 = vmatpush.msra.mxu1 %v7062_v0 }
 0x24f   :  { %1597 = vmatpush.msra.mxu2 %v5131_v26  ;;  %1617 = vmatpush.msra.mxu3 %v7063_v1 }
 0x250   :  { %1558 = vmatpush.msra.mxu0 %v5139_v28  ;;  %1578 = vmatpush.msra.mxu1 %v5141_v29 }
 0x251   :  { %1598 = vmatpush.msra.mxu2 %v5143_v30  ;;  %1618 = vmatpush.msra.mxu3 %v5147_v31 }
 0x252   :  { %1559 = vmatpush.msra.mxu0 %v5151_v44  ;;  %1579 = vmatpush.msra.mxu1 %v5153_v45 }
 0x253   :  { %1599 = vmatpush.msra.mxu2 %v5155_v46  ;;  %1619 = vmatpush.msra.mxu3 %v5159_v48  ;;  %v7067_v46 = vld [vmem:[#allocation32_spill] sm:$0xff] }
 0x254   :  { %1560 = vmatpush.msra.mxu0 %v5163_v49  ;;  %1580 = vmatpush.msra.mxu1 %v5165_v51 }
 0x255   :  { %1600 = vmatpush.msra.mxu2 %v5167_v53  ;;  %1620 = vmatpush.msra.mxu3 %v5173_v39 }
 0x256   :  { %1561 = vmatpush.msra.mxu0 %v5177_v42  ;;  %1581 = vmatpush.msra.mxu1 %v5179_v58 }
 0x257   :  { %1601 = vmatpush.msra.mxu2 %v5181_v18  ;;  %1621 = vmatpush.msra.mxu3 %v5185_v2 }
 0x258   :  { %1562 = vmatpush.msra.mxu0 %v5189_v47  ;;  %1582 = vmatpush.msra.mxu1 %v5191_v19 }
 0x259   :  { %1602 = vmatpush.msra.mxu2 %v5193_v50  ;;  %1622 = vmatpush.msra.mxu3 %v5197_v60 }
 0x25a   :  { %1563 = vmatpush.msra.mxu0 %v5199_v32  ;;  %1583 = vmatpush.msra.mxu1 %v5201_v12 }
 0x25b   :  { %1603 = vmatpush.msra.mxu2 %v5205_v54  ;;  %1623 = vmatpush.msra.mxu3 %v7044_v61  ;;  %v7064_v54 = vld [vmem:[#allocation23_spill] sm:$0xff] }
 0x25c   :  { %1564 = vmatpush.msra.mxu0 %v7045_v35  ;;  %1584 = vmatpush.msra.mxu1 %v7046_v56 }
 0x25d   :  { %1604 = vmatpush.msra.mxu2 %v7047_v4  ;;  %1624 = vmatpush.msra.mxu3 %v7048_v36 }
 0x25e   :  { %1565 = vmatpush.msra.mxu0 %v7049_v3  ;;  %1585 = vmatpush.msra.mxu1 %v7050_v15 }
 0x25f   :  { %1605 = vmatpush.msra.mxu2 %v5228_v33  ;;  %1625 = vmatpush.msra.mxu3 %v5230_v9 }
 0x260   :  { %1566 = vmatpush.msra.mxu0 %v5234_v8  ;;  %1586 = vmatpush.msra.mxu1 %v5236_v11 }
 0x261   :  { %1606 = vmatpush.msra.mxu2 %v5240_v38  ;;  %1626 = vmatpush.msra.mxu3 %v7051_v43  ;;  %v7065_v38 = vld [vmem:[#allocation24_spill] sm:$0xff] }
 0x262   :  { %1567 = vmatpush.msra.mxu0 %v5252_v34  ;;  %1587 = vmatpush.msra.mxu1 %v5254_v52 }
 0x263   :  { %1607 = vmatpush.msra.mxu2 %v7052_v5  ;;  %1627 = vmatpush.msra.mxu3 %v5261_v40 }
 0x2b2   :  { %v1000_v12 = vpop.permute.xlu1 %999 }
 0x2b3   :  { %1002 = vst.msk [vmem:[#allocation3 + $0x6] sm:$0x30] %vm996_vm12, %v1000_v12 }
 0x2bf   :  { %v1086_v18 = vpop.f32.mrf.mxu0  ;;  %v1106_v33 = vpop.f32.mrf.mxu1 }
 0x2c0   :  { %v1153_v42 = vrot.slane %v1086_v18, 2  ;;  %v1154_v50 = vrot.slane %v1106_v33, 2 }
 0x2c2   :  { %v1161_v58 = vadd.f32 %v1153_v42, %v7064_v54  ;;  %v1162_v9 = vadd.f32 %v1154_v50, %v7065_v38  ;;  %v7068_v42 = vld [vmem:[#allocation19_spill] sm:$0xff]  ;;  %v7069_v54 = vld [vmem:[#allocation20_spill] sm:$0xff] }
 0x2c4   :  { %v3992_v10 = vmul.f32 -1.442695, %v1161_v58  ;;  %v3993_v7 = vmul.f32 -1.442695, %v1162_v9 }
 0x2c6   :  { %4113 = vpow2.f32 %v3992_v10  ;;  %v1146_v34 = vpop.f32.mrf.mxu3  ;;  %v1126_v29 = vpop.f32.mrf.mxu2 }
 0x2c7   :  { %4115 = vpow2.f32 %v3993_v7  ;;  %v1156_v52 = vrot.slane %v1146_v34, 2  ;;  %v1155_v30 = vrot.slane %v1126_v29, 2  ;;  %v7070_v7 = vld [vmem:[#allocation27_spill] sm:$0xff] }
 0x2c9   :  { %v1164_v14 = vadd.f32 %v1156_v52, %v7066_v13  ;;  %v1163_v48 = vadd.f32 %v1155_v30, %v7067_v46  ;;  %v7071_v30 = vld [vmem:[#allocation30_spill] sm:$0xff] }
 0x2cb   :  { %v3994_v17 = vmul.f32 -1.442695, %v1164_v14 }
 0x2cc   :  { %v4114_v20 = vpop.eup %4113 }
 0x2cd   :  { %v4116_v22 = vpop.eup %4115  ;;  %v1168_v26 = vadd.f32 1.0, %v4114_v20  ;;  %4117 = vpow2.f32 %v3994_v17 }
 0x2ce   :  { %v1187_v28 = vadd.f32 1.0, %v4116_v22 }
 0x2cf   :  { %4119 = vrcp.f32 %v1168_v26  ;;  %v1180_v47 = vand.u32 2147483648, %v1168_v26  ;;  %v1178_v32 = vand.u32 2147483647, %v1168_v26  ;;  %vm1174_vm0 = vweird.f32 %v1168_v26 }
 0x2d0   :  { %4121 = vrcp.f32 %v1187_v28  ;;  %v1199_v19 = vand.u32 2147483648, %v1187_v28  ;;  %v1197_v11 = vand.u32 2147483647, %v1187_v28  ;;  %vm1193_vm2 = vweird.f32 %v1187_v28 }
 0x2d1   :  { %v1181_v35 = vor.u32 1.1754944e-38, %v1180_v47  ;;  %vm1179_vm5 = vcmp.eq.f32.partialorder %v1178_v32, 8.507059e+37 }
 0x2d2   :  { %v1200_v4 = vor.u32 1.1754944e-38, %v1199_v19  ;;  %vm1198_vm6 = vcmp.eq.f32.partialorder %v1197_v11, 8.507059e+37 }
 0x2d3   :  { %v4118_v31 = vpop.eup %4117 }
 0x2d4   :  { %v1207_v44 = vadd.f32 1.0, %v4118_v31 }
 0x2d5   :  { %v4120_v45 = vpop.eup %4119 }
 0x2d6   :  { %v4122_v49 = vpop.eup %4121  ;;  %v1170_v51 = vmul.f32 %v4120_v45, %v1168_v26  ;;  %4123 = vrcp.f32 %v1207_v44  ;;  %vm1175_vm13 = vweird.f32 %v4120_v45  ;;  %v1219_v25 = vand.u32 2147483648, %v1207_v44 }
 0x2d7   :  { %v1189_v53 = vmul.f32 %v4122_v49, %v1187_v28  ;;  %4125 = vtanh.f32 %v1163_v48  ;;  %vm1194_vm15 = vweird.f32 %v4122_v49  ;;  %vm1176_vm3 = vmor %vm1174_vm0, %vm1175_vm13  ;;  %vm1213_vm8 = vweird.f32 %v1207_v44 }
 0x2d8   :  { %v1171_v39 = vsub.f32 1.0, %v1170_v51  ;;  %vm1195_vm4 = vmor %vm1193_vm2, %vm1194_vm15  ;;  %v1217_v55 = vand.u32 2147483647, %v1207_v44  ;;  %v1220_v59 = vor.u32 1.1754944e-38, %v1219_v25 }
 0x2d9   :  { %v1190_v2 = vsub.f32 1.0, %v1189_v53 }
 0x2da   :  { %v1172_v60 = vmul.f32 %v4120_v45, %v1171_v39  ;;  %vm1218_vm10 = vcmp.eq.f32.partialorder %v1217_v55, 8.507059e+37 }
 0x2db   :  { %v1191_v8 = vmul.f32 %v4122_v49, %v1190_v2 }
 0x2dc   :  { %v4124_v40 = vpop.eup %4123  ;;  %v1173_v61 = vadd.f32 %v4120_v45, %v1172_v60 }
 0x2dd   :  { %v1192_v56 = vadd.f32 %v4122_v49, %v1191_v8  ;;  %v1209_v24 = vmul.f32 %v4124_v40, %v1207_v44  ;;  %v4126_v37 = vpop.eup %4125  ;;  %vm1214_vm7 = vweird.f32 %v4124_v40 }
 0x2de   :  { %v1177_v36 = vsel %vm1176_vm3, %v4120_v45, %v1173_v61  ;;  %vm1215_vm9 = vmor %vm1213_vm8, %vm1214_vm7 }
 0x2df   :  { %v1182_v3 = vsel %vm1179_vm5, %v1181_v35, %v1177_v36  ;;  %v1196_v15 = vsel %vm1195_vm4, %v4122_v49, %v1192_v56  ;;  %v1210_v57 = vsub.f32 1.0, %v1209_v24 }
 0x2e0   :  { %v1201_v43 = vsel %vm1198_vm6, %v1200_v4, %v1196_v15  ;;  %v1227_v5 = vmul.f32 %v4126_v37, %v1182_v3 }
 0x2e1   :  { %v1226_v6 = vmul.f32 %v1224_v41, %v1201_v43  ;;  %v1211_v16 = vmul.f32 %v4124_v40, %v1210_v57 }
 0x2e3   :  { %v5433_v21 = vadd.f32 %v1227_v5, %v1226_v6  ;;  %v1212_v23 = vadd.f32 %v4124_v40, %v1211_v16 }
 0x2e5   :  { %4127 = vtanh.f32 %v5433_v21  ;;  %v1216_v27 = vsel %vm1215_vm9, %v4124_v40, %v1212_v23  ;;  %v1463_v56 = vrot.slane %v5433_v21, 6 }
 0x2e6   :  { %v1221_v63 = vsel %vm1218_vm10, %v1220_v59, %v1216_v27 }
 0x2eb   :  { %v4128_v62 = vpop.eup %4127 }
 0x2ec   :  { %v1230_v0 = vmul.f32 %v4128_v62, %v1221_v63  ;;  %v5450_v62 = vld [vmem:[#allocation7 + $0x1e0] sm:$0xff]  ;;  %v5452_v63 = vld [vmem:[#allocation7 + $0x1e8] sm:$0xff] }
 0x2ee   :  { %1234 = vrot.lane.b32.xlu1 %v1230_v0, %s4522_s3  ;;  %v1318_v1 = vrot.slane %v1230_v0, 6  ;;  %1232 = vst.msk [vmem:[#allocation2] sm:$0xc0] %vm1231_vm11, %v1230_v0  ;;  %v5454_v0 = vld [vmem:[#allocation7 + $0x1f0] sm:$0xff] }
 0x2f0   :  { %1336 = vmatmul.f32.vlgmr.msrb.gmra.mxu0 %v1318_v1  ;;  %1356 = vmatmul.f32.vlgmr.msrb.gmra.mxu1 %v1318_v1 }
 0x2f1   :  { %1376 = vmatmul.f32.vlgmr.msrb.gmra.mxu2 %v1318_v1  ;;  %1396 = vmatmul.f32.vlgmr.msrb.gmra.mxu3 %v1318_v1  ;;  %v5458_v1 = vld [vmem:[#allocation7 + $0x1f8] sm:$0xff] }
 0x2f2   :  { %1786 = vmatpush.msrb.mxu0 %v5450_v62  ;;  %1806 = vmatpush.msrb.mxu1 %v5452_v63 }
 0x2f3   :  { %1826 = vmatpush.msrb.mxu2 %v5454_v0  ;;  %1846 = vmatpush.msrb.mxu3 %v5458_v1 }
 0x360   :  { %v1235_v12 = vpop.permute.xlu1 %1234 }
 0x361   :  { %1237 = vst.msk [vmem:[#allocation3 + $0x2] sm:$0xc0] %vm1231_vm11, %v1235_v12  ;;  %v5462_v12 = vld [vmem:[#allocation7 + $0x1c0] sm:$0xff] }
 0x362   :  { %1787 = vmatpush.msrb.mxu0 %v5462_v12 }
 0x36d   :  { %v1337_v18 = vpop.f32.mrf.mxu0  ;;  %v1357_v33 = vpop.f32.mrf.mxu1 }
 0x36e   :  { %v1400_v50 = vadd.f32 %v1337_v18, %v7068_v42  ;;  %v1401_v58 = vadd.f32 %v1357_v33, %v7069_v54  ;;  %v5464_v18 = vld [vmem:[#allocation7 + $0x1c8] sm:$0xff]  ;;  %v5466_v33 = vld [vmem:[#allocation7 + $0x1d0] sm:$0xff] }
 0x36f   :  { %1807 = vmatpush.msrb.mxu1 %v5464_v18  ;;  %1827 = vmatpush.msrb.mxu2 %v5466_v33 }
 0x370   :  { %v3995_v38 = vmul.f32 -1.442695, %v1400_v50  ;;  %v3996_v9 = vmul.f32 -1.442695, %v1401_v58  ;;  %v5470_v50 = vld [vmem:[#allocation7 + $0x1d8] sm:$0xff]  ;;  %v5474_v58 = vld [vmem:[#allocation7 + $0x1a0] sm:$0xff] }
 0x371   :  { %1847 = vmatpush.msrb.mxu3 %v5470_v50  ;;  %1788 = vmatpush.msrb.mxu0 %v5474_v58 }
 0x372   :  { %4129 = vpow2.f32 %v3995_v38  ;;  %v5476_v38 = vld [vmem:[#allocation7 + $0x1a8] sm:$0xff] }
 0x373   :  { %4131 = vpow2.f32 %v3996_v9  ;;  %v5478_v9 = vld [vmem:[#allocation7 + $0x1b0] sm:$0xff]  ;;  %1808 = vmatpush.msrb.mxu1 %v5476_v38 }
 0x374   :  { %v1397_v10 = vpop.f32.mrf.mxu3  ;;  %v1377_v22 = vpop.f32.mrf.mxu2  ;;  %1828 = vmatpush.msrb.mxu2 %v5478_v9 }
 0x375   :  { %v1403_v34 = vadd.f32 %v1397_v10, %v7070_v7  ;;  %v1402_v31 = vadd.f32 %v1377_v22, %v7071_v30  ;;  %v5482_v10 = vld [vmem:[#allocation7 + $0x1b8] sm:$0xff]  ;;  %v5502_v22 = vld [vmem:[#allocation7 + $0x170] sm:$0xff]  ;;  %v5617_v30 = vld [vmem:[#allocation7 + $0x20] sm:$0xff] }
 0x376   :  { %1848 = vmatpush.msrb.mxu3 %v5482_v10  ;;  %v5619_v7 = vld [vmem:[#allocation7 + $0x28] sm:$0xff] }
 0x377   :  { %v3997_v52 = vmul.f32 -1.442695, %v1403_v34  ;;  %v5486_v34 = vld [vmem:[#allocation7 + $0x180] sm:$0xff] }
 0x378   :  { %v4130_v13 = vpop.eup %4129  ;;  %1789 = vmatpush.msrb.mxu0 %v5486_v34 }
 0x379   :  { %v4132_v14 = vpop.eup %4131  ;;  %v1407_v17 = vadd.f32 1.0, %v4130_v13  ;;  %4133 = vpow2.f32 %v3997_v52  ;;  %v5488_v52 = vld [vmem:[#allocation7 + $0x188] sm:$0xff]  ;;  %v5490_v13 = vld [vmem:[#allocation7 + $0x190] sm:$0xff] }
 0x37a   :  { %v1426_v20 = vadd.f32 1.0, %v4132_v14  ;;  %1809 = vmatpush.msrb.mxu1 %v5488_v52  ;;  %v5494_v14 = vld [vmem:[#allocation7 + $0x198] sm:$0xff]  ;;  %1829 = vmatpush.msrb.mxu2 %v5490_v13 }
 0x37b   :  { %4135 = vrcp.f32 %v1407_v17  ;;  %v1419_v51 = vand.u32 2147483648, %v1407_v17  ;;  %v1417_v2 = vand.u32 2147483647, %v1407_v17  ;;  %vm1413_vm0 = vweird.f32 %v1407_v17  ;;  %1849 = vmatpush.msrb.mxu3 %v5494_v14 }
 0x37c   :  { %4137 = vrcp.f32 %v1426_v20  ;;  %v1438_v53 = vand.u32 2147483648, %v1426_v20  ;;  %v1436_v19 = vand.u32 2147483647, %v1426_v20  ;;  %vm1432_vm2 = vweird.f32 %v1426_v20  ;;  %1830 = vmatpush.msrb.mxu2 %v5502_v22 }
 0x37d   :  { %v1420_v8 = vor.u32 1.1754944e-38, %v1419_v51  ;;  %vm1418_vm5 = vcmp.eq.f32.partialorder %v1417_v2, 8.507059e+37  ;;  %v5538_v2 = vld [vmem:[#allocation7 + $0x110] sm:$0xff] }
 0x37e   :  { %v1439_v61 = vor.u32 1.1754944e-38, %v1438_v53  ;;  %vm1437_vm6 = vcmp.eq.f32.partialorder %v1436_v19, 8.507059e+37  ;;  %v5534_v53 = vld [vmem:[#allocation7 + $0x100] sm:$0xff] }
 0x37f   :  { %v4134_v26 = vpop.eup %4133 }
 0x380   :  { %v1446_v28 = vadd.f32 1.0, %v4134_v26  ;;  %v5506_v26 = vld [vmem:[#allocation7 + $0x178] sm:$0xff] }
 0x381   :  { %v4136_v29 = vpop.eup %4135  ;;  %1850 = vmatpush.msrb.mxu3 %v5506_v26 }
 0x382   :  { %v4138_v44 = vpop.eup %4137  ;;  %v1409_v45 = vmul.f32 %v4136_v29, %v1407_v17  ;;  %4139 = vrcp.f32 %v1446_v28  ;;  %vm1414_vm13 = vweird.f32 %v4136_v29  ;;  %v1458_v6 = vand.u32 2147483648, %v1446_v28  ;;  %v5498_v17 = vld [vmem:[#allocation7 + $0x160] sm:$0xff] }
 0x383   :  { %v1428_v46 = vmul.f32 %v4138_v44, %v1426_v20  ;;  %4141 = vtanh.f32 %v1402_v31  ;;  %vm1433_vm15 = vweird.f32 %v4138_v44  ;;  %vm1415_vm3 = vmor %vm1413_vm0, %vm1414_vm13  ;;  %vm1452_vm8 = vweird.f32 %v1446_v28  ;;  %v5500_v20 = vld [vmem:[#allocation7 + $0x168] sm:$0xff]  ;;  %1790 = vmatpush.msrb.mxu0 %v5498_v17  ;;  %v5514_v31 = vld [vmem:[#allocation7 + $0x150] sm:$0xff] }
 0x384   :  { %v1410_v48 = vsub.f32 1.0, %v1409_v45  ;;  %vm1434_vm4 = vmor %vm1432_vm2, %vm1433_vm15  ;;  %v1456_v16 = vand.u32 2147483647, %v1446_v28  ;;  %v1459_v23 = vor.u32 1.1754944e-38, %v1458_v6  ;;  %1810 = vmatpush.msrb.mxu1 %v5500_v20  ;;  %1831 = vmatpush.msrb.mxu2 %v5514_v31  ;;  %v5522_v45 = vld [vmem:[#allocation7 + $0x120] sm:$0xff]  ;;  %v5574_v6 = vld [vmem:[#allocation7 + $0xa8] sm:$0xff] }
 0x385   :  { %v1429_v49 = vsub.f32 1.0, %v1428_v46  ;;  %v5524_v46 = vld [vmem:[#allocation7 + $0x128] sm:$0xff] }
 0x386   :  { %v1411_v39 = vmul.f32 %v4136_v29, %v1410_v48  ;;  %vm1457_vm10 = vcmp.eq.f32.partialorder %v1456_v16, 8.507059e+37  ;;  %v5526_v48 = vld [vmem:[#allocation7 + $0x130] sm:$0xff] }
 0x387   :  { %v1430_v47 = vmul.f32 %v4138_v44, %v1429_v49  ;;  %v5530_v49 = vld [vmem:[#allocation7 + $0x138] sm:$0xff]  ;;  %1832 = vmatpush.msrb.mxu2 %v5526_v48  ;;  %v5576_v16 = vld [vmem:[#allocation7 + $0xb0] sm:$0xff] }
 0x388   :  { %v4140_v60 = vpop.eup %4139  ;;  %v1412_v32 = vadd.f32 %v4136_v29, %v1411_v39  ;;  %v5536_v39 = vld [vmem:[#allocation7 + $0x108] sm:$0xff] }
 0x389   :  { %v1431_v11 = vadd.f32 %v4138_v44, %v1430_v47  ;;  %v1448_v40 = vmul.f32 %v4140_v60, %v1446_v28  ;;  %v4142_v24 = vpop.eup %4141  ;;  %vm1453_vm7 = vweird.f32 %v4140_v60  ;;  %v5510_v28 = vld [vmem:[#allocation7 + $0x140] sm:$0xff]  ;;  %1833 = vmatpush.msrb.mxu2 %v5538_v2 }
 0x38a   :  { %v1416_v35 = vsel %vm1415_vm3, %v4136_v29, %v1412_v32  ;;  %vm1454_vm9 = vmor %vm1452_vm8, %vm1453_vm7  ;;  %v5512_v29 = vld [vmem:[#allocation7 + $0x148] sm:$0xff]  ;;  %1791 = vmatpush.msrb.mxu0 %v5510_v28 }
 0x38b   :  { %v1421_v41 = vsel %vm1418_vm5, %v1420_v8, %v1416_v35  ;;  %v1435_v4 = vsel %vm1434_vm4, %v4138_v44, %v1431_v11  ;;  %v1449_v36 = vsub.f32 1.0, %v1448_v40  ;;  %1811 = vmatpush.msrb.mxu1 %v5512_v29  ;;  %v5518_v44 = vld [vmem:[#allocation7 + $0x158] sm:$0xff]  ;;  %v5546_v8 = vld [vmem:[#allocation7 + $0xe0] sm:$0xff]  ;;  %v5548_v11 = vld [vmem:[#allocation7 + $0xe8] sm:$0xff] }
 0x38c   :  { %v1440_v37 = vsel %vm1437_vm6, %v1439_v61, %v1435_v4  ;;  %v1466_v3 = vmul.f32 %v4142_v24, %v1421_v41  ;;  %1851 = vmatpush.msrb.mxu3 %v5518_v44  ;;  %1792 = vmatpush.msrb.mxu0 %v5522_v45  ;;  %v5550_v40 = vld [vmem:[#allocation7 + $0xf0] sm:$0xff]  ;;  %v7072_v61 = vld [vmem:[#allocation21_spill] sm:$0xff] }
 0x38d   :  { %v1465_v15 = vmul.f32 %v1463_v56, %v1440_v37  ;;  %v1450_v57 = vmul.f32 %v4140_v60, %v1449_v36  ;;  %1812 = vmatpush.msrb.mxu1 %v5524_v46  ;;  %v5555_v56 = vld [vmem:[#allocation7 + $0xf8] sm:$0xff]  ;;  %v7073_v24 = vld [vmem:[#allocation25_spill] sm:$0xff]  ;;  %1834 = vmatpush.msrb.mxu2 %v5550_v40  ;;  %v5564_v37 = vld [vmem:[#allocation7 + $0xd0] sm:$0xff] }
 0x38e   :  { %1852 = vmatpush.msrb.mxu3 %v5530_v49  ;;  %1793 = vmatpush.msrb.mxu0 %v5534_v53  ;;  %v5560_v4 = vld [vmem:[#allocation7 + $0xc0] sm:$0xff]  ;;  %v5562_v36 = vld [vmem:[#allocation7 + $0xc8] sm:$0xff] }
 0x38f   :  { %v5444_v43 = vadd.f32 %v1466_v3, %v1465_v15  ;;  %v1451_v5 = vadd.f32 %v4140_v60, %v1450_v57  ;;  %1813 = vmatpush.msrb.mxu1 %v5536_v39  ;;  %v5568_v15 = vld [vmem:[#allocation7 + $0xd8] sm:$0xff]  ;;  %1835 = vmatpush.msrb.mxu2 %v5564_v37 }
 0x390   :  { %1794 = vmatpush.msrb.mxu0 %v5546_v8 }
 0x391   :  { %4143 = vtanh.f32 %v5444_v43  ;;  %v1455_v21 = vsel %vm1454_vm9, %v4140_v60, %v1451_v5  ;;  %v5542_v60 = vld [vmem:[#allocation7 + $0x118] sm:$0xff]  ;;  %1814 = vmatpush.msrb.mxu1 %v5548_v11  ;;  %v5572_v5 = vld [vmem:[#allocation7 + $0xa0] sm:$0xff]  ;;  %1836 = vmatpush.msrb.mxu2 %v5576_v16 }
 0x392   :  { %v1460_v55 = vsel %vm1457_vm10, %v1459_v23, %v1455_v21  ;;  %1853 = vmatpush.msrb.mxu3 %v5542_v60  ;;  %1795 = vmatpush.msrb.mxu0 %v5560_v4  ;;  %v5580_v21 = vld [vmem:[#allocation7 + $0xb8] sm:$0xff]  ;;  %v5582_v23 = vld [vmem:[#allocation7 + $0x80] sm:$0xff] }
 0x393   :  { %1815 = vmatpush.msrb.mxu1 %v5562_v36 }
 0x394   :  { %1854 = vmatpush.msrb.mxu3 %v5555_v56  ;;  %1796 = vmatpush.msrb.mxu0 %v5572_v5 }
 0x395   :  { %1816 = vmatpush.msrb.mxu1 %v5574_v6 }
 0x396   :  { %1855 = vmatpush.msrb.mxu3 %v5568_v15  ;;  %1797 = vmatpush.msrb.mxu0 %v5582_v23 }
 0x397   :  { %v4144_v25 = vpop.eup %4143 }
 0x398   :  { %v1469_v27 = vmul.f32 %v4144_v25, %v1460_v55  ;;  %v5584_v25 = vld [vmem:[#allocation7 + $0x88] sm:$0xff]  ;;  %1856 = vmatpush.msrb.mxu3 %v5580_v21 }
 0x399   :  { %1817 = vmatpush.msrb.mxu1 %v5584_v25 }
 0x39a   :  { %1472 = vrot.lane.b32.xlu2 %v1469_v27, %s4522_s3  ;;  %1470 = vst.msk [vmem:[#allocation2 + $0x8] sm:$0x3] %vm516_vm1, %v1469_v27  ;;  %1568 = vmatmul.f32.vlgmr.msra.gmra.mxu0 %v1469_v27 }
 0x39b   :  { %1588 = vmatmul.f32.vlgmr.msra.gmra.mxu1 %v1469_v27  ;;  %1608 = vmatmul.f32.vlgmr.msra.gmra.mxu2 %v1469_v27 }
 0x39c   :  { %1628 = vmatmul.f32.vlgmr.msra.gmra.mxu3 %v1469_v27  ;;  %v5588_v27 = vld [vmem:[#allocation7 + $0x90] sm:$0xff] }
 0x39d   :  { %1837 = vmatpush.msrb.mxu2 %v5588_v27 }
 0x3f4   :  { %v1473_v59 = vpop.permute.xlu2 %1472 }
 0x3f5   :  { %1475 = vst.msk [vmem:[#allocation3 + $0x6] sm:$0x3] %vm516_vm1, %v1473_v59  ;;  %v5590_v59 = vld [vmem:[#allocation7 + $0x98] sm:$0xff] }
 0x3f6   :  { %1857 = vmatpush.msrb.mxu3 %v5590_v59 }
 0x417   :  { %v1569_v51 = vpop.f32.mrf.mxu0 }
 0x418   :  { %v1636_v47 = vrot.slane %v1569_v51, 6  ;;  %v1589_v19 = vpop.f32.mrf.mxu1  ;;  %v5592_v51 = vld [vmem:[#allocation7 + $0x60] sm:$0xff] }
 0x419   :  { %v1637_v32 = vrot.slane %v1589_v19, 6  ;;  %7074 = vst [vmem:[#allocation44_spill] sm:$0xff] %v5592_v51  ;;  %v5596_v19 = vld [vmem:[#allocation7 + $0x68] sm:$0xff]  ;;  %1798 = vmatpush.msrb.mxu0 %v5592_v51 }
 0x41a   :  { %v1644_v35 = vadd.f32 %v1636_v47, %v7072_v61  ;;  %7075 = vst [vmem:[#allocation45_spill] sm:$0xff] %v5596_v19  ;;  %1818 = vmatpush.msrb.mxu1 %v5596_v19  ;;  %v5613_v61 = vld [vmem:[#allocation7 + $0x58] sm:$0xff] }
 0x41b   :  { %v1645_v41 = vadd.f32 %v1637_v32, %v7073_v24  ;;  %v5598_v32 = vld [vmem:[#allocation7 + $0x70] sm:$0xff] }
 0x41c   :  { %v3998_v3 = vmul.f32 -1.442695, %v1644_v35  ;;  %7076 = vst [vmem:[#allocation46_spill] sm:$0xff] %v5598_v32  ;;  %v5600_v35 = vld [vmem:[#allocation7 + $0x78] sm:$0xff]  ;;  %v5611_v24 = vld [vmem:[#allocation7 + $0x50] sm:$0xff]  ;;  %1838 = vmatpush.msrb.mxu2 %v5598_v32 }
 0x41d   :  { %v3999_v57 = vmul.f32 -1.442695, %v1645_v41  ;;  %7077 = vst [vmem:[#allocation47_spill] sm:$0xff] %v5600_v35  ;;  %v5604_v41 = vld [vmem:[#allocation7 + $0x40] sm:$0xff]  ;;  %1858 = vmatpush.msrb.mxu3 %v5600_v35 }
 0x41e   :  { %4145 = vpow2.f32 %v3998_v3  ;;  %7078 = vst [vmem:[#allocation48_spill] sm:$0xff] %v5604_v41  ;;  %v5606_v3 = vld [vmem:[#allocation7 + $0x48] sm:$0xff]  ;;  %1799 = vmatpush.msrb.mxu0 %v5604_v41  ;;  %1839 = vmatpush.msrb.mxu2 %v5611_v24  ;;  %v1609_v32 = vpop.f32.mrf.mxu2  ;;  %v5639_v41 = vld [vmem:[#allocation7 + $0x10] sm:$0xff] }
 0x41f   :  { %4147 = vpow2.f32 %v3999_v57  ;;  %v1629_v55 = vpop.f32.mrf.mxu3  ;;  %7079 = vst [vmem:[#allocation49_spill] sm:$0xff] %v5606_v3  ;;  %v7080_v57 = vld [vmem:[#allocation28_spill] sm:$0xff]  ;;  %1819 = vmatpush.msrb.mxu1 %v5606_v3  ;;  %1859 = vmatpush.msrb.mxu3 %v5613_v61  ;;  %v5637_v3 = vld [vmem:[#allocation7 + $0x8] sm:$0xff] }
 0x420   :  { %v1639_v47 = vrot.slane %v1629_v55, 6  ;;  %1800 = vmatpush.msrb.mxu0 %v5617_v30  ;;  %7083 = vst [vmem:[#allocation52_spill] sm:$0xff] %v5637_v3 }
 0x421   :  { %1820 = vmatpush.msrb.mxu1 %v5619_v7 }
 0x422   :  { %v1647_v55 = vadd.f32 %v1639_v47, %v7080_v57  ;;  %v5623_v47 = vld [vmem:[#allocation7 + $0x30] sm:$0xff]  ;;  %v5625_v57 = vld [vmem:[#allocation7 + $0x38] sm:$0xff] }
 0x423   :  { %7081 = vst [vmem:[#allocation50_spill] sm:$0xff] %v5625_v57  ;;  %1840 = vmatpush.msrb.mxu2 %v5623_v47  ;;  %1860 = vmatpush.msrb.mxu3 %v5625_v57 }
 0x424   :  { %v4146_v54 = vpop.eup %4145  ;;  %v4000_v42 = vmul.f32 -1.442695, %v1647_v55  ;;  %v5635_v55 = vld [vmem:[#allocation7] sm:$0xff]  ;;  %1821 = vmatpush.msrb.mxu1 %v5637_v3  ;;  %v7084_v3 = vld [vmem:[#allocation31_spill] sm:$0xff] }
 0x425   :  { %v4148_v19 = vpop.eup %4147  ;;  %v5627_v51 = vadd.f32 1.0, %v4146_v54  ;;  %7082 = vst [vmem:[#allocation51_spill] sm:$0xff] %v5635_v55  ;;  %v5644_v54 = vld [vmem:[#allocation7 + $0x18] sm:$0xff]  ;;  %1801 = vmatpush.msrb.mxu0 %v5635_v55  ;;  %1841 = vmatpush.msrb.mxu2 %v5639_v41 }
 0x426   :  { %v5631_v35 = vadd.f32 1.0, %v4148_v19  ;;  %4149 = vpow2.f32 %v4000_v42  ;;  %v1638_v42 = vrot.slane %v1609_v32, 6  ;;  %1861 = vmatpush.msrb.mxu3 %v5644_v54  ;;  %2040 = vmatpush.msra.mxu1 %v5452_v63 }
 0x427   :  { %4151 = vrcp.f32 %v5627_v51  ;;  %2020 = vmatpush.msra.mxu0 %v5450_v62  ;;  %2060 = vmatpush.msra.mxu2 %v5454_v0  ;;  %vm1657_vm15 = vweird.f32 %v5627_v51 }
 0x428   :  { %4153 = vrcp.f32 %v5631_v35  ;;  %2080 = vmatpush.msra.mxu3 %v5458_v1  ;;  %2041 = vmatpush.msra.mxu1 %v5464_v18  ;;  %v1646_v32 = vadd.f32 %v1638_v42, %v7084_v3  ;;  %v1663_v18 = vand.u32 2147483648, %v5627_v51  ;;  %vm1676_vm0 = vweird.f32 %v5631_v35 }
 0x429   :  { %2021 = vmatpush.msra.mxu0 %v5462_v12  ;;  %2061 = vmatpush.msra.mxu2 %v5466_v33  ;;  %v1682_v33 = vand.u32 2147483648, %v5631_v35 }
 0x42a   :  { %2081 = vmatpush.msra.mxu3 %v5470_v50  ;;  %2042 = vmatpush.msra.mxu1 %v5476_v38 }
 0x42b   :  { %2022 = vmatpush.msra.mxu0 %v5474_v58  ;;  %2062 = vmatpush.msra.mxu2 %v5478_v9  ;;  %v1661_v58 = vand.u32 2147483647, %v5627_v51  ;;  %v1680_v9 = vand.u32 2147483647, %v5631_v35 }
 0x42c   :  { %v4150_v19 = vpop.eup %4149  ;;  %2082 = vmatpush.msra.mxu3 %v5482_v10  ;;  %2043 = vmatpush.msra.mxu1 %v5488_v52  ;;  %v1664_v52 = vor.u32 1.1754944e-38, %v1663_v18  ;;  %v2220_v18 = vld [vmem:[#allocation9 + $0x60] sm:$0xff] }
 0x42d   :  { %v4152_v55 = vpop.eup %4151  ;;  %v5658_v57 = vadd.f32 1.0, %v4150_v19  ;;  %2023 = vmatpush.msra.mxu0 %v5486_v34  ;;  %2063 = vmatpush.msra.mxu2 %v5490_v13  ;;  %vm1662_vm4 = vcmp.eq.f32.partialorder %v1661_v58, 8.507059e+37  ;;  %vm1681_vm5 = vcmp.eq.f32.partialorder %v1680_v9, 8.507059e+37  ;;  %v2212_v58 = vld [vmem:[#allocation9 + $0x20] sm:$0xff] }
 0x42e   :  { %v4154_v62 = vpop.eup %4153  ;;  %v1653_v63 = vmul.f32 %v4152_v55, %v5627_v51  ;;  %2083 = vmatpush.msra.mxu3 %v5494_v14  ;;  %vm1658_vm1 = vweird.f32 %v4152_v55  ;;  %2044 = vmatpush.msra.mxu1 %v5500_v20  ;;  %v1683_v14 = vor.u32 1.1754944e-38, %v1682_v33  ;;  %v2216_v33 = vld [vmem:[#allocation9 + $0x40] sm:$0xff] }
 0x42f   :  { %v1672_v0 = vmul.f32 %v4154_v62, %v5631_v35  ;;  %4155 = vrcp.f32 %v5658_v57  ;;  %2024 = vmatpush.msra.mxu0 %v5498_v17  ;;  %vm1677_vm13 = vweird.f32 %v4154_v62  ;;  %2064 = vmatpush.msra.mxu2 %v5502_v22  ;;  %vm1659_vm2 = vmor %vm1657_vm15, %vm1658_vm1  ;;  %vm1696_vm7 = vweird.f32 %v5658_v57 }
 0x430   :  { %v1654_v1 = vsub.f32 1.0, %v1653_v63  ;;  %4157 = vtanh.f32 %v1646_v32  ;;  %2084 = vmatpush.msra.mxu3 %v5506_v26  ;;  %2045 = vmatpush.msra.mxu1 %v5512_v29  ;;  %vm1678_vm3 = vmor %vm1676_vm0, %vm1677_vm13  ;;  %v1707_v26 = vrot.slane %v5444_v43, 6 }
 0x431   :  { %v1673_v12 = vsub.f32 1.0, %v1672_v0  ;;  %2025 = vmatpush.msra.mxu0 %v5510_v28  ;;  %2065 = vmatpush.msra.mxu2 %v5514_v31 }
 0x432   :  { %v1655_v50 = vmul.f32 %v4152_v55, %v1654_v1  ;;  %2085 = vmatpush.msra.mxu3 %v5518_v44  ;;  %2046 = vmatpush.msra.mxu1 %v5524_v46 }
 0x433   :  { %v1674_v38 = vmul.f32 %v4154_v62, %v1673_v12  ;;  %2026 = vmatpush.msra.mxu0 %v5522_v45  ;;  %2066 = vmatpush.msra.mxu2 %v5526_v48 }
 0x434   :  { %v1656_v10 = vadd.f32 %v4152_v55, %v1655_v50  ;;  %2086 = vmatpush.msra.mxu3 %v5530_v49  ;;  %2047 = vmatpush.msra.mxu1 %v5536_v39  ;;  %v1702_v49 = vand.u32 2147483648, %v5658_v57 }
 0x435   :  { %v4156_v34 = vpop.eup %4155  ;;  %v1675_v13 = vadd.f32 %v4154_v62, %v1674_v38  ;;  %2027 = vmatpush.msra.mxu0 %v5534_v53  ;;  %2067 = vmatpush.msra.mxu2 %v5538_v2  ;;  %v1700_v53 = vand.u32 2147483647, %v5658_v57 }
 0x436   :  { %v1660_v17 = vsel %vm1659_vm2, %v4152_v55, %v1656_v10  ;;  %v1692_v20 = vmul.f32 %v4156_v34, %v5658_v57  ;;  %v4158_v22 = vpop.eup %4157  ;;  %2087 = vmatpush.msra.mxu3 %v5542_v60  ;;  %2048 = vmatpush.msra.mxu1 %v5548_v11  ;;  %vm1697_vm6 = vweird.f32 %v4156_v34  ;;  %v1703_v2 = vor.u32 1.1754944e-38, %v1702_v49  ;;  %v7085_v60 = vld [vmem:[#allocation44_spill] sm:$0xff]  ;;  %v7097_v10 = vld [vmem:[#allocation30_spill] sm:$0xff] }
 0x437   :  { %v1665_v28 = vsel %vm1662_vm4, %v1664_v52, %v1660_v17  ;;  %v1679_v29 = vsel %vm1678_vm3, %v4154_v62, %v1675_v13  ;;  %2028 = vmatpush.msra.mxu0 %v5546_v8  ;;  %2068 = vmatpush.msra.mxu2 %v5550_v40  ;;  %vm1698_vm8 = vmor %vm1696_vm7, %vm1697_vm6  ;;  %vm1701_vm9 = vcmp.eq.f32.partialorder %v1700_v53, 8.507059e+37  ;;  %v7086_v8 = vld [vmem:[#allocation45_spill] sm:$0xff] }
 0x438   :  { %v1684_v31 = vsel %vm1681_vm5, %v1683_v14, %v1679_v29  ;;  %v1710_v44 = vmul.f32 %v4158_v22, %v1665_v28  ;;  %v1693_v51 = vsub.f32 1.0, %v1692_v20  ;;  %2088 = vmatpush.msra.mxu3 %v5555_v56  ;;  %2049 = vmatpush.msra.mxu1 %v5562_v36  ;;  %v7087_v56 = vld [vmem:[#allocation46_spill] sm:$0xff]  ;;  %v2208_v52 = vld [vmem:[#allocation9] sm:$0xff] }
 0x439   :  { %v1709_v45 = vmul.f32 %v1707_v26, %v1684_v31  ;;  %2029 = vmatpush.msra.mxu0 %v5560_v4  ;;  %2069 = vmatpush.msra.mxu2 %v5564_v37  ;;  %v7088_v4 = vld [vmem:[#allocation47_spill] sm:$0xff]  ;;  %v7089_v37 = vld [vmem:[#allocation48_spill] sm:$0xff] }
 0x43a   :  { %v1694_v43 = vmul.f32 %v4156_v34, %v1693_v51  ;;  %2089 = vmatpush.msra.mxu3 %v5568_v15  ;;  %2050 = vmatpush.msra.mxu1 %v5574_v6  ;;  %v7090_v15 = vld [vmem:[#allocation49_spill] sm:$0xff]  ;;  %v7091_v6 = vld [vmem:[#allocation50_spill] sm:$0xff] }
 0x43b   :  { %v5701_v46 = vadd.f32 %v1710_v44, %v1709_v45  ;;  %2030 = vmatpush.msra.mxu0 %v5572_v5  ;;  %2070 = vmatpush.msra.mxu2 %v5576_v16 }
 0x43c   :  { %v1695_v48 = vadd.f32 %v4156_v34, %v1694_v43  ;;  %2090 = vmatpush.msra.mxu3 %v5580_v21  ;;  %2051 = vmatpush.msra.mxu1 %v5584_v25  ;;  %v7094_v25 = vld [vmem:[#allocation19_spill] sm:$0xff] }
 0x43d   :  { %4159 = vtanh.f32 %v5701_v46  ;;  %2031 = vmatpush.msra.mxu0 %v5582_v23  ;;  %2071 = vmatpush.msra.mxu2 %v5588_v27 }
 0x43e   :  { %v1699_v39 = vsel %vm1698_vm8, %v4156_v34, %v1695_v48  ;;  %2091 = vmatpush.msra.mxu3 %v5590_v59  ;;  %2052 = vmatpush.msra.mxu1 %v7086_v8  ;;  %v7095_v59 = vld [vmem:[#allocation20_spill] sm:$0xff]  ;;  %vm2224_vm8 = vcmask 261120  }
 0x43f   :  { %2032 = vmatpush.msra.mxu0 %v7085_v60  ;;  %v1704_v40 = vsel %vm1701_vm9, %v1703_v2, %v1699_v39  ;;  %2072 = vmatpush.msra.mxu2 %v7087_v56  ;;  %v1941_v39 = vrot.slane %v5701_v46, 6 }
 0x440   :  { %2092 = vmatpush.msra.mxu3 %v7088_v4  ;;  %2053 = vmatpush.msra.mxu1 %v7090_v15 }
 0x441   :  { %2033 = vmatpush.msra.mxu0 %v7089_v37  ;;  %2073 = vmatpush.msra.mxu2 %v5611_v24  ;;  %v7092_v24 = vld [vmem:[#allocation51_spill] sm:$0xff] }
 0x442   :  { %2093 = vmatpush.msra.mxu3 %v5613_v61  ;;  %2054 = vmatpush.msra.mxu1 %v5619_v7  ;;  %v7093_v61 = vld [vmem:[#allocation52_spill] sm:$0xff] }
 0x443   :  { %v4160_v11 = vpop.eup %4159  ;;  %2034 = vmatpush.msra.mxu0 %v5617_v30  ;;  %2074 = vmatpush.msra.mxu2 %v5623_v47 }
 0x444   :  { %v1713_v36 = vmul.f32 %v4160_v11, %v1704_v40  ;;  %2094 = vmatpush.msra.mxu3 %v7091_v6  ;;  %2055 = vmatpush.msra.mxu1 %v7093_v61 }
 0x445   :  { %2035 = vmatpush.msra.mxu0 %v7092_v24  ;;  %2075 = vmatpush.msra.mxu2 %v5639_v41  ;;  %v7096_v41 = vld [vmem:[#allocation27_spill] sm:$0xff] }
 0x446   :  { %1716 = vrot.lane.b32.xlu2 %v1713_v36, %s4522_s3  ;;  %1714 = vst.msk [vmem:[#allocation2 + $0x8] sm:$0xc] %vm761_vm14, %v1713_v36  ;;  %v1784_v5 = vrot.slane %v1713_v36, 2  ;;  %2095 = vmatpush.msra.mxu3 %v5644_v54 }
 0x448   :  { %1802 = vmatmul.f32.vlgmr.msrb.gmra.mxu0 %v1784_v5  ;;  %1822 = vmatmul.f32.vlgmr.msrb.gmra.mxu1 %v1784_v5 }
 0x449   :  { %1842 = vmatmul.f32.vlgmr.msrb.gmra.mxu2 %v1784_v5  ;;  %1862 = vmatmul.f32.vlgmr.msrb.gmra.mxu3 %v1784_v5 }
 0x44a   :  { %4050 = vmatpush.msrb.mxu3 %v2220_v18  ;;  %2243 = vmatpush.msrb.mxu0 %v2220_v18 }
 0x44c   :  { %4051 = vmatpush.msrb.mxu3 %v2216_v33  ;;  %2244 = vmatpush.msrb.mxu0 %v2216_v33 }
 0x44e   :  { %4052 = vmatpush.msrb.mxu3 %v2212_v58  ;;  %2245 = vmatpush.msrb.mxu0 %v2212_v58 }
 0x450   :  { %4053 = vmatpush.msrb.mxu3 %v2208_v52  ;;  %2246 = vmatpush.msrb.mxu0 %v2208_v52  ;;  %v2217_v52 = vld [vmem:[#allocation9 + $0x48] sm:$0xff] }
 0x4a0   :  { %v1717_v16 = vpop.permute.xlu2 %1716 }
 0x4a1   :  { %1719 = vst.msk [vmem:[#allocation3 + $0x2] sm:$0xc] %vm761_vm14, %v1717_v16 }
 0x4c5   :  { %v1803_v7 = vpop.f32.mrf.mxu0  ;;  %v1823_v30 = vpop.f32.mrf.mxu1 }
 0x4c6   :  { %v1870_v21 = vrot.slane %v1803_v7, 4  ;;  %v1871_v23 = vrot.slane %v1823_v30, 4 }
 0x4c8   :  { %v1878_v27 = vadd.f32 %v1870_v21, %v7094_v25  ;;  %v1879_v35 = vadd.f32 %v1871_v23, %v7095_v59  ;;  %v5750_v25 = vld [vmem:[#allocation3 + $0x8] sm:$0xff] }
 0x4ca   :  { %v4001_v57 = vmul.f32 -1.442695, %v1878_v27  ;;  %v4002_v47 = vmul.f32 -1.442695, %v1879_v35 }
 0x4cc   :  { %4161 = vpow2.f32 %v4001_v57  ;;  %v1863_v55 = vpop.f32.mrf.mxu3  ;;  %v1843_v1 = vpop.f32.mrf.mxu2 }
 0x4cd   :  { %4163 = vpow2.f32 %v4002_v47  ;;  %v1873_v42 = vrot.slane %v1863_v55, 4  ;;  %v1872_v12 = vrot.slane %v1843_v1, 4  ;;  %v7098_v55 = vld [vmem:[#allocation21_spill] sm:$0xff] }
 0x4cf   :  { %v1881_v19 = vadd.f32 %v1873_v42, %v7096_v41  ;;  %v1880_v34 = vadd.f32 %v1872_v12, %v7097_v10  ;;  %v7099_v41 = vld [vmem:[#allocation25_spill] sm:$0xff]  ;;  %v2222_v10 = vld [vmem:[#allocation9 + $0x70] sm:$0xff] }
 0x4d0   :  { %2289 = vmatpush.msrb.mxu2 %v2222_v10  ;;  %v2197_v10 = vld [vmem:[%s6820_s4 + $0x38] sm:$0xff] }
 0x4d1   :  { %v4003_v54 = vmul.f32 -1.442695, %v1881_v19 }
 0x4d2   :  { %v4162_v32 = vpop.eup %4161 }
 0x4d3   :  { %v4164_v62 = vpop.eup %4163  ;;  %v1885_v63 = vadd.f32 1.0, %v4162_v32  ;;  %4165 = vpow2.f32 %v4003_v54 }
 0x4d4   :  { %v1904_v0 = vadd.f32 1.0, %v4164_v62 }
 0x4d5   :  { %4167 = vrcp.f32 %v1885_v63  ;;  %v1897_v26 = vand.u32 2147483648, %v1885_v63  ;;  %v1895_v31 = vand.u32 2147483647, %v1885_v63  ;;  %vm1891_vm1 = vweird.f32 %v1885_v63 }
 0x4d6   :  { %4169 = vrcp.f32 %v1904_v0  ;;  %v1916_v28 = vand.u32 2147483648, %v1904_v0  ;;  %v1914_v51 = vand.u32 2147483647, %v1904_v0  ;;  %vm1910_vm13 = vweird.f32 %v1904_v0 }
 0x4d7   :  { %v1898_v48 = vor.u32 1.1754944e-38, %v1897_v26  ;;  %vm1896_vm2 = vcmp.eq.f32.partialorder %v1895_v31, 8.507059e+37  ;;  %v2215_v26 = vld [vmem:[#allocation9 + $0x38] sm:$0xff] }
 0x4d8   :  { %v1917_v2 = vor.u32 1.1754944e-38, %v1916_v28  ;;  %vm1915_vm3 = vcmp.eq.f32.partialorder %v1914_v51, 8.507059e+37 }
 0x4d9   :  { %v4166_v50 = vpop.eup %4165 }
 0x4da   :  { %v1924_v38 = vadd.f32 1.0, %v4166_v50 }
 0x4db   :  { %v4168_v9 = vpop.eup %4167 }
 0x4dc   :  { %v4170_v13 = vpop.eup %4169  ;;  %v1887_v14 = vmul.f32 %v4168_v9, %v1885_v63  ;;  %4171 = vrcp.f32 %v1924_v38  ;;  %vm1892_vm14 = vweird.f32 %v4168_v9  ;;  %v1936_v24 = vand.u32 2147483648, %v1924_v38 }
 0x4dd   :  { %v1906_v17 = vmul.f32 %v4170_v13, %v1904_v0  ;;  %4173 = vtanh.f32 %v1880_v34  ;;  %vm1911_vm10 = vweird.f32 %v4170_v13  ;;  %vm1893_vm15 = vmor %vm1891_vm1, %vm1892_vm14  ;;  %vm1930_vm5 = vweird.f32 %v1924_v38  ;;  %v7100_v0 = vld [vmem:[#allocation28_spill] sm:$0xff] }
 0x4de   :  { %v1888_v20 = vsub.f32 1.0, %v1887_v14  ;;  %vm1912_vm0 = vmor %vm1910_vm13, %vm1911_vm10  ;;  %v1934_v46 = vand.u32 2147483647, %v1924_v38  ;;  %v1937_v16 = vor.u32 1.1754944e-38, %v1936_v24  ;;  %v2223_v34 = vld [vmem:[#allocation9 + $0x78] sm:$0xff] }
 0x4df   :  { %v1907_v22 = vsub.f32 1.0, %v1906_v17  ;;  %v2219_v14 = vld [vmem:[#allocation9 + $0x58] sm:$0xff]  ;;  %v2213_v17 = vld [vmem:[#allocation9 + $0x28] sm:$0xff] }
 0x4e0   :  { %v1889_v29 = vmul.f32 %v4168_v9, %v1888_v20  ;;  %vm1935_vm7 = vcmp.eq.f32.partialorder %v1934_v46, 8.507059e+37  ;;  %v2214_v20 = vld [vmem:[#allocation9 + $0x30] sm:$0xff] }
 0x4e1   :  { %v1908_v44 = vmul.f32 %v4170_v13, %v1907_v22 }
 0x4e2   :  { %v4172_v45 = vpop.eup %4171  ;;  %v1890_v43 = vadd.f32 %v4168_v9, %v1889_v29 }
 0x4e3   :  { %v1909_v49 = vadd.f32 %v4170_v13, %v1908_v44  ;;  %v1926_v53 = vmul.f32 %v4172_v45, %v1924_v38  ;;  %v4174_v8 = vpop.eup %4173  ;;  %vm1931_vm4 = vweird.f32 %v4172_v45 }
 0x4e4   :  { %v1894_v60 = vsel %vm1893_vm15, %v4168_v9, %v1890_v43  ;;  %vm1932_vm6 = vmor %vm1930_vm5, %vm1931_vm4  ;;  %v2221_v9 = vld [vmem:[#allocation9 + $0x68] sm:$0xff] }
 0x4e5   :  { %v1899_v11 = vsel %vm1896_vm2, %v1898_v48, %v1894_v60  ;;  %v1913_v40 = vsel %vm1912_vm0, %v4170_v13, %v1909_v49  ;;  %v1927_v56 = vsub.f32 1.0, %v1926_v53  ;;  %2266 = vmatpush.msrb.mxu1 %v2221_v9  ;;  %v2218_v13 = vld [vmem:[#allocation9 + $0x50] sm:$0xff] }
 0x4e6   :  { %v1918_v4 = vsel %vm1915_vm3, %v1917_v2, %v1913_v40  ;;  %v1944_v36 = vmul.f32 %v4174_v8, %v1899_v11  ;;  %2290 = vmatpush.msrb.mxu2 %v2218_v13  ;;  %v2196_v9 = vld [vmem:[%s6820_s4 + $0x30] sm:$0xff] }
 0x4e7   :  { %v1943_v37 = vmul.f32 %v1941_v39, %v1918_v4  ;;  %v1928_v15 = vmul.f32 %v4172_v45, %v1927_v56  ;;  %2267 = vmatpush.msrb.mxu1 %v2217_v52  ;;  %v2191_v52 = vld [vmem:[%s6820_s4 + $0x8] sm:$0xff]  ;;  %v2192_v13 = vld [vmem:[%s6820_s4 + $0x10] sm:$0xff] }
 0x4e8   :  { %2291 = vmatpush.msrb.mxu2 %v2214_v20 }
 0x4e9   :  { %v5745_v5 = vadd.f32 %v1944_v36, %v1943_v37  ;;  %v1929_v6 = vadd.f32 %v4172_v45, %v1928_v15  ;;  %2268 = vmatpush.msrb.mxu1 %v2213_v17 }
 0x4eb   :  { %4175 = vtanh.f32 %v5745_v5  ;;  %v1933_v61 = vsel %vm1932_vm6, %v4172_v45, %v1929_v6  ;;  %v2175_v37 = vrot.slane %v5745_v5, 6 }
 0x4ec   :  { %v1938_v30 = vsel %vm1935_vm7, %v1937_v16, %v1933_v61 }
 0x4f1   :  { %v4176_v7 = vpop.eup %4175 }
 0x4f2   :  { %v1947_v21 = vmul.f32 %v4176_v7, %v1938_v30 }
 0x4f4   :  { %1950 = vrot.lane.b32.xlu0 %v1947_v21, %s4522_s3  ;;  %1948 = vst.msk [vmem:[#allocation2 + $0x8] sm:$0x30] %vm996_vm12, %v1947_v21  ;;  %v2018_v23 = vrot.slane %v1947_v21, 4 }
 0x4f6   :  { %2036 = vmatmul.f32.vlgmr.msra.gmra.mxu0 %v2018_v23  ;;  %2056 = vmatmul.f32.vlgmr.msra.gmra.mxu1 %v2018_v23 }
 0x4f7   :  { %2076 = vmatmul.f32.vlgmr.msra.gmra.mxu2 %v2018_v23  ;;  %2096 = vmatmul.f32.vlgmr.msra.gmra.mxu3 %v2018_v23 }
 0x4f8   :  { %2312 = vmatpush.msra.mxu3 %v2223_v34  ;;  %v2190_v34 = vld [vmem:[%s6820_s4] sm:$0xff] }
 0x4fa   :  { %2313 = vmatpush.msra.mxu3 %v2219_v14  ;;  %v2193_v14 = vld [vmem:[%s6820_s4 + $0x18] sm:$0xff] }
 0x4fc   :  { %2314 = vmatpush.msra.mxu3 %v2215_v26  ;;  %v5813_v26 = vld [vmem:[#allocation10 + $0x1e8] sm:$0xff] }
 0x4ff   :  { %4008 = vmatmul.msk.f32.vlgmr.msrb.gmra.mxu3 %vm2224_vm8, %v5750_v25 }
 0x566   :  { %v1951_v27 = vpop.permute.xlu0 %1950 }
 0x567   :  { %1953 = vst.msk [vmem:[#allocation3 - $0x2] sm:$0x30] %vm996_vm12, %v1951_v27 }
 0x573   :  { %v2037_v59 = vpop.f32.mrf.mxu0  ;;  %v2057_v35 = vpop.f32.mrf.mxu1 }
 0x574   :  { %v2104_v57 = vrot.slane %v2037_v59, 2  ;;  %v2105_v47 = vrot.slane %v2057_v35, 2 }
 0x576   :  { %v2112_v42 = vadd.f32 %v2104_v57, %v7098_v55  ;;  %v2113_v19 = vadd.f32 %v2105_v47, %v7099_v41 }
 0x578   :  { %v4004_v54 = vmul.f32 -1.442695, %v2112_v42  ;;  %v4005_v32 = vmul.f32 -1.442695, %v2113_v19  ;;  %v2209_v19 = vld [vmem:[#allocation9 + $0x8] sm:$0xff] }
 0x579   :  { %2269 = vmatpush.msrb.mxu1 %v2209_v19  ;;  %v5944_v19 = vld [vmem:[#allocation10 + $0xa8] sm:$0xff] }
 0x57a   :  { %4177 = vpow2.f32 %v4004_v54  ;;  %v2097_v62 = vpop.f32.mrf.mxu3  ;;  %v2077_v38 = vpop.f32.mrf.mxu2  ;;  %v2210_v54 = vld [vmem:[#allocation9 + $0x10] sm:$0xff]  ;;  %7108 = vst [vmem:[#allocation40_spill] sm:$0xff] %v5944_v19 }
 0x57b   :  { %4179 = vpow2.f32 %v4005_v32  ;;  %v2107_v63 = vrot.slane %v2097_v62, 2  ;;  %v2106_v22 = vrot.slane %v2077_v38, 2  ;;  %v2211_v32 = vld [vmem:[#allocation9 + $0x18] sm:$0xff]  ;;  %2292 = vmatpush.msrb.mxu2 %v2210_v54  ;;  %v2202_v62 = vld [vmem:[%s6820_s4 + $0x60] sm:$0xff]  ;;  %v2195_v38 = vld [vmem:[%s6820_s4 + $0x28] sm:$0xff] }
 0x57c   :  { %2315 = vmatpush.msra.mxu3 %v2211_v32  ;;  %2341 = vmatpush.msra.mxu0 %v2202_v62  ;;  %v5948_v54 = vld [vmem:[#allocation10 + $0xb0] sm:$0xff]  ;;  %v5950_v32 = vld [vmem:[#allocation10 + $0xb8] sm:$0xff]  ;;  %v5954_v62 = vld [vmem:[#allocation10 + $0x80] sm:$0xff] }
 0x57d   :  { %v2115_v1 = vadd.f32 %v2107_v63, %v7100_v0  ;;  %v2114_v44 = vadd.f32 %v2106_v22, %v7084_v3  ;;  %v2203_v63 = vld [vmem:[%s6820_s4 + $0x68] sm:$0xff]  ;;  %v2204_v0 = vld [vmem:[%s6820_s4 + $0x70] sm:$0xff]  ;;  %v5811_v22 = vld [vmem:[#allocation10 + $0x1e0] sm:$0xff]  ;;  %7109 = vst [vmem:[#allocation41_spill] sm:$0xff] %v5948_v54 }
 0x57e   :  { %2364 = vmatpush.msra.mxu1 %v2203_v63  ;;  %2387 = vmatpush.msra.mxu2 %v2204_v0  ;;  %7110 = vst [vmem:[#allocation42_spill] sm:$0xff] %v5950_v32  ;;  %v5956_v63 = vld [vmem:[#allocation10 + $0x88] sm:$0xff]  ;;  %v5960_v0 = vld [vmem:[#allocation10 + $0x90] sm:$0xff] }
 0x57f   :  { %v4006_v12 = vmul.f32 -1.442695, %v2115_v1  ;;  %v2205_v1 = vld [vmem:[%s6820_s4 + $0x78] sm:$0xff]  ;;  %7111 = vst [vmem:[#allocation43_spill] sm:$0xff] %v5954_v62 }
 0x580   :  { %v4178_v18 = vpop.eup %4177  ;;  %2410 = vmatpush.msrb.mxu3 %v2205_v1  ;;  %7112 = vst [vmem:[#allocation23_spill] sm:$0xff] %v5956_v63  ;;  %v5962_v1 = vld [vmem:[#allocation10 + $0x98] sm:$0xff] }
 0x581   :  { %v4180_v33 = vpop.eup %4179  ;;  %v2119_v50 = vadd.f32 1.0, %v4178_v18  ;;  %4181 = vpow2.f32 %v4006_v12  ;;  %v2198_v12 = vld [vmem:[%s6820_s4 + $0x40] sm:$0xff]  ;;  %v2199_v18 = vld [vmem:[%s6820_s4 + $0x48] sm:$0xff]  ;;  %7113 = vst [vmem:[#allocation24_spill] sm:$0xff] %v5960_v0 }
 0x582   :  { %v2138_v58 = vadd.f32 1.0, %v4180_v33  ;;  %v2200_v33 = vld [vmem:[%s6820_s4 + $0x50] sm:$0xff]  ;;  %2342 = vmatpush.msra.mxu0 %v2198_v12  ;;  %2365 = vmatpush.msra.mxu1 %v2199_v18  ;;  %7114 = vst [vmem:[#allocation29_spill] sm:$0xff] %v5962_v1  ;;  %v5968_v12 = vld [vmem:[#allocation10 + $0x60] sm:$0xff]  ;;  %v5972_v18 = vld [vmem:[#allocation10 + $0x68] sm:$0xff] }
 0x583   :  { %4183 = vrcp.f32 %v2119_v50  ;;  %v2131_v53 = vand.u32 2147483648, %v2119_v50  ;;  %v2129_v60 = vand.u32 2147483647, %v2119_v50  ;;  %vm2125_vm14 = vweird.f32 %v2119_v50  ;;  %2388 = vmatpush.msra.mxu2 %v2200_v33  ;;  %7115 = vst [vmem:[#allocation32_spill] sm:$0xff] %v5968_v12  ;;  %v5974_v33 = vld [vmem:[#allocation10 + $0x70] sm:$0xff] }
 0x584   :  { %4185 = vrcp.f32 %v2138_v58  ;;  %v2150_v39 = vand.u32 2147483648, %v2138_v58  ;;  %v2148_v11 = vand.u32 2147483647, %v2138_v58  ;;  %vm2144_vm10 = vweird.f32 %v2138_v58  ;;  %2366 = vmatpush.msra.mxu1 %v2195_v38  ;;  %7116 = vst [vmem:[#allocation31_spill] sm:$0xff] %v5972_v18  ;;  %v5984_v38 = vld [vmem:[#allocation10 + $0x48] sm:$0xff] }
 0x585   :  { %v2132_v3 = vor.u32 1.1754944e-38, %v2131_v53  ;;  %vm2130_vm15 = vcmp.eq.f32.partialorder %v2129_v60, 8.507059e+37  ;;  %2389 = vmatpush.msra.mxu2 %v2196_v9  ;;  %v5843_v53 = vld [vmem:[#allocation10 + $0x1b8] sm:$0xff]  ;;  %v5853_v60 = vld [vmem:[#allocation10 + $0x190] sm:$0xff]  ;;  %7117 = vst [vmem:[#allocation44_spill] sm:$0xff] %v5974_v33 }
 0x586   :  { %v2151_v15 = vor.u32 1.1754944e-38, %v2150_v39  ;;  %vm2149_vm0 = vcmp.eq.f32.partialorder %v2148_v11, 8.507059e+37  ;;  %2367 = vmatpush.msra.mxu1 %v2191_v52  ;;  %v5847_v39 = vld [vmem:[#allocation10 + $0x180] sm:$0xff]  ;;  %7120 = vst [vmem:[#allocation47_spill] sm:$0xff] %v5984_v38  ;;  %v5986_v9 = vld [vmem:[#allocation10 + $0x50] sm:$0xff]  ;;  %v5996_v52 = vld [vmem:[#allocation10 + $0x28] sm:$0xff] }
 0x587   :  { %v4182_v28 = vpop.eup %4181  ;;  %2390 = vmatpush.msra.mxu2 %v2192_v13  ;;  %v5863_v11 = vld [vmem:[#allocation10 + $0x160] sm:$0xff]  ;;  %7121 = vst [vmem:[#allocation48_spill] sm:$0xff] %v5986_v9  ;;  %v5998_v13 = vld [vmem:[#allocation10 + $0x30] sm:$0xff] }
 0x588   :  { %v2158_v29 = vadd.f32 1.0, %v4182_v28  ;;  %v5817_v28 = vld [vmem:[#allocation10 + $0x1f0] sm:$0xff]  ;;  %7124 = vst [vmem:[#allocation51_spill] sm:$0xff] %v5996_v52 }
 0x589   :  { %v4184_v31 = vpop.eup %4183  ;;  %7125 = vst [vmem:[#allocation52_spill] sm:$0xff] %v5998_v13 }
 0x58a   :  { %v4186_v51 = vpop.eup %4185  ;;  %v2121_v45 = vmul.f32 %v4184_v31, %v2119_v50  ;;  %4187 = vrcp.f32 %v2158_v29  ;;  %vm2126_vm12 = vweird.f32 %v4184_v31  ;;  %v2170_v35 = vand.u32 2147483648, %v2158_v29  ;;  %v2201_v50 = vld [vmem:[%s6820_s4 + $0x58] sm:$0xff] }
 0x58b   :  { %v2140_v43 = vmul.f32 %v4186_v51, %v2138_v58  ;;  %4189 = vtanh.f32 %v2114_v44  ;;  %vm2145_vm9 = vweird.f32 %v4186_v51  ;;  %vm2127_vm1 = vmor %vm2125_vm14, %vm2126_vm12  ;;  %vm2164_vm3 = vweird.f32 %v2158_v29  ;;  %v2194_v58 = vld [vmem:[%s6820_s4 + $0x20] sm:$0xff]  ;;  %2411 = vmatpush.msrb.mxu3 %v2201_v50  ;;  %v5825_v44 = vld [vmem:[#allocation10 + $0x1c8] sm:$0xff] }
 0x58c   :  { %v2122_v48 = vsub.f32 1.0, %v2121_v45  ;;  %vm2146_vm13 = vmor %vm2144_vm10, %vm2145_vm9  ;;  %v2168_v5 = vand.u32 2147483647, %v2158_v29  ;;  %v2171_v47 = vor.u32 1.1754944e-38, %v2170_v35  ;;  %2343 = vmatpush.msra.mxu0 %v2194_v58  ;;  %v5831_v45 = vld [vmem:[#allocation10 + $0x1d8] sm:$0xff]  ;;  %v5924_v35 = vld [vmem:[#allocation10 + $0xf0] sm:$0xff] }
 0x58d   :  { %v2141_v49 = vsub.f32 1.0, %v2140_v43  ;;  %2412 = vmatpush.msrb.mxu3 %v2197_v10  ;;  %v5835_v43 = vld [vmem:[#allocation10 + $0x1a0] sm:$0xff]  ;;  %7101 = vst [vmem:[#allocation33_spill] sm:$0xff] %v5924_v35  ;;  %v5978_v50 = vld [vmem:[#allocation10 + $0x78] sm:$0xff] }
 0x58e   :  { %v2123_v2 = vmul.f32 %v4184_v31, %v2122_v48  ;;  %vm2169_vm5 = vcmp.eq.f32.partialorder %v2168_v5, 8.507059e+37  ;;  %2344 = vmatpush.msra.mxu0 %v2190_v34  ;;  %v5837_v48 = vld [vmem:[#allocation10 + $0x1a8] sm:$0xff]  ;;  %v5926_v5 = vld [vmem:[#allocation10 + $0xf8] sm:$0xff]  ;;  %7118 = vst [vmem:[#allocation45_spill] sm:$0xff] %v5978_v50  ;;  %v5980_v58 = vld [vmem:[#allocation10 + $0x40] sm:$0xff] }
 0x58f   :  { %v2142_v8 = vmul.f32 %v4186_v51, %v2141_v49  ;;  %2413 = vmatpush.msrb.mxu3 %v2193_v14  ;;  %v5841_v49 = vld [vmem:[#allocation10 + $0x1b0] sm:$0xff]  ;;  %7102 = vst [vmem:[#allocation34_spill] sm:$0xff] %v5926_v5  ;;  %v5990_v10 = vld [vmem:[#allocation10 + $0x58] sm:$0xff]  ;;  %v5992_v34 = vld [vmem:[#allocation10 + $0x20] sm:$0xff] }
 0x590   :  { %v4188_v40 = vpop.eup %4187  ;;  %v2124_v56 = vadd.f32 %v4184_v31, %v2123_v2  ;;  %v5849_v2 = vld [vmem:[#allocation10 + $0x188] sm:$0xff]  ;;  %7119 = vst [vmem:[#allocation46_spill] sm:$0xff] %v5980_v58  ;;  %v6002_v14 = vld [vmem:[#allocation10 + $0x38] sm:$0xff] }
 0x591   :  { %v2143_v4 = vadd.f32 %v4186_v51, %v2142_v8  ;;  %v2160_v36 = vmul.f32 %v4188_v40, %v2158_v29  ;;  %v4190_v24 = vpop.eup %4189  ;;  %vm2165_vm2 = vweird.f32 %v4188_v40  ;;  %v5819_v29 = vld [vmem:[#allocation10 + $0x1f8] sm:$0xff]  ;;  %7122 = vst [vmem:[#allocation49_spill] sm:$0xff] %v5990_v10 }
 0x592   :  { %v2128_v6 = vsel %vm2127_vm1, %v4184_v31, %v2124_v56  ;;  %vm2166_vm4 = vmor %vm2164_vm3, %vm2165_vm2  ;;  %v5823_v31 = vld [vmem:[#allocation10 + $0x1c0] sm:$0xff]  ;;  %v5855_v8 = vld [vmem:[#allocation10 + $0x198] sm:$0xff]  ;;  %7123 = vst [vmem:[#allocation50_spill] sm:$0xff] %v5992_v34 }
 0x593   :  { %v2133_v46 = vsel %vm2130_vm15, %v2132_v3, %v2128_v6  ;;  %v2147_v61 = vsel %vm2146_vm13, %v4186_v51, %v2143_v4  ;;  %v2161_v16 = vsub.f32 1.0, %v2160_v36  ;;  %v5829_v51 = vld [vmem:[#allocation10 + $0x1d0] sm:$0xff]  ;;  %v2188_v56 = vld [vmem:[#allocation2] sm:$0xff]  ;;  %v5873_v4 = vld [vmem:[#allocation10 + $0x178] sm:$0xff]  ;;  %7126 = vst [vmem:[#allocation19_spill] sm:$0xff] %v6002_v14 }
 0x594   :  { %v2178_v7 = vmul.f32 %v4190_v24, %v2133_v46  ;;  %v2152_v30 = vsel %vm2149_vm0, %v2151_v15, %v2147_v61  ;;  %v5871_v3 = vld [vmem:[#allocation10 + $0x170] sm:$0xff]  ;;  %v5878_v36 = vld [vmem:[#allocation10 + $0x140] sm:$0xff]  ;;  %v5886_v6 = vld [vmem:[#allocation10 + $0x158] sm:$0xff] }
 0x595   :  { %v2162_v21 = vmul.f32 %v4188_v40, %v2161_v16  ;;  %v2177_v23 = vmul.f32 %v2175_v37, %v2152_v30  ;;  %v5880_v37 = vld [vmem:[#allocation10 + $0x148] sm:$0xff]  ;;  %v5884_v15 = vld [vmem:[#allocation10 + $0x150] sm:$0xff]  ;;  %v5890_v24 = vld [vmem:[#allocation10 + $0x120] sm:$0xff] }
 0x596   :  { %v5896_v46 = vld [vmem:[#allocation10 + $0x130] sm:$0xff]  ;;  %v5898_v61 = vld [vmem:[#allocation10 + $0x138] sm:$0xff]  ;;  %v5902_v16 = vld [vmem:[#allocation10 + $0x100] sm:$0xff] }
 0x597   :  { %v2179_v27 = vadd.f32 %v2178_v7, %v2177_v23  ;;  %v2163_v59 = vadd.f32 %v4188_v40, %v2162_v21  ;;  %v5904_v7 = vld [vmem:[#allocation10 + $0x108] sm:$0xff]  ;;  %v5908_v30 = vld [vmem:[#allocation10 + $0x110] sm:$0xff]  ;;  %v5910_v21 = vld [vmem:[#allocation10 + $0x118] sm:$0xff] }
 0x599   :  { %4191 = vtanh.f32 %v2179_v27  ;;  %v2167_v57 = vsel %vm2166_vm4, %v4188_v40, %v2163_v59  ;;  %v5865_v40 = vld [vmem:[#allocation10 + $0x168] sm:$0xff]  ;;  %v5918_v27 = vld [vmem:[#allocation10 + $0xe0] sm:$0xff] }
 0x59a   :  { %v2172_v42 = vsel %vm2169_vm5, %v2171_v47, %v2167_v57  ;;  %v5920_v59 = vld [vmem:[#allocation10 + $0xe8] sm:$0xff]  ;;  %v5930_v57 = vld [vmem:[#allocation10 + $0xc0] sm:$0xff] }
 0x59b   :  { %7103 = vst [vmem:[#allocation35_spill] sm:$0xff] %v5930_v57  ;;  %v5932_v47 = vld [vmem:[#allocation10 + $0xc8] sm:$0xff] }
 0x59c   :  { %7104 = vst [vmem:[#allocation36_spill] sm:$0xff] %v5932_v47 }
 0x59f   :  { %v4192_v55 = vpop.eup %4191 }
 0x5a0   :  { %v2181_v41 = vmul.f32 %v4192_v55, %v2172_v42  ;;  %v5936_v55 = vld [vmem:[#allocation10 + $0xd0] sm:$0xff]  ;;  %v5938_v42 = vld [vmem:[#allocation10 + $0xd8] sm:$0xff] }
 0x5a1   :  { %7105 = vst [vmem:[#allocation37_spill] sm:$0xff] %v5936_v55 }
 0x5a2   :  { %2184 = vrot.lane.b32.xlu1 %v2181_v41, %s4522_s3  ;;  %2182 = vst.msk [vmem:[#allocation2 + $0x8] sm:$0xc0] %vm1231_vm11, %v2181_v41  ;;  %v5942_v41 = vld [vmem:[#allocation10 + $0xa0] sm:$0xff]  ;;  %s4524_s3 = smov [#allocation12]  }
 0x5a3   :  { %7106 = vst [vmem:[#allocation38_spill] sm:$0xff] %v5938_v42  ;;  %s3961_s26 = sshll.u32 %s4524_s3, 4  ;;  %s3962_s26 = int_to_ptr.vmem [resolvable:$true] %s3961_s26 }
 0x5a4   :  { %7107 = vst [vmem:[#allocation39_spill] sm:$0xff] %v5942_v41 }
 0x5a9   :  { %v2189_v23 = vld [vmem:[#allocation2 + $0x8] sm:$0xff] }
 0x614   :  { %v2185_v17 = vpop.permute.xlu1 %2184 }
 0x615   :  { %2187 = vst.msk [vmem:[#allocation3 - $0x6] sm:$0xc0] %vm1231_vm11, %v2185_v17  ;;  %v6004_v17 = vld [vmem:[#allocation10] sm:$0xff] }
 0x616   :  { %7127 = vst [vmem:[#allocation20_spill] sm:$0xff] %v6004_v17 }
 0x61c   :  { %v2206_v20 = vld [vmem:[#allocation3] sm:$0xff] }
 0x61d   :  { %4007 = vmatmul.msk.f32.vlgmr.msrb.gmra.mxu0 %vm2224_vm8, %v2206_v20  ;;  %4009 = vmatmul.msk.f32.vlgmr.msrb.gmra.mxu1 %vm2224_vm8, %v2206_v20 }
 0x61e   :  { %4011 = vmatmul.msk.f32.vlgmr.msrb.gmra.mxu2 %vm2224_vm8, %v2206_v20  ;;  %4013 = vmatmul.msk.f32.vlgmr.msra.gmra.mxu3 %vm2224_vm8, %v2206_v20  ;;  %v6008_v20 = vld [vmem:[#allocation10 + $0x8] sm:$0xff] }
 0x61f   :  { %2531 = vmatpush.msrb.mxu0 %v5811_v22  ;;  %2551 = vmatpush.msrb.mxu1 %v5813_v26  ;;  %7128 = vst [vmem:[#allocation27_spill] sm:$0xff] %v6008_v20 }
 0x620   :  { %2571 = vmatpush.msrb.mxu2 %v5817_v28  ;;  %2591 = vmatpush.msra.mxu3 %v5819_v29 }
 0x621   :  { %2532 = vmatpush.msrb.mxu0 %v5823_v31  ;;  %2552 = vmatpush.msrb.mxu1 %v5825_v44 }
 0x622   :  { %2572 = vmatpush.msrb.mxu2 %v5829_v51  ;;  %2592 = vmatpush.msra.mxu3 %v5831_v45 }
 0x623   :  { %2533 = vmatpush.msrb.mxu0 %v5835_v43  ;;  %2553 = vmatpush.msrb.mxu1 %v5837_v48 }
 0x624   :  { %2573 = vmatpush.msrb.mxu2 %v5841_v49  ;;  %2593 = vmatpush.msra.mxu3 %v5843_v53 }
 0x625   :  { %2534 = vmatpush.msrb.mxu0 %v5847_v39  ;;  %2554 = vmatpush.msrb.mxu1 %v5849_v2 }
 0x626   :  { %2574 = vmatpush.msrb.mxu2 %v5853_v60  ;;  %2594 = vmatpush.msra.mxu3 %v5855_v8 }
 0x627   :  { %4010 = vmatmul.msk.f32.gmra.mxu1 %vm2224_vm8, %v5750_v25  ;;  %4012 = vmatmul.msk.f32.gmra.mxu2 %vm2224_vm8, %v5750_v25 }
 0x628   :  { %4014 = vmatmul.msk.f32.gmra.mxu3 %vm2224_vm8, %v5750_v25  ;;  %4015 = vmatmul.msk.f32.vlgmr.msra.gmra.mxu0 %vm2224_vm8, %v2188_v56  ;;  %v5892_v25 = vld [vmem:[#allocation10 + $0x128] sm:$0xff] }
 0x629   :  { %2535 = vmatpush.msrb.mxu0 %v5863_v11  ;;  %2555 = vmatpush.msrb.mxu1 %v5865_v40 }
 0x62a   :  { %2575 = vmatpush.msrb.mxu2 %v5871_v3  ;;  %2595 = vmatpush.msra.mxu3 %v5873_v4 }
 0x62b   :  { %2536 = vmatpush.msrb.mxu0 %v5878_v36  ;;  %2556 = vmatpush.msrb.mxu1 %v5880_v37 }
 0x62c   :  { %2576 = vmatpush.msrb.mxu2 %v5884_v15  ;;  %2596 = vmatpush.msra.mxu3 %v5886_v6 }
 0x62d   :  { %2537 = vmatpush.msrb.mxu0 %v5890_v24  ;;  %2557 = vmatpush.msrb.mxu1 %v5892_v25 }
 0x62e   :  { %2577 = vmatpush.msrb.mxu2 %v5896_v46  ;;  %2597 = vmatpush.msra.mxu3 %v5898_v61 }
 0x62f   :  { %2538 = vmatpush.msrb.mxu0 %v5902_v16  ;;  %2558 = vmatpush.msrb.mxu1 %v5904_v7 }
 0x630   :  { %2578 = vmatpush.msrb.mxu2 %v5908_v30  ;;  %2598 = vmatpush.msra.mxu3 %v5910_v21 }
 0x631   :  { %4016 = vmatmul.msk.f32.gmra.mxu0 %vm2224_vm8, %v2189_v23  ;;  %4017 = vmatmul.msk.f32.vlgmr.msra.gmra.mxu1 %vm2224_vm8, %v2188_v56 }
 0x632   :  { %4019 = vmatmul.msk.f32.vlgmr.msra.gmra.mxu2 %vm2224_vm8, %v2188_v56  ;;  %4021 = vmatmul.msk.f32.vlgmr.msrb.gmra.mxu3 %vm2224_vm8, %v2188_v56  ;;  %v6012_v56 = vld [vmem:[#allocation10 + $0x10] sm:$0xff] }
 0x633   :  { %2539 = vmatpush.msrb.mxu0 %v5918_v27  ;;  %2559 = vmatpush.msrb.mxu1 %v5920_v59  ;;  %7129 = vst [vmem:[#allocation30_spill] sm:$0xff] %v6012_v56 }
 0x634   :  { %2579 = vmatpush.msrb.mxu2 %v5924_v35  ;;  %2599 = vmatpush.msra.mxu3 %v5926_v5 }
 0x635   :  { %2540 = vmatpush.msrb.mxu0 %v5930_v57  ;;  %2560 = vmatpush.msrb.mxu1 %v5932_v47 }
 0x636   :  { %2580 = vmatpush.msrb.mxu2 %v5936_v55  ;;  %2600 = vmatpush.msra.mxu3 %v5938_v42 }
 0x637   :  { %2541 = vmatpush.msrb.mxu0 %v5942_v41  ;;  %2561 = vmatpush.msrb.mxu1 %v5944_v19 }
 0x638   :  { %2581 = vmatpush.msrb.mxu2 %v5948_v54  ;;  %2601 = vmatpush.msra.mxu3 %v5950_v32 }
 0x639   :  { %2542 = vmatpush.msrb.mxu0 %v5954_v62  ;;  %2562 = vmatpush.msrb.mxu1 %v5956_v63 }
 0x63a   :  { %2582 = vmatpush.msrb.mxu2 %v5960_v0  ;;  %2602 = vmatpush.msra.mxu3 %v5962_v1 }
 0x63b   :  { %4018 = vmatmul.msk.f32.gmra.mxu1 %vm2224_vm8, %v2189_v23  ;;  %4020 = vmatmul.msk.f32.gmra.mxu2 %vm2224_vm8, %v2189_v23 }
 0x63c   :  { %4022 = vmatmul.msk.f32.gmra.mxu3 %vm2224_vm8, %v2189_v23  ;;  %2543 = vmatpush.msrb.mxu0 %v5968_v12  ;;  %v6014_v23 = vld [vmem:[#allocation10 + $0x18] sm:$0xff] }
 0x63d   :  { %2563 = vmatpush.msrb.mxu1 %v5972_v18  ;;  %2583 = vmatpush.msrb.mxu2 %v5974_v33  ;;  %7130 = vst [vmem:[#allocation21_spill] sm:$0xff] %v6014_v23 }
 0x63e   :  { %2603 = vmatpush.msra.mxu3 %v5978_v50  ;;  %2544 = vmatpush.msrb.mxu0 %v5980_v58 }
 0x63f   :  { %2564 = vmatpush.msrb.mxu1 %v5984_v38  ;;  %2584 = vmatpush.msrb.mxu2 %v5986_v9  ;;  %v7131_v9 = vmov 0.0  }
 0x640   :  { %2604 = vmatpush.msra.mxu3 %v5990_v10  ;;  %2545 = vmatpush.msrb.mxu0 %v5992_v34 }
 0x641   :  { %2565 = vmatpush.msrb.mxu1 %v5996_v52  ;;  %2585 = vmatpush.msrb.mxu2 %v5998_v13 }
 0x642   :  { %2605 = vmatpush.msra.mxu3 %v6002_v14  ;;  %2546 = vmatpush.msrb.mxu0 %v6004_v17 }
 0x643   :  { %2547 = vmatmul.f32.vlgmr.msrb.gmra.mxu0 %v7131_v9  ;;  %2566 = vmatpush.msrb.mxu1 %v6008_v20 }
 0x644   :  { %2586 = vmatpush.msrb.mxu2 %v6012_v56  ;;  %2606 = vmatpush.msra.mxu3 %v6014_v23 }
 0x645   :  { %2567 = vmatmul.f32.vlgmr.msrb.gmra.mxu1 %v7131_v9  ;;  %2587 = vmatmul.f32.vlgmr.msrb.gmra.mxu2 %v7131_v9 }
 0x646   :  { %2607 = vmatmul.f32.vlgmr.msra.gmra.mxu3 %v7131_v9  ;;  %2690 = vmatpush.msra.mxu0 %v5811_v22  ;;  %v7132_v9 = vld [vmem:[#allocation48_spill] sm:$0xff] }
 0x647   :  { %2710 = vmatpush.msra.mxu1 %v5813_v26  ;;  %2730 = vmatpush.msra.mxu2 %v5817_v28 }
 0x648   :  { %2750 = vmatpush.msrb.mxu3 %v5819_v29  ;;  %2691 = vmatpush.msra.mxu0 %v5823_v31 }
 0x649   :  { %2711 = vmatpush.msra.mxu1 %v5825_v44  ;;  %2731 = vmatpush.msra.mxu2 %v5829_v51 }
 0x64a   :  { %2751 = vmatpush.msrb.mxu3 %v5831_v45  ;;  %2692 = vmatpush.msra.mxu0 %v5835_v43 }
 0x64b   :  { %2712 = vmatpush.msra.mxu1 %v5837_v48  ;;  %2732 = vmatpush.msra.mxu2 %v5841_v49 }
 0x64c   :  { %2752 = vmatpush.msrb.mxu3 %v5843_v53  ;;  %2693 = vmatpush.msra.mxu0 %v5847_v39 }
 0x64d   :  { %2713 = vmatpush.msra.mxu1 %v5849_v2  ;;  %2733 = vmatpush.msra.mxu2 %v5853_v60 }
 0x64e   :  { %2753 = vmatpush.msrb.mxu3 %v5855_v8  ;;  %2694 = vmatpush.msra.mxu0 %v5863_v11 }
 0x64f   :  { %2714 = vmatpush.msra.mxu1 %v5865_v40  ;;  %2734 = vmatpush.msra.mxu2 %v5871_v3 }
 0x650   :  { %2754 = vmatpush.msrb.mxu3 %v5873_v4  ;;  %2695 = vmatpush.msra.mxu0 %v5878_v36 }
 0x651   :  { %2715 = vmatpush.msra.mxu1 %v5880_v37  ;;  %2735 = vmatpush.msra.mxu2 %v5884_v15 }
 0x652   :  { %2755 = vmatpush.msrb.mxu3 %v5886_v6  ;;  %2696 = vmatpush.msra.mxu0 %v5890_v24 }
 0x653   :  { %2716 = vmatpush.msra.mxu1 %v5892_v25  ;;  %2736 = vmatpush.msra.mxu2 %v5896_v46 }
 0x654   :  { %2756 = vmatpush.msrb.mxu3 %v5898_v61  ;;  %2697 = vmatpush.msra.mxu0 %v5902_v16 }
 0x655   :  { %2717 = vmatpush.msra.mxu1 %v5904_v7  ;;  %2737 = vmatpush.msra.mxu2 %v5908_v30 }
 0x656   :  { %2757 = vmatpush.msrb.mxu3 %v5910_v21  ;;  %2698 = vmatpush.msra.mxu0 %v5918_v27 }
 0x657   :  { %2718 = vmatpush.msra.mxu1 %v5920_v59  ;;  %2738 = vmatpush.msra.mxu2 %v5924_v35 }
 0x658   :  { %2758 = vmatpush.msrb.mxu3 %v5926_v5  ;;  %2699 = vmatpush.msra.mxu0 %v5930_v57 }
 0x659   :  { %2719 = vmatpush.msra.mxu1 %v5932_v47  ;;  %2739 = vmatpush.msra.mxu2 %v5936_v55 }
 0x65a   :  { %2759 = vmatpush.msrb.mxu3 %v5938_v42  ;;  %2700 = vmatpush.msra.mxu0 %v5942_v41 }
 0x65b   :  { %2720 = vmatpush.msra.mxu1 %v5944_v19  ;;  %2740 = vmatpush.msra.mxu2 %v5948_v54 }
 0x65c   :  { %2760 = vmatpush.msrb.mxu3 %v5950_v32  ;;  %2701 = vmatpush.msra.mxu0 %v5954_v62 }
 0x65d   :  { %2721 = vmatpush.msra.mxu1 %v5956_v63  ;;  %2741 = vmatpush.msra.mxu2 %v5960_v0 }
 0x65e   :  { %2761 = vmatpush.msrb.mxu3 %v5962_v1  ;;  %2702 = vmatpush.msra.mxu0 %v5968_v12 }
 0x65f   :  { %2722 = vmatpush.msra.mxu1 %v5972_v18  ;;  %2742 = vmatpush.msra.mxu2 %v5974_v33 }
 0x660   :  { %2762 = vmatpush.msrb.mxu3 %v5978_v50  ;;  %2703 = vmatpush.msra.mxu0 %v5980_v58 }
 0x661   :  { %2723 = vmatpush.msra.mxu1 %v5984_v38  ;;  %2743 = vmatpush.msra.mxu2 %v7132_v9 }
 0x662   :  { %2763 = vmatpush.msrb.mxu3 %v5990_v10  ;;  %2704 = vmatpush.msra.mxu0 %v5992_v34 }
 0x663   :  { %2724 = vmatpush.msra.mxu1 %v5996_v52  ;;  %2744 = vmatpush.msra.mxu2 %v5998_v13 }
 0x664   :  { %2764 = vmatpush.msrb.mxu3 %v6002_v14  ;;  %2705 = vmatpush.msra.mxu0 %v6004_v17 }
 0x665   :  { %2725 = vmatpush.msra.mxu1 %v6008_v20  ;;  %2745 = vmatpush.msra.mxu2 %v6012_v56 }
 0x666   :  { %2765 = vmatpush.msrb.mxu3 %v6014_v23  ;;  %2855 = vmatpush.msrb.mxu0 %v5811_v22 }
 0x667   :  { %2875 = vmatpush.msrb.mxu1 %v5813_v26  ;;  %2895 = vmatpush.msrb.mxu2 %v5817_v28 }
 0x668   :  { %2915 = vmatpush.msra.mxu3 %v5819_v29  ;;  %2856 = vmatpush.msrb.mxu0 %v5823_v31 }
 0x669   :  { %2876 = vmatpush.msrb.mxu1 %v5825_v44  ;;  %2896 = vmatpush.msrb.mxu2 %v5829_v51 }
 0x66a   :  { %2916 = vmatpush.msra.mxu3 %v5831_v45  ;;  %2857 = vmatpush.msrb.mxu0 %v5835_v43 }
 0x66b   :  { %2877 = vmatpush.msrb.mxu1 %v5837_v48  ;;  %2897 = vmatpush.msrb.mxu2 %v5841_v49 }
 0x66c   :  { %2917 = vmatpush.msra.mxu3 %v5843_v53  ;;  %2858 = vmatpush.msrb.mxu0 %v5847_v39 }
 0x66d   :  { %2878 = vmatpush.msrb.mxu1 %v5849_v2  ;;  %2898 = vmatpush.msrb.mxu2 %v5853_v60 }
 0x66e   :  { %2918 = vmatpush.msra.mxu3 %v5855_v8  ;;  %2859 = vmatpush.msrb.mxu0 %v5863_v11 }
 0x66f   :  { %2879 = vmatpush.msrb.mxu1 %v5865_v40  ;;  %2899 = vmatpush.msrb.mxu2 %v5871_v3 }
 0x670   :  { %2919 = vmatpush.msra.mxu3 %v5873_v4  ;;  %2860 = vmatpush.msrb.mxu0 %v5878_v36 }
 0x671   :  { %2880 = vmatpush.msrb.mxu1 %v5880_v37  ;;  %2900 = vmatpush.msrb.mxu2 %v5884_v15 }
 0x672   :  { %2920 = vmatpush.msra.mxu3 %v5886_v6  ;;  %2861 = vmatpush.msrb.mxu0 %v5890_v24 }
 0x673   :  { %2881 = vmatpush.msrb.mxu1 %v5892_v25  ;;  %2901 = vmatpush.msrb.mxu2 %v5896_v46 }
 0x674   :  { %2921 = vmatpush.msra.mxu3 %v5898_v61  ;;  %2862 = vmatpush.msrb.mxu0 %v5902_v16 }
 0x675   :  { %2882 = vmatpush.msrb.mxu1 %v5904_v7  ;;  %2902 = vmatpush.msrb.mxu2 %v5908_v30 }
 0x676   :  { %2922 = vmatpush.msra.mxu3 %v5910_v21  ;;  %2863 = vmatpush.msrb.mxu0 %v5918_v27 }
 0x677   :  { %2883 = vmatpush.msrb.mxu1 %v5920_v59  ;;  %2903 = vmatpush.msrb.mxu2 %v5924_v35 }
 0x678   :  { %2923 = vmatpush.msra.mxu3 %v5926_v5  ;;  %2864 = vmatpush.msrb.mxu0 %v5930_v57 }
 0x679   :  { %2884 = vmatpush.msrb.mxu1 %v5932_v47  ;;  %2904 = vmatpush.msrb.mxu2 %v5936_v55  ;;  %v7137_v47 = vld [vmem:[#allocation18_spill] sm:$0xff] }
 0x67a   :  { %2924 = vmatpush.msra.mxu3 %v5938_v42  ;;  %2865 = vmatpush.msrb.mxu0 %v5942_v41 }
 0x67b   :  { %2885 = vmatpush.msrb.mxu1 %v5944_v19  ;;  %2905 = vmatpush.msrb.mxu2 %v5948_v54 }
 0x67c   :  { %2925 = vmatpush.msra.mxu3 %v5950_v32  ;;  %2866 = vmatpush.msrb.mxu0 %v5954_v62 }
 0x67d   :  { %2886 = vmatpush.msrb.mxu1 %v5956_v63  ;;  %2906 = vmatpush.msrb.mxu2 %v5960_v0 }
 0x67e   :  { %2926 = vmatpush.msra.mxu3 %v5962_v1  ;;  %2867 = vmatpush.msrb.mxu0 %v5968_v12 }
 0x67f   :  { %2887 = vmatpush.msrb.mxu1 %v5972_v18  ;;  %2907 = vmatpush.msrb.mxu2 %v5974_v33 }
 0x680   :  { %2927 = vmatpush.msra.mxu3 %v5978_v50  ;;  %2868 = vmatpush.msrb.mxu0 %v5980_v58 }
 0x681   :  { %2888 = vmatpush.msrb.mxu1 %v5984_v38  ;;  %2908 = vmatpush.msrb.mxu2 %v7132_v9  ;;  %v2251_v38 = vpop.f32.mrf.mxu3 }
 0x682   :  { %2928 = vmatpush.msra.mxu3 %v5990_v10  ;;  %2869 = vmatpush.msrb.mxu0 %v5992_v34 }
 0x683   :  { %2889 = vmatpush.msrb.mxu1 %v5996_v52  ;;  %2909 = vmatpush.msrb.mxu2 %v5998_v13  ;;  %v2421_v13 = vld [vmem:[%s6823_s7] sm:$0xf]  ;;  %s4523_s7 = smov 64  }
 0x684   :  { %2929 = vmatpush.msra.mxu3 %v6002_v14  ;;  %2870 = vmatpush.msrb.mxu0 %v6004_v17  ;;  %v2423_v52 = vperm.slane %v2421_v13, 0  ;;  %v2424_v54 = vperm.slane %v2421_v13, 1  ;;  %v2426_v55 = vperm.slane %v2421_v13, 3 }
 0x685   :  { %2890 = vmatpush.msrb.mxu1 %v6008_v20  ;;  %2910 = vmatpush.msrb.mxu2 %v6012_v56 }
 0x686   :  { %2930 = vmatpush.msra.mxu3 %v6014_v23  ;;  %v7133_v23 = vld [vmem:[#allocation17_spill] sm:$0xff] }
 0x687   :  { %vm2439_vm11 = vcmp.lt.s32.totalorder %v7133_v23, 64 }
 0x69a   :  { %v2271_v9 = vpop.f32.mrf.mxu1  ;;  %v2248_v58 = vpop.f32.mrf.mxu0 }
 0x6a1   :  { %v2294_v10 = vpop.f32.mrf.mxu2  ;;  %v2317_v50 = vpop.f32.mrf.mxu3 }
 0x6a4   :  { %v2274_v34 = vpop.f32.mrf.mxu1 }
 0x6a5   :  { %v2346_v33 = vpop.f32.mrf.mxu0 }
 0x6a6   :  { %v2347_v14 = vadd.f32 %v2346_v33, %v2248_v58 }
 0x6a8   :  { %v2431_v20 = vadd.f32 %v2423_v52, %v2347_v14 }
 0x6aa   :  { %v2297_v17 = vpop.f32.mrf.mxu2  ;;  %v3186_v63 = vrot.slane %v2431_v20, 6  ;;  %v3351_v62 = vrot.slane %v2431_v20, 2 }
 0x6ab   :  { %v2320_v18 = vpop.f32.mrf.mxu3 }
 0x6ae   :  { %v2349_v12 = vpop.f32.mrf.mxu0  ;;  %v2369_v56 = vpop.f32.mrf.mxu1 }
 0x6af   :  { %v2350_v1 = vadd.f32 %v2349_v12, %v2251_v38  ;;  %v2370_v32 = vadd.f32 %v2369_v56, %v2271_v9 }
 0x6b1   :  { %v2435_v0 = vadd.f32 %v2423_v52, %v2350_v1  ;;  %v2432_v1 = vadd.f32 %v2424_v54, %v2370_v32  ;;  %v2425_v52 = vperm.slane %v2421_v13, 2 }
 0x6b3   :  { %v2678_v19 = vrot.slane %v2435_v0, 2  ;;  %v6159_v41 = vsel %vm2439_vm11, %v2435_v0, %v3186_v63  ;;  %v6163_v33 = vsel %vm2439_vm11, %v2435_v0, %v3351_v62  ;;  %v7138_v63 = vand.u32 127, %v7137_v47 }
 0x6b4   :  { %7134 = vst [vmem:[#allocation25_spill] sm:$0xff] %v6159_v41  ;;  %v3352_v57 = vrot.slane %v2432_v1, 2  ;;  %v2455_v5 = vrot.slane %v2435_v0, 6 }
 0x6b5   :  { %7135 = vst [vmem:[#allocation28_spill] sm:$0xff] %v6163_v33  ;;  %v2392_v58 = vpop.f32.mrf.mxu2  ;;  %v2415_v14 = vpop.f32.mrf.mxu3  ;;  %v6167_v12 = vsel %vm2439_vm11, %v2431_v20, %v2678_v19  ;;  %vm6171_vm6 = vcmp.lt.s32.totalorder %v7138_v63, 64  ;;  %v3187_v33 = vrot.slane %v2432_v1, 6  ;;  %v7149_v63 = vld [vmem:[#allocation22_spill] sm:$0xff] }
 0x6b6   :  { %7136 = vst [vmem:[#allocation17_spill] sm:$0xff] %v6167_v12  ;;  %v2393_v9 = vadd.f32 %v2392_v58, %v2294_v10  ;;  %v2416_v42 = vadd.f32 %v2415_v14, %v2317_v50  ;;  %v6189_v14 = vsel %vm2439_vm11, %v2431_v20, %v2455_v5 }
 0x6b8   :  { %v2372_v38 = vpop.f32.mrf.mxu1  ;;  %v2433_v10 = vadd.f32 %v2425_v52, %v2393_v9  ;;  %v2434_v47 = vadd.f32 %v2426_v55, %v2416_v42 }
 0x6b9   :  { %v2373_v56 = vadd.f32 %v2372_v38, %v2274_v34 }
 0x6ba   :  { %v3188_v41 = vrot.slane %v2433_v10, 6 }
 0x6bb   :  { %v2436_v62 = vadd.f32 %v2424_v54, %v2373_v56  ;;  %v7145_v56 = vld [vmem:[#allocation26_spill] sm:$0xff] }
 0x6bd   :  { %v2456_v35 = vrot.slane %v2436_v62, 6  ;;  %v2679_v19 = vrot.slane %v2436_v62, 2  ;;  %v6177_v32 = vsel %vm6171_vm6, %v2436_v62, %v3187_v33  ;;  %v6181_v50 = vsel %vm6171_vm6, %v2436_v62, %v3352_v57 }
 0x6be   :  { %7141 = vst [vmem:[#allocation18_spill] sm:$0xff] %v6177_v32  ;;  %v2395_v34 = vpop.f32.mrf.mxu2 }
 0x6bf   :  { %7142 = vst [vmem:[#allocation53_spill] sm:$0xff] %v6181_v50  ;;  %v2396_v13 = vadd.f32 %v2395_v34, %v2297_v17  ;;  %v2418_v58 = vpop.f32.mrf.mxu3  ;;  %v6185_v54 = vsel %vm6171_vm6, %v2432_v1, %v2679_v19  ;;  %v6193_v38 = vsel %vm6171_vm6, %v2432_v1, %v2456_v35  ;;  %v7146_v17 = vand.u32 127, %v7145_v56 }
 0x6c0   :  { %7143 = vst [vmem:[#allocation54_spill] sm:$0xff] %v6185_v54  ;;  %v2419_v0 = vadd.f32 %v2418_v58, %v2320_v18  ;;  %v2548_v33 = vpop.f32.mrf.mxu0  ;;  %v7150_v18 = vand.u32 127, %v7149_v63  ;;  %v3189_v35 = vrot.slane %v2434_v47, 6  ;;  %v3353_v1 = vrot.slane %v2433_v10, 2 }
 0x6c1   :  { %7144 = vst [vmem:[#allocation55_spill] sm:$0xff] %v6193_v38  ;;  %v2437_v57 = vadd.f32 %v2425_v52, %v2396_v13  ;;  %v2611_v42 = vadd.f32 %v2548_v33, %v6189_v14  ;;  %vm6198_vm7 = vcmp.lt.s32.totalorder %v7146_v17, 64  ;;  %v3354_v34 = vrot.slane %v2434_v47, 2 }
 0x6c2   :  { %vm6204_vm12 = vcmp.lt.s32.totalorder %v7150_v18, 64  ;;  %v2438_v5 = vadd.f32 %v2426_v55, %v2419_v0  ;;  %v2568_v20 = vpop.f32.mrf.mxu1 }
 0x6c3   :  { %v4023_v52 = vmul.f32 -1.442695, %v2611_v42  ;;  %v2612_v62 = vadd.f32 %v2568_v20, %v6193_v38  ;;  %v2680_v19 = vrot.slane %v2437_v57, 2  ;;  %v6211_v33 = vsel %vm6198_vm7, %v2437_v57, %v3188_v41 }
 0x6c4   :  { %v2458_v13 = vrot.slane %v2438_v5, 6  ;;  %v2681_v58 = vrot.slane %v2438_v5, 2  ;;  %7153 = vst [vmem:[#allocation26_spill] sm:$0xff] %v6211_v33  ;;  %v6215_v56 = vsel %vm6204_vm12, %v2438_v5, %v3189_v35  ;;  %v6227_v17 = vsel %vm6198_vm7, %v2437_v57, %v3353_v1 }
 0x6c5   :  { %7154 = vst [vmem:[#allocation22_spill] sm:$0xff] %v6215_v56  ;;  %4193 = vpow2.f32 %v4023_v52  ;;  %v4024_v55 = vmul.f32 -1.442695, %v2612_v62  ;;  %v6219_v0 = vsel %vm6198_vm7, %v2433_v10, %v2680_v19  ;;  %v6231_v63 = vsel %vm6204_vm12, %v2438_v5, %v3354_v34 }
 0x6c6   :  { %7155 = vst [vmem:[#allocation56_spill] sm:$0xff] %v6219_v0  ;;  %v6223_v42 = vsel %vm6204_vm12, %v2434_v47, %v2681_v58  ;;  %v6235_v18 = vsel %vm6204_vm12, %v2434_v47, %v2458_v13  ;;  %v2457_v62 = vrot.slane %v2437_v57, 6 }
 0x6c7   :  { %7156 = vst [vmem:[#allocation57_spill] sm:$0xff] %v6223_v42  ;;  %4195 = vpow2.f32 %v4024_v55 }
 0x6c8   :  { %7157 = vst [vmem:[#allocation58_spill] sm:$0xff] %v6227_v17  ;;  %v6240_v5 = vsel %vm6198_vm7, %v2433_v10, %v2457_v62  ;;  %v2588_v34 = vpop.f32.mrf.mxu2 }
 0x6c9   :  { %7158 = vst [vmem:[#allocation59_spill] sm:$0xff] %v6231_v63  ;;  %v2608_v20 = vpop.f32.mrf.mxu3  ;;  %v2613_v47 = vadd.f32 %v2588_v34, %v6240_v5 }
 0x6ca   :  { %7159 = vst [vmem:[#allocation60_spill] sm:$0xff] %v6235_v18  ;;  %v2614_v41 = vadd.f32 %v2608_v20, %v6235_v18 }
 0x6cb   :  { %v4194_v35 = vpop.eup %4193  ;;  %7160 = vst [vmem:[#allocation61_spill] sm:$0xff] %v6240_v5 }
 0x6cc   :  { %v2618_v52 = vadd.f32 1.0, %v4194_v35  ;;  %v4025_v19 = vmul.f32 -1.442695, %v2614_v41 }
 0x6cd   :  { %v4196_v58 = vpop.eup %4195 }
 0x6ce   :  { %4197 = vrcp.f32 %v2618_v52  ;;  %v2637_v1 = vadd.f32 1.0, %v4196_v58  ;;  %v2630_v41 = vand.u32 2147483648, %v2618_v52  ;;  %v2628_v63 = vand.u32 2147483647, %v2618_v52 }
 0x6cf   :  { %4199 = vpow2.f32 %v4025_v19  ;;  %vm2624_vm14 = vweird.f32 %v2618_v52 }
 0x6d0   :  { %4201 = vrcp.f32 %v2637_v1  ;;  %v2649_v9 = vand.u32 2147483648, %v2637_v1  ;;  %v2647_v34 = vand.u32 2147483647, %v2637_v1  ;;  %v2631_v50 = vor.u32 1.1754944e-38, %v2630_v41 }
 0x6d1   :  { %4203 = vtanh.f32 %v2613_v47  ;;  %vm2643_vm13 = vweird.f32 %v2637_v1  ;;  %vm2629_vm15 = vcmp.eq.f32.partialorder %v2628_v63, 8.507059e+37 }
 0x6d2   :  { %v2650_v56 = vor.u32 1.1754944e-38, %v2649_v9  ;;  %vm2648_vm2 = vcmp.eq.f32.partialorder %v2647_v34, 8.507059e+37 }
 0x6d4   :  { %v4198_v23 = vpop.eup %4197 }
 0x6d5   :  { %v4200_v13 = vpop.eup %4199  ;;  %v2620_v55 = vmul.f32 %v4198_v23, %v2618_v52  ;;  %vm2625_vm9 = vweird.f32 %v4198_v23 }
 0x6d6   :  { %v4202_v20 = vpop.eup %4201  ;;  %v2657_v17 = vadd.f32 1.0, %v4200_v13  ;;  %vm2626_vm1 = vmor %vm2624_vm14, %vm2625_vm9 }
 0x6d7   :  { %v2621_v35 = vsub.f32 1.0, %v2620_v55  ;;  %v2639_v57 = vmul.f32 %v4202_v20, %v2637_v1  ;;  %vm2644_vm10 = vweird.f32 %v4202_v20  ;;  %v4204_v33 = vpop.eup %4203 }
 0x6d8   :  { %4205 = vrcp.f32 %v2657_v17  ;;  %vm2645_vm0 = vmor %vm2643_vm13, %vm2644_vm10  ;;  %v2669_v1 = vand.u32 2147483648, %v2657_v17  ;;  %vm2663_vm4 = vweird.f32 %v2657_v17 }
 0x6d9   :  { %v2640_v58 = vsub.f32 1.0, %v2639_v57  ;;  %v2622_v19 = vmul.f32 %v4198_v23, %v2621_v35 }
 0x6da   :  { %v2670_v41 = vor.u32 1.1754944e-38, %v2669_v1 }
 0x6db   :  { %v2641_v10 = vmul.f32 %v4202_v20, %v2640_v58  ;;  %v2623_v62 = vadd.f32 %v4198_v23, %v2622_v19 }
 0x6dd   :  { %v2627_v13 = vsel %vm2626_vm1, %v4198_v23, %v2623_v62  ;;  %v2642_v55 = vadd.f32 %v4202_v20, %v2641_v10  ;;  %v2667_v23 = vand.u32 2147483647, %v2657_v17 }
 0x6de   :  { %v4206_v47 = vpop.eup %4205  ;;  %v2632_v32 = vsel %vm2629_vm15, %v2631_v50, %v2627_v13 }
 0x6df   :  { %v2646_v35 = vsel %vm2645_vm0, %v4202_v20, %v2642_v55  ;;  %v2674_v57 = vmul.f32 %v4204_v33, %v2632_v32  ;;  %v2659_v5 = vmul.f32 %v4206_v47, %v2657_v17  ;;  %vm2664_vm3 = vweird.f32 %v4206_v47 }
 0x6e0   :  { %v2651_v52 = vsel %vm2648_vm2, %v2650_v56, %v2646_v35  ;;  %vm2665_vm5 = vmor %vm2663_vm4, %vm2664_vm3  ;;  %vm2668_vm11 = vcmp.eq.f32.partialorder %v2667_v23, 8.507059e+37 }
 0x6e1   :  { %v2673_v58 = vmul.f32 0.0, %v2651_v52  ;;  %v2660_v19 = vsub.f32 1.0, %v2659_v5 }
 0x6e3   :  { %v6243_v18 = vadd.f32 %v2674_v57, %v2673_v58  ;;  %v2661_v38 = vmul.f32 %v4206_v47, %v2660_v19 }
 0x6e5   :  { %4207 = vtanh.f32 %v6243_v18  ;;  %v2662_v63 = vadd.f32 %v4206_v47, %v2661_v38 }
 0x6e7   :  { %v2666_v50 = vsel %vm2665_vm5, %v4206_v47, %v2662_v63 }
 0x6e8   :  { %v2671_v32 = vsel %vm2668_vm11, %v2670_v41, %v2666_v50 }
 0x6eb   :  { %v4208_v20 = vpop.eup %4207 }
 0x6ec   :  { %v2677_v33 = vmul.f32 %v4208_v20, %v2671_v32 }
 0x6ee   :  { %3872 = vrot.lane.b32.xlu2 %v2677_v33, %s4523_s7  ;;  %2706 = vmatmul.f32.vlgmr.msra.gmra.mxu0 %v2677_v33 }
 0x6ef   :  { %2726 = vmatmul.f32.vlgmr.msra.gmra.mxu1 %v2677_v33  ;;  %2746 = vmatmul.f32.vlgmr.msra.gmra.mxu2 %v2677_v33 }
 0x6f0   :  { %2766 = vmatmul.f32.vlgmr.msrb.gmra.mxu3 %v2677_v33  ;;  %3020 = vmatpush.msra.mxu0 %v5811_v22  ;;  %v7161_v22 = vld [vmem:[#allocation33_spill] sm:$0xff] }
 0x6f1   :  { %3040 = vmatpush.msra.mxu1 %v5813_v26  ;;  %3060 = vmatpush.msra.mxu2 %v5817_v28  ;;  %v7162_v26 = vld [vmem:[#allocation34_spill] sm:$0xff]  ;;  %v7163_v28 = vld [vmem:[#allocation35_spill] sm:$0xff] }
 0x6f2   :  { %3080 = vmatpush.msrb.mxu3 %v5819_v29  ;;  %3021 = vmatpush.msra.mxu0 %v5823_v31  ;;  %v7164_v29 = vld [vmem:[#allocation36_spill] sm:$0xff]  ;;  %v7165_v31 = vld [vmem:[#allocation37_spill] sm:$0xff] }
 0x6f3   :  { %3041 = vmatpush.msra.mxu1 %v5825_v44  ;;  %3061 = vmatpush.msra.mxu2 %v5829_v51  ;;  %v7166_v44 = vld [vmem:[#allocation38_spill] sm:$0xff]  ;;  %v7167_v51 = vld [vmem:[#allocation39_spill] sm:$0xff] }
 0x6f4   :  { %3081 = vmatpush.msrb.mxu3 %v5831_v45  ;;  %3022 = vmatpush.msra.mxu0 %v5835_v43  ;;  %v7168_v45 = vld [vmem:[#allocation40_spill] sm:$0xff]  ;;  %v7169_v43 = vld [vmem:[#allocation41_spill] sm:$0xff] }
 0x6f5   :  { %3042 = vmatpush.msra.mxu1 %v5837_v48  ;;  %3062 = vmatpush.msra.mxu2 %v5841_v49  ;;  %v7170_v48 = vld [vmem:[#allocation42_spill] sm:$0xff]  ;;  %v7171_v49 = vld [vmem:[#allocation43_spill] sm:$0xff] }
 0x6f6   :  { %3082 = vmatpush.msrb.mxu3 %v5843_v53  ;;  %3023 = vmatpush.msra.mxu0 %v5847_v39  ;;  %v7172_v53 = vld [vmem:[#allocation23_spill] sm:$0xff]  ;;  %v7173_v39 = vld [vmem:[#allocation24_spill] sm:$0xff] }
 0x6f7   :  { %3043 = vmatpush.msra.mxu1 %v5849_v2  ;;  %3063 = vmatpush.msra.mxu2 %v5853_v60  ;;  %v7174_v2 = vld [vmem:[#allocation29_spill] sm:$0xff]  ;;  %v7175_v60 = vld [vmem:[#allocation32_spill] sm:$0xff] }
 0x6f8   :  { %3083 = vmatpush.msrb.mxu3 %v5855_v8  ;;  %3024 = vmatpush.msra.mxu0 %v5863_v11  ;;  %v7176_v8 = vld [vmem:[#allocation31_spill] sm:$0xff]  ;;  %v7177_v11 = vld [vmem:[#allocation44_spill] sm:$0xff] }
 0x6f9   :  { %3044 = vmatpush.msra.mxu1 %v5865_v40  ;;  %3064 = vmatpush.msra.mxu2 %v5871_v3  ;;  %v7178_v40 = vld [vmem:[#allocation45_spill] sm:$0xff]  ;;  %v7179_v3 = vld [vmem:[#allocation46_spill] sm:$0xff] }
 0x6fa   :  { %3084 = vmatpush.msrb.mxu3 %v5873_v4  ;;  %3025 = vmatpush.msra.mxu0 %v5878_v36  ;;  %v7180_v4 = vld [vmem:[#allocation47_spill] sm:$0xff]  ;;  %v7181_v36 = vld [vmem:[#allocation48_spill] sm:$0xff] }
 0x6fb   :  { %3045 = vmatpush.msra.mxu1 %v5880_v37  ;;  %3065 = vmatpush.msra.mxu2 %v5884_v15  ;;  %v7182_v37 = vld [vmem:[#allocation49_spill] sm:$0xff]  ;;  %v7183_v15 = vld [vmem:[#allocation50_spill] sm:$0xff] }
 0x6fc   :  { %3085 = vmatpush.msrb.mxu3 %v5886_v6  ;;  %3026 = vmatpush.msra.mxu0 %v5890_v24  ;;  %v7184_v6 = vld [vmem:[#allocation51_spill] sm:$0xff]  ;;  %v7185_v24 = vld [vmem:[#allocation52_spill] sm:$0xff] }
 0x6fd   :  { %3046 = vmatpush.msra.mxu1 %v5892_v25  ;;  %3066 = vmatpush.msra.mxu2 %v5896_v46  ;;  %v7186_v25 = vld [vmem:[#allocation19_spill] sm:$0xff]  ;;  %v7187_v46 = vld [vmem:[#allocation20_spill] sm:$0xff] }
 0x6fe   :  { %3086 = vmatpush.msrb.mxu3 %v5898_v61  ;;  %3027 = vmatpush.msra.mxu0 %v5902_v16  ;;  %v7188_v61 = vld [vmem:[#allocation27_spill] sm:$0xff]  ;;  %v7189_v16 = vld [vmem:[#allocation30_spill] sm:$0xff] }
 0x6ff   :  { %3047 = vmatpush.msra.mxu1 %v5904_v7  ;;  %3067 = vmatpush.msra.mxu2 %v5908_v30  ;;  %v7190_v7 = vld [vmem:[#allocation21_spill] sm:$0xff] }
 0x700   :  { %3087 = vmatpush.msrb.mxu3 %v5910_v21  ;;  %3028 = vmatpush.msra.mxu0 %v5918_v27 }
 0x701   :  { %3048 = vmatpush.msra.mxu1 %v5920_v59  ;;  %3068 = vmatpush.msra.mxu2 %v7161_v22 }
 0x702   :  { %3088 = vmatpush.msrb.mxu3 %v7162_v26  ;;  %3029 = vmatpush.msra.mxu0 %v7163_v28 }
 0x703   :  { %3049 = vmatpush.msra.mxu1 %v7164_v29  ;;  %3069 = vmatpush.msra.mxu2 %v7165_v31 }
 0x704   :  { %3089 = vmatpush.msrb.mxu3 %v7166_v44  ;;  %3030 = vmatpush.msra.mxu0 %v7167_v51 }
 0x705   :  { %3050 = vmatpush.msra.mxu1 %v7168_v45  ;;  %3070 = vmatpush.msra.mxu2 %v7169_v43 }
 0x706   :  { %3090 = vmatpush.msrb.mxu3 %v7170_v48  ;;  %3031 = vmatpush.msra.mxu0 %v7171_v49 }
 0x707   :  { %3051 = vmatpush.msra.mxu1 %v7172_v53  ;;  %3071 = vmatpush.msra.mxu2 %v7173_v39 }
 0x708   :  { %3091 = vmatpush.msrb.mxu3 %v7174_v2  ;;  %3032 = vmatpush.msra.mxu0 %v7175_v60  ;;  %v2845_v2 = vrot.slane %v6243_v18, 6 }
 0x709   :  { %3052 = vmatpush.msra.mxu1 %v7176_v8  ;;  %3072 = vmatpush.msra.mxu2 %v7177_v11 }
 0x70a   :  { %3092 = vmatpush.msrb.mxu3 %v7178_v40  ;;  %3033 = vmatpush.msra.mxu0 %v7179_v3 }
 0x70b   :  { %3053 = vmatpush.msra.mxu1 %v7180_v4  ;;  %3073 = vmatpush.msra.mxu2 %v7181_v36 }
 0x70c   :  { %3093 = vmatpush.msrb.mxu3 %v7182_v37  ;;  %3034 = vmatpush.msra.mxu0 %v7183_v15 }
 0x70d   :  { %3054 = vmatpush.msra.mxu1 %v7184_v6  ;;  %3074 = vmatpush.msra.mxu2 %v7185_v24 }
 0x70e   :  { %3094 = vmatpush.msrb.mxu3 %v7186_v25  ;;  %3035 = vmatpush.msra.mxu0 %v7187_v46 }
 0x70f   :  { %3055 = vmatpush.msra.mxu1 %v7188_v61  ;;  %3075 = vmatpush.msra.mxu2 %v7189_v16 }
 0x710   :  { %3095 = vmatpush.msrb.mxu3 %v7190_v7 }
 0x76b   :  { %v2707_v30 = vpop.f32.mrf.mxu0 }
 0x76c   :  { %v2774_v21 = vrot.slane %v2707_v30, 6  ;;  %v2727_v27 = vpop.f32.mrf.mxu1 }
 0x76d   :  { %v2775_v59 = vrot.slane %v2727_v27, 6 }
 0x76e   :  { %v2782_v38 = vadd.f32 %v2774_v21, %v6167_v12  ;;  %v6468_v12 = vld [vmem:[#allocation10 + $0x70] sm:$0xff] }
 0x76f   :  { %v2783_v56 = vadd.f32 %v2775_v59, %v6185_v54  ;;  %v6465_v54 = vld [vmem:[#allocation10 + $0x68] sm:$0xff]  ;;  %7203 = vst [vmem:[#allocation24_spill] sm:$0xff] %v6468_v12 }
 0x770   :  { %v4026_v17 = vmul.f32 -1.442695, %v2782_v38  ;;  %7202 = vst [vmem:[#allocation23_spill] sm:$0xff] %v6465_v54 }
 0x771   :  { %v4027_v5 = vmul.f32 -1.442695, %v2783_v56 }
 0x772   :  { %4209 = vpow2.f32 %v4026_v17  ;;  %v2747_v57 = vpop.f32.mrf.mxu2 }
 0x773   :  { %4211 = vpow2.f32 %v4027_v5  ;;  %v2767_v9 = vpop.f32.mrf.mxu3  ;;  %v2776_v52 = vrot.slane %v2747_v57, 6  ;;  %v6333_v57 = vld [vmem:[#allocation10 + $0x1c8] sm:$0xff] }
 0x774   :  { %v2777_v10 = vrot.slane %v2767_v9, 6 }
 0x775   :  { %v2784_v1 = vadd.f32 %v2776_v52, %v6219_v0  ;;  %v6336_v52 = vld [vmem:[#allocation10 + $0x1d0] sm:$0xff]  ;;  %v6459_v0 = vld [vmem:[#allocation10 + $0x98] sm:$0xff] }
 0x776   :  { %v2785_v62 = vadd.f32 %v2777_v10, %v6223_v42  ;;  %7200 = vst [vmem:[#allocation42_spill] sm:$0xff] %v6459_v0  ;;  %v6462_v42 = vld [vmem:[#allocation10 + $0x60] sm:$0xff] }
 0x777   :  { %7201 = vst [vmem:[#allocation43_spill] sm:$0xff] %v6462_v42 }
 0x778   :  { %v4210_v34 = vpop.eup %4209  ;;  %v4028_v13 = vmul.f32 -1.442695, %v2785_v62 }
 0x779   :  { %v4212_v55 = vpop.eup %4211  ;;  %v2789_v47 = vadd.f32 1.0, %v4210_v34  ;;  %v6318_v34 = vld [vmem:[#allocation10 + $0x1e0] sm:$0xff] }
 0x77a   :  { %v2808_v35 = vadd.f32 1.0, %v4212_v55  ;;  %4213 = vpow2.f32 %v4028_v13  ;;  %v6321_v13 = vld [vmem:[#allocation10 + $0x1e8] sm:$0xff]  ;;  %v6324_v55 = vld [vmem:[#allocation10 + $0x1f0] sm:$0xff] }
 0x77b   :  { %4215 = vrcp.f32 %v2789_v47  ;;  %v2801_v33 = vand.u32 2147483648, %v2789_v47  ;;  %v2799_v28 = vand.u32 2147483647, %v2789_v47  ;;  %vm2795_vm12 = vweird.f32 %v2789_v47 }
 0x77c   :  { %4217 = vrcp.f32 %v2808_v35  ;;  %v2820_v22 = vand.u32 2147483648, %v2808_v35  ;;  %v2818_v31 = vand.u32 2147483647, %v2808_v35  ;;  %vm2814_vm9 = vweird.f32 %v2808_v35 }
 0x77d   :  { %v2802_v45 = vor.u32 1.1754944e-38, %v2801_v33  ;;  %vm2800_vm1 = vcmp.eq.f32.partialorder %v2799_v28, 8.507059e+37  ;;  %v6366_v33 = vld [vmem:[#allocation10 + $0x160] sm:$0xff]  ;;  %v6375_v28 = vld [vmem:[#allocation10 + $0x178] sm:$0xff] }
 0x77e   :  { %v2821_v48 = vor.u32 1.1754944e-38, %v2820_v22  ;;  %vm2819_vm13 = vcmp.eq.f32.partialorder %v2818_v31, 8.507059e+37  ;;  %v6369_v22 = vld [vmem:[#allocation10 + $0x168] sm:$0xff] }
 0x77f   :  { %v6381_v31 = vld [vmem:[#allocation10 + $0x148] sm:$0xff] }
 0x780   :  { %v4214_v58 = vpop.eup %4213 }
 0x781   :  { %v4216_v19 = vpop.eup %4215  ;;  %v2828_v63 = vadd.f32 1.0, %v4214_v58  ;;  %v6339_v58 = vld [vmem:[#allocation10 + $0x1d8] sm:$0xff] }
 0x782   :  { %v4218_v23 = vpop.eup %4217  ;;  %v2791_v50 = vmul.f32 %v4216_v19, %v2789_v47  ;;  %vm2796_vm6 = vweird.f32 %v4216_v19  ;;  %v6327_v47 = vld [vmem:[#allocation10 + $0x1f8] sm:$0xff] }
 0x783   :  { %v2810_v41 = vmul.f32 %v4218_v23, %v2808_v35  ;;  %4219 = vrcp.f32 %v2828_v63  ;;  %vm2815_vm7 = vweird.f32 %v4218_v23  ;;  %vm2797_vm14 = vmor %vm2795_vm12, %vm2796_vm6  ;;  %v2840_v38 = vand.u32 2147483648, %v2828_v63  ;;  %v6330_v35 = vld [vmem:[#allocation10 + $0x1c0] sm:$0xff] }
 0x784   :  { %v2792_v20 = vsub.f32 1.0, %v2791_v50  ;;  %4221 = vtanh.f32 %v2784_v1  ;;  %vm2816_vm10 = vmor %vm2814_vm9, %vm2815_vm7  ;;  %vm2834_vm0 = vweird.f32 %v2828_v63  ;;  %v2838_v56 = vand.u32 2147483647, %v2828_v63  ;;  %v6345_v1 = vld [vmem:[#allocation10 + $0x1a8] sm:$0xff]  ;;  %v6354_v50 = vld [vmem:[#allocation10 + $0x180] sm:$0xff] }
 0x785   :  { %v2811_v32 = vsub.f32 1.0, %v2810_v41  ;;  %v2841_v18 = vor.u32 1.1754944e-38, %v2840_v38  ;;  %v6357_v41 = vld [vmem:[#allocation10 + $0x188] sm:$0xff]  ;;  %v6435_v38 = vld [vmem:[#allocation10 + $0xd8] sm:$0xff] }
 0x786   :  { %v2793_v26 = vmul.f32 %v4216_v19, %v2792_v20  ;;  %vm2839_vm3 = vcmp.eq.f32.partialorder %v2838_v56, 8.507059e+37  ;;  %v6360_v20 = vld [vmem:[#allocation10 + $0x190] sm:$0xff]  ;;  %7192 = vst [vmem:[#allocation34_spill] sm:$0xff] %v6435_v38  ;;  %v6438_v56 = vld [vmem:[#allocation10 + $0xa0] sm:$0xff] }
 0x787   :  { %v2812_v29 = vmul.f32 %v4218_v23, %v2811_v32  ;;  %v6363_v32 = vld [vmem:[#allocation10 + $0x198] sm:$0xff]  ;;  %7193 = vst [vmem:[#allocation35_spill] sm:$0xff] %v6438_v56 }
 0x788   :  { %v2794_v44 = vadd.f32 %v4216_v19, %v2793_v26  ;;  %v6372_v26 = vld [vmem:[#allocation10 + $0x170] sm:$0xff] }
 0x789   :  { %v4220_v51 = vpop.eup %4219  ;;  %v2813_v43 = vadd.f32 %v4218_v23, %v2812_v29  ;;  %v6378_v29 = vld [vmem:[#allocation10 + $0x140] sm:$0xff] }
 0x78a   :  { %v2798_v49 = vsel %vm2797_vm14, %v4216_v19, %v2794_v44  ;;  %v2830_v53 = vmul.f32 %v4220_v51, %v2828_v63  ;;  %v4222_v39 = vpop.eup %4221  ;;  %vm2835_vm15 = vweird.f32 %v4220_v51  ;;  %v6342_v19 = vld [vmem:[#allocation10 + $0x1a0] sm:$0xff]  ;;  %v6348_v63 = vld [vmem:[#allocation10 + $0x1b0] sm:$0xff] }
 0x78b   :  { %v2803_v60 = vsel %vm2800_vm1, %v2802_v45, %v2798_v49  ;;  %v2817_v8 = vsel %vm2816_vm10, %v4218_v23, %v2813_v43  ;;  %vm2836_vm2 = vmor %vm2834_vm0, %vm2835_vm15  ;;  %v6351_v23 = vld [vmem:[#allocation10 + $0x1b8] sm:$0xff]  ;;  %v6384_v44 = vld [vmem:[#allocation10 + $0x150] sm:$0xff] }
 0x78c   :  { %v2822_v11 = vsel %vm2819_vm13, %v2821_v48, %v2817_v8  ;;  %v2848_v40 = vmul.f32 %v4222_v39, %v2803_v60  ;;  %v2831_v3 = vsub.f32 1.0, %v2830_v53  ;;  %v6390_v45 = vld [vmem:[#allocation10 + $0x120] sm:$0xff]  ;;  %v6393_v43 = vld [vmem:[#allocation10 + $0x128] sm:$0xff]  ;;  %v6396_v48 = vld [vmem:[#allocation10 + $0x130] sm:$0xff] }
 0x78d   :  { %v2847_v30 = vmul.f32 %v2845_v2, %v2822_v11  ;;  %v6399_v49 = vld [vmem:[#allocation10 + $0x138] sm:$0xff]  ;;  %v6402_v53 = vld [vmem:[#allocation10 + $0x100] sm:$0xff]  ;;  %v6405_v39 = vld [vmem:[#allocation10 + $0x108] sm:$0xff] }
 0x78e   :  { %v2832_v21 = vmul.f32 %v4220_v51, %v2831_v3  ;;  %v6408_v2 = vld [vmem:[#allocation10 + $0x110] sm:$0xff]  ;;  %v6411_v60 = vld [vmem:[#allocation10 + $0x118] sm:$0xff]  ;;  %v6414_v8 = vld [vmem:[#allocation10 + $0xe0] sm:$0xff] }
 0x78f   :  { %v6315_v27 = vadd.f32 %v2848_v40, %v2847_v30  ;;  %v6417_v11 = vld [vmem:[#allocation10 + $0xe8] sm:$0xff]  ;;  %v6420_v40 = vld [vmem:[#allocation10 + $0xf0] sm:$0xff]  ;;  %v6423_v3 = vld [vmem:[#allocation10 + $0xf8] sm:$0xff] }
 0x790   :  { %v2833_v59 = vadd.f32 %v4220_v51, %v2832_v21  ;;  %v6426_v30 = vld [vmem:[#allocation10 + $0xc0] sm:$0xff]  ;;  %v6429_v21 = vld [vmem:[#allocation10 + $0xc8] sm:$0xff] }
 0x791   :  { %4223 = vtanh.f32 %v6315_v27 }
 0x792   :  { %v2837_v17 = vsel %vm2836_vm2, %v4220_v51, %v2833_v59  ;;  %v6387_v51 = vld [vmem:[#allocation10 + $0x158] sm:$0xff]  ;;  %v6432_v59 = vld [vmem:[#allocation10 + $0xd0] sm:$0xff] }
 0x793   :  { %v2842_v9 = vsel %vm2839_vm3, %v2841_v18, %v2837_v17  ;;  %7191 = vst [vmem:[#allocation33_spill] sm:$0xff] %v6432_v59  ;;  %v6441_v17 = vld [vmem:[#allocation10 + $0xa8] sm:$0xff]  ;;  %v6444_v18 = vld [vmem:[#allocation10 + $0xb0] sm:$0xff] }
 0x794   :  { %7194 = vst [vmem:[#allocation36_spill] sm:$0xff] %v6441_v17 }
 0x795   :  { %7195 = vst [vmem:[#allocation37_spill] sm:$0xff] %v6444_v18 }
 0x797   :  { %v4224_v5 = vpop.eup %4223 }
 0x798   :  { %v2851_v10 = vmul.f32 %v4224_v5, %v2842_v9  ;;  %v6447_v5 = vld [vmem:[#allocation10 + $0xb8] sm:$0xff]  ;;  %v6450_v9 = vld [vmem:[#allocation10 + $0x80] sm:$0xff] }
 0x799   :  { %7196 = vst [vmem:[#allocation38_spill] sm:$0xff] %v6447_v5 }
 0x79a   :  { %v2853_v62 = vrot.slane %v2851_v10, 2  ;;  %7197 = vst [vmem:[#allocation39_spill] sm:$0xff] %v6450_v9  ;;  %v6453_v10 = vld [vmem:[#allocation10 + $0x88] sm:$0xff] }
 0x79b   :  { %7198 = vst [vmem:[#allocation40_spill] sm:$0xff] %v6453_v10 }
 0x79c   :  { %2871 = vmatmul.f32.vlgmr.msrb.gmra.mxu0 %v2853_v62  ;;  %2891 = vmatmul.f32.vlgmr.msrb.gmra.mxu1 %v2853_v62 }
 0x79d   :  { %2911 = vmatmul.f32.vlgmr.msrb.gmra.mxu2 %v2853_v62  ;;  %2931 = vmatmul.f32.vlgmr.msra.gmra.mxu3 %v2853_v62  ;;  %v6456_v62 = vld [vmem:[#allocation10 + $0x90] sm:$0xff] }
 0x79e   :  { %3201 = vmatpush.msrb.mxu0 %v6318_v34  ;;  %3221 = vmatpush.msrb.mxu1 %v6321_v13  ;;  %7199 = vst [vmem:[#allocation41_spill] sm:$0xff] %v6456_v62 }
 0x79f   :  { %3241 = vmatpush.msrb.mxu2 %v6324_v55  ;;  %3261 = vmatpush.msra.mxu3 %v6327_v47 }
 0x7a0   :  { %3202 = vmatpush.msrb.mxu0 %v6330_v35  ;;  %3222 = vmatpush.msrb.mxu1 %v6333_v57 }
 0x7a1   :  { %3242 = vmatpush.msrb.mxu2 %v6336_v52  ;;  %3262 = vmatpush.msra.mxu3 %v6339_v58 }
 0x7a2   :  { %3203 = vmatpush.msrb.mxu0 %v6342_v19  ;;  %3223 = vmatpush.msrb.mxu1 %v6345_v1 }
 0x7a3   :  { %3243 = vmatpush.msrb.mxu2 %v6348_v63  ;;  %3263 = vmatpush.msra.mxu3 %v6351_v23 }
 0x7a4   :  { %3204 = vmatpush.msrb.mxu0 %v6354_v50  ;;  %3224 = vmatpush.msrb.mxu1 %v6357_v41 }
 0x7a5   :  { %3244 = vmatpush.msrb.mxu2 %v6360_v20  ;;  %3264 = vmatpush.msra.mxu3 %v6363_v32 }
 0x7a6   :  { %3205 = vmatpush.msrb.mxu0 %v6366_v33  ;;  %3225 = vmatpush.msrb.mxu1 %v6369_v22 }
 0x7a7   :  { %3245 = vmatpush.msrb.mxu2 %v6372_v26  ;;  %3265 = vmatpush.msra.mxu3 %v6375_v28 }
 0x7a8   :  { %3206 = vmatpush.msrb.mxu0 %v6378_v29  ;;  %3226 = vmatpush.msrb.mxu1 %v6381_v31 }
 0x7a9   :  { %3246 = vmatpush.msrb.mxu2 %v6384_v44  ;;  %3266 = vmatpush.msra.mxu3 %v6387_v51 }
 0x7aa   :  { %3207 = vmatpush.msrb.mxu0 %v6390_v45  ;;  %3227 = vmatpush.msrb.mxu1 %v6393_v43 }
 0x7ab   :  { %3247 = vmatpush.msrb.mxu2 %v6396_v48  ;;  %3267 = vmatpush.msra.mxu3 %v6399_v49 }
 0x7ac   :  { %3208 = vmatpush.msrb.mxu0 %v6402_v53  ;;  %3228 = vmatpush.msrb.mxu1 %v6405_v39 }
 0x7ad   :  { %3248 = vmatpush.msrb.mxu2 %v6408_v2  ;;  %3268 = vmatpush.msra.mxu3 %v6411_v60 }
 0x7ae   :  { %3209 = vmatpush.msrb.mxu0 %v6414_v8  ;;  %3229 = vmatpush.msrb.mxu1 %v6417_v11 }
 0x7af   :  { %3249 = vmatpush.msrb.mxu2 %v6420_v40  ;;  %3269 = vmatpush.msra.mxu3 %v6423_v3 }
 0x7b0   :  { %3210 = vmatpush.msrb.mxu0 %v6426_v30  ;;  %3230 = vmatpush.msrb.mxu1 %v6429_v21 }
 0x7b1   :  { %3250 = vmatpush.msrb.mxu2 %v6432_v59  ;;  %3270 = vmatpush.msra.mxu3 %v6435_v38 }
 0x7b2   :  { %3211 = vmatpush.msrb.mxu0 %v6438_v56  ;;  %3231 = vmatpush.msrb.mxu1 %v6441_v17 }
 0x7b3   :  { %3251 = vmatpush.msrb.mxu2 %v6444_v18  ;;  %3271 = vmatpush.msra.mxu3 %v6447_v5 }
 0x7b4   :  { %3212 = vmatpush.msrb.mxu0 %v6450_v9  ;;  %3232 = vmatpush.msrb.mxu1 %v6453_v10  ;;  %v6471_v10 = vld [vmem:[#allocation10 + $0x78] sm:$0xff] }
 0x7b5   :  { %3252 = vmatpush.msrb.mxu2 %v6456_v62  ;;  %3272 = vmatpush.msra.mxu3 %v6459_v0  ;;  %7204 = vst [vmem:[#allocation29_spill] sm:$0xff] %v6471_v10  ;;  %v6474_v62 = vld [vmem:[#allocation10 + $0x40] sm:$0xff] }
 0x7b6   :  { %3213 = vmatpush.msrb.mxu0 %v6462_v42  ;;  %3233 = vmatpush.msrb.mxu1 %v6465_v54  ;;  %7205 = vst [vmem:[#allocation32_spill] sm:$0xff] %v6474_v62  ;;  %v7207_v54 = vld [vmem:[#allocation60_spill] sm:$0xff] }
 0x7b7   :  { %3253 = vmatpush.msrb.mxu2 %v6468_v12  ;;  %3273 = vmatpush.msra.mxu3 %v6471_v10  ;;  %v7206_v10 = vld [vmem:[#allocation55_spill] sm:$0xff] }
 0x7b8   :  { %3214 = vmatpush.msrb.mxu0 %v6474_v62  ;;  %3234 = vmatpush.msrb.mxu1 %v7180_v4 }
 0x7b9   :  { %3254 = vmatpush.msrb.mxu2 %v7181_v36  ;;  %3274 = vmatpush.msra.mxu3 %v7182_v37 }
 0x7ba   :  { %3215 = vmatpush.msrb.mxu0 %v7183_v15  ;;  %3235 = vmatpush.msrb.mxu1 %v7184_v6 }
 0x7bb   :  { %3255 = vmatpush.msrb.mxu2 %v7185_v24  ;;  %3275 = vmatpush.msra.mxu3 %v7186_v25 }
 0x7bc   :  { %3216 = vmatpush.msrb.mxu0 %v7187_v46  ;;  %3236 = vmatpush.msrb.mxu1 %v7188_v61 }
 0x7bd   :  { %3256 = vmatpush.msrb.mxu2 %v7189_v16  ;;  %3276 = vmatpush.msra.mxu3 %v7190_v7 }
 0x819   :  { %v2872_v4 = vpop.f32.mrf.mxu0  ;;  %v2892_v36 = vpop.f32.mrf.mxu1 }
 0x81a   :  { %v2939_v62 = vrot.slane %v2872_v4, 4  ;;  %v2940_v37 = vrot.slane %v2892_v36, 4 }
 0x81c   :  { %v2947_v15 = vadd.f32 %v2939_v62, %v6189_v14  ;;  %v2948_v6 = vadd.f32 %v2940_v37, %v7206_v10  ;;  %v7208_v37 = vld [vmem:[#allocation61_spill] sm:$0xff] }
 0x81e   :  { %v4029_v12 = vmul.f32 -1.442695, %v2947_v15  ;;  %v4030_v24 = vmul.f32 -1.442695, %v2948_v6 }
 0x820   :  { %4225 = vpow2.f32 %v4029_v12  ;;  %v2932_v25 = vpop.f32.mrf.mxu3  ;;  %v2912_v4 = vpop.f32.mrf.mxu2 }
 0x821   :  { %4227 = vpow2.f32 %v4030_v24  ;;  %v2942_v46 = vrot.slane %v2932_v25, 4  ;;  %v2941_v14 = vrot.slane %v2912_v4, 4 }
 0x823   :  { %v2950_v61 = vadd.f32 %v2942_v46, %v7207_v54  ;;  %v2949_v12 = vadd.f32 %v2941_v14, %v7208_v37 }
 0x825   :  { %v4031_v42 = vmul.f32 -1.442695, %v2950_v61 }
 0x826   :  { %v4226_v16 = vpop.eup %4225 }
 0x827   :  { %v4228_v0 = vpop.eup %4227  ;;  %v2954_v7 = vadd.f32 1.0, %v4226_v16  ;;  %4229 = vpow2.f32 %v4031_v42 }
 0x828   :  { %v2973_v9 = vadd.f32 1.0, %v4228_v0 }
 0x829   :  { %4231 = vrcp.f32 %v2954_v7  ;;  %v2966_v46 = vand.u32 2147483648, %v2954_v7  ;;  %v2964_v0 = vand.u32 2147483647, %v2954_v7  ;;  %vm2960_vm11 = vweird.f32 %v2954_v7 }
 0x82a   :  { %4233 = vrcp.f32 %v2973_v9  ;;  %v2985_v61 = vand.u32 2147483648, %v2973_v9  ;;  %v2983_v4 = vand.u32 2147483647, %v2973_v9  ;;  %vm2979_vm6 = vweird.f32 %v2973_v9 }
 0x82b   :  { %v2967_v14 = vor.u32 1.1754944e-38, %v2966_v46  ;;  %vm2965_vm9 = vcmp.eq.f32.partialorder %v2964_v0, 8.507059e+37 }
 0x82c   :  { %vm2984_vm14 = vcmp.eq.f32.partialorder %v2983_v4, 8.507059e+37  ;;  %v7214_v4 = vld [vmem:[#allocation38_spill] sm:$0xff] }
 0x82d   :  { %v4230_v62 = vpop.eup %4229 }
 0x82e   :  { %v2993_v10 = vadd.f32 1.0, %v4230_v62 }
 0x82f   :  { %v4232_v36 = vpop.eup %4231 }
 0x830   :  { %v4234_v15 = vpop.eup %4233  ;;  %v2956_v6 = vmul.f32 %v4232_v36, %v2954_v7  ;;  %4235 = vrcp.f32 %v2993_v10  ;;  %vm2961_vm4 = vweird.f32 %v4232_v36  ;;  %vm2999_vm1 = vweird.f32 %v2993_v10 }
 0x831   :  { %v2975_v24 = vmul.f32 %v4234_v15, %v2973_v9  ;;  %4237 = vtanh.f32 %v2949_v12  ;;  %vm2980_vm5 = vweird.f32 %v4234_v15  ;;  %vm2962_vm7 = vmor %vm2960_vm11, %vm2961_vm4 }
 0x832   :  { %v2957_v54 = vsub.f32 1.0, %v2956_v6  ;;  %v3010_v6 = vrot.slane %v6315_v27, 6  ;;  %vm2981_vm12 = vmor %vm2979_vm6, %vm2980_vm5  ;;  %v3005_v27 = vand.u32 2147483648, %v2993_v10 }
 0x833   :  { %v2976_v25 = vsub.f32 1.0, %v2975_v24  ;;  %v2986_v24 = vor.u32 1.1754944e-38, %v2985_v61  ;;  %v3003_v61 = vand.u32 2147483647, %v2993_v10 }
 0x834   :  { %v2958_v42 = vmul.f32 %v4232_v36, %v2957_v54  ;;  %v3006_v0 = vor.u32 1.1754944e-38, %v3005_v27  ;;  %v6555_v27 = vld [vmem:[#allocation10 + $0x58] sm:$0xff] }
 0x835   :  { %v2977_v16 = vmul.f32 %v4234_v15, %v2976_v25  ;;  %vm3004_vm15 = vcmp.eq.f32.partialorder %v3003_v61, 8.507059e+37  ;;  %7226 = vst [vmem:[#allocation45_spill] sm:$0xff] %v6555_v27  ;;  %v6558_v61 = vld [vmem:[#allocation10 + $0x20] sm:$0xff] }
 0x836   :  { %v4236_v5 = vpop.eup %4235  ;;  %v2959_v62 = vadd.f32 %v4232_v36, %v2958_v42  ;;  %7227 = vst [vmem:[#allocation46_spill] sm:$0xff] %v6558_v61 }
 0x837   :  { %v2978_v37 = vadd.f32 %v4234_v15, %v2977_v16  ;;  %v2995_v18 = vmul.f32 %v4236_v5, %v2993_v10  ;;  %v4238_v54 = vpop.eup %4237  ;;  %vm3000_vm10 = vweird.f32 %v4236_v5  ;;  %v7213_v10 = vld [vmem:[#allocation37_spill] sm:$0xff] }
 0x838   :  { %v2963_v12 = vsel %vm2962_vm7, %v4232_v36, %v2959_v62  ;;  %vm3001_vm13 = vmor %vm2999_vm1, %vm3000_vm10  ;;  %v7215_v62 = vld [vmem:[#allocation39_spill] sm:$0xff] }
 0x839   :  { %v2968_v17 = vsel %vm2965_vm9, %v2967_v14, %v2963_v12  ;;  %v2982_v56 = vsel %vm2981_vm12, %v4234_v15, %v2978_v37  ;;  %v2996_v25 = vsub.f32 1.0, %v2995_v18  ;;  %v7216_v14 = vld [vmem:[#allocation40_spill] sm:$0xff]  ;;  %v7217_v37 = vld [vmem:[#allocation41_spill] sm:$0xff]  ;;  %v7220_v12 = vld [vmem:[#allocation23_spill] sm:$0xff] }
 0x83a   :  { %v2987_v38 = vsel %vm2984_vm14, %v2986_v24, %v2982_v56  ;;  %v3013_v59 = vmul.f32 %v4238_v54, %v2968_v17  ;;  %v7211_v17 = vld [vmem:[#allocation35_spill] sm:$0xff]  ;;  %v7221_v54 = vld [vmem:[#allocation24_spill] sm:$0xff] }
 0x83b   :  { %v3012_v42 = vmul.f32 %v3010_v6, %v2987_v38  ;;  %v2997_v7 = vmul.f32 %v4236_v5, %v2996_v25  ;;  %v7210_v38 = vld [vmem:[#allocation34_spill] sm:$0xff]  ;;  %v7219_v24 = vld [vmem:[#allocation43_spill] sm:$0xff]  ;;  %v7222_v25 = vld [vmem:[#allocation29_spill] sm:$0xff] }
 0x83c   :  { %v7218_v6 = vld [vmem:[#allocation42_spill] sm:$0xff] }
 0x83d   :  { %v6493_v9 = vadd.f32 %v3013_v59, %v3012_v42  ;;  %v2998_v46 = vadd.f32 %v4236_v5, %v2997_v7  ;;  %v7209_v59 = vld [vmem:[#allocation33_spill] sm:$0xff]  ;;  %v7223_v42 = vld [vmem:[#allocation32_spill] sm:$0xff] }
 0x83e   :  { %v6549_v7 = vld [vmem:[#allocation10 + $0x48] sm:$0xff] }
 0x83f   :  { %4239 = vtanh.f32 %v6493_v9  ;;  %v3002_v36 = vsel %vm3001_vm13, %v4236_v5, %v2998_v46  ;;  %v7212_v5 = vld [vmem:[#allocation36_spill] sm:$0xff]  ;;  %7224 = vst [vmem:[#allocation31_spill] sm:$0xff] %v6549_v7  ;;  %v6552_v46 = vld [vmem:[#allocation10 + $0x50] sm:$0xff] }
 0x840   :  { %v3007_v16 = vsel %vm3004_vm15, %v3006_v0, %v3002_v36  ;;  %7225 = vst [vmem:[#allocation44_spill] sm:$0xff] %v6552_v46  ;;  %v6561_v36 = vld [vmem:[#allocation10 + $0x28] sm:$0xff]  ;;  %v6564_v0 = vld [vmem:[#allocation10 + $0x30] sm:$0xff] }
 0x841   :  { %7228 = vst [vmem:[#allocation47_spill] sm:$0xff] %v6561_v36 }
 0x842   :  { %7229 = vst [vmem:[#allocation48_spill] sm:$0xff] %v6564_v0 }
 0x845   :  { %v4240_v15 = vpop.eup %4239 }
 0x846   :  { %v3016_v18 = vmul.f32 %v4240_v15, %v3007_v16  ;;  %v6567_v15 = vld [vmem:[#allocation10 + $0x38] sm:$0xff]  ;;  %v6570_v16 = vld [vmem:[#allocation10] sm:$0xff] }
 0x847   :  { %7230 = vst [vmem:[#allocation49_spill] sm:$0xff] %v6567_v15 }
 0x848   :  { %v3018_v56 = vrot.slane %v3016_v18, 4  ;;  %7231 = vst [vmem:[#allocation50_spill] sm:$0xff] %v6570_v16  ;;  %v6573_v18 = vld [vmem:[#allocation10 + $0x8] sm:$0xff] }
 0x849   :  { %7232 = vst [vmem:[#allocation51_spill] sm:$0xff] %v6573_v18 }
 0x84a   :  { %3036 = vmatmul.f32.vlgmr.msra.gmra.mxu0 %v3018_v56  ;;  %3056 = vmatmul.f32.vlgmr.msra.gmra.mxu1 %v3018_v56 }
 0x84b   :  { %3076 = vmatmul.f32.vlgmr.msra.gmra.mxu2 %v3018_v56  ;;  %3096 = vmatmul.f32.vlgmr.msrb.gmra.mxu3 %v3018_v56  ;;  %v6576_v56 = vld [vmem:[#allocation10 + $0x10] sm:$0xff] }
 0x84c   :  { %3363 = vmatpush.msra.mxu0 %v6318_v34  ;;  %3383 = vmatpush.msra.mxu1 %v6321_v13  ;;  %7233 = vst [vmem:[#allocation52_spill] sm:$0xff] %v6576_v56 }
 0x84d   :  { %3403 = vmatpush.msra.mxu2 %v6324_v55  ;;  %3423 = vmatpush.msrb.mxu3 %v6327_v47 }
 0x84e   :  { %3364 = vmatpush.msra.mxu0 %v6330_v35  ;;  %3384 = vmatpush.msra.mxu1 %v6333_v57 }
 0x84f   :  { %3404 = vmatpush.msra.mxu2 %v6336_v52  ;;  %3424 = vmatpush.msrb.mxu3 %v6339_v58 }
 0x850   :  { %3365 = vmatpush.msra.mxu0 %v6342_v19  ;;  %3385 = vmatpush.msra.mxu1 %v6345_v1 }
 0x851   :  { %3405 = vmatpush.msra.mxu2 %v6348_v63  ;;  %3425 = vmatpush.msrb.mxu3 %v6351_v23 }
 0x852   :  { %3366 = vmatpush.msra.mxu0 %v6354_v50  ;;  %3386 = vmatpush.msra.mxu1 %v6357_v41 }
 0x853   :  { %3406 = vmatpush.msra.mxu2 %v6360_v20  ;;  %3426 = vmatpush.msrb.mxu3 %v6363_v32 }
 0x854   :  { %3367 = vmatpush.msra.mxu0 %v6366_v33  ;;  %3387 = vmatpush.msra.mxu1 %v6369_v22 }
 0x855   :  { %3407 = vmatpush.msra.mxu2 %v6372_v26  ;;  %3427 = vmatpush.msrb.mxu3 %v6375_v28 }
 0x856   :  { %3368 = vmatpush.msra.mxu0 %v6378_v29  ;;  %3388 = vmatpush.msra.mxu1 %v6381_v31 }
 0x857   :  { %3408 = vmatpush.msra.mxu2 %v6384_v44  ;;  %3428 = vmatpush.msrb.mxu3 %v6387_v51 }
 0x858   :  { %3369 = vmatpush.msra.mxu0 %v6390_v45  ;;  %3389 = vmatpush.msra.mxu1 %v6393_v43 }
 0x859   :  { %3409 = vmatpush.msra.mxu2 %v6396_v48  ;;  %3429 = vmatpush.msrb.mxu3 %v6399_v49 }
 0x85a   :  { %3370 = vmatpush.msra.mxu0 %v6402_v53  ;;  %3390 = vmatpush.msra.mxu1 %v6405_v39 }
 0x85b   :  { %3410 = vmatpush.msra.mxu2 %v6408_v2  ;;  %3430 = vmatpush.msrb.mxu3 %v6411_v60 }
 0x85c   :  { %3371 = vmatpush.msra.mxu0 %v6414_v8  ;;  %3391 = vmatpush.msra.mxu1 %v6417_v11 }
 0x85d   :  { %3411 = vmatpush.msra.mxu2 %v6420_v40  ;;  %3431 = vmatpush.msrb.mxu3 %v6423_v3 }
 0x85e   :  { %3372 = vmatpush.msra.mxu0 %v6426_v30  ;;  %3392 = vmatpush.msra.mxu1 %v6429_v21 }
 0x85f   :  { %3412 = vmatpush.msra.mxu2 %v7209_v59  ;;  %3432 = vmatpush.msrb.mxu3 %v7210_v38 }
 0x860   :  { %3373 = vmatpush.msra.mxu0 %v7211_v17  ;;  %3393 = vmatpush.msra.mxu1 %v7212_v5 }
 0x861   :  { %3413 = vmatpush.msra.mxu2 %v7213_v10  ;;  %3433 = vmatpush.msrb.mxu3 %v7214_v4 }
 0x862   :  { %3374 = vmatpush.msra.mxu0 %v7215_v62  ;;  %3394 = vmatpush.msra.mxu1 %v7216_v14 }
 0x863   :  { %3414 = vmatpush.msra.mxu2 %v7217_v37  ;;  %3434 = vmatpush.msrb.mxu3 %v7218_v6 }
 0x864   :  { %3375 = vmatpush.msra.mxu0 %v7219_v24  ;;  %3395 = vmatpush.msra.mxu1 %v7220_v12  ;;  %v7237_v24 = vld [vmem:[#allocation57_spill] sm:$0xff] }
 0x865   :  { %3415 = vmatpush.msra.mxu2 %v7221_v54  ;;  %3435 = vmatpush.msrb.mxu3 %v7222_v25 }
 0x866   :  { %3376 = vmatpush.msra.mxu0 %v7223_v42  ;;  %3396 = vmatpush.msra.mxu1 %v6549_v7  ;;  %v7236_v42 = vld [vmem:[#allocation54_spill] sm:$0xff] }
 0x867   :  { %3416 = vmatpush.msra.mxu2 %v6552_v46  ;;  %3436 = vmatpush.msrb.mxu3 %v6555_v27  ;;  %v7235_v46 = vld [vmem:[#allocation17_spill] sm:$0xff] }
 0x868   :  { %3377 = vmatpush.msra.mxu0 %v6558_v61  ;;  %3397 = vmatpush.msra.mxu1 %v6561_v36  ;;  %v6579_v36 = vld [vmem:[#allocation10 + $0x18] sm:$0xff] }
 0x869   :  { %3417 = vmatpush.msra.mxu2 %v6564_v0  ;;  %3437 = vmatpush.msrb.mxu3 %v6567_v15  ;;  %7234 = vst [vmem:[#allocation19_spill] sm:$0xff] %v6579_v36 }
 0x86a   :  { %3378 = vmatpush.msra.mxu0 %v6570_v16  ;;  %3398 = vmatpush.msra.mxu1 %v6573_v18 }
 0x86b   :  { %3418 = vmatpush.msra.mxu2 %v6576_v56  ;;  %3438 = vmatpush.msrb.mxu3 %v6579_v36 }
 0x8c7   :  { %v3037_v0 = vpop.f32.mrf.mxu0  ;;  %v3057_v61 = vpop.f32.mrf.mxu1 }
 0x8c8   :  { %v3104_v27 = vrot.slane %v3037_v0, 2  ;;  %v3105_v15 = vrot.slane %v3057_v61, 2  ;;  %v7238_v61 = vld [vmem:[#allocation56_spill] sm:$0xff] }
 0x8ca   :  { %v3112_v7 = vadd.f32 %v3104_v27, %v7235_v46  ;;  %v3113_v16 = vadd.f32 %v3105_v15, %v7236_v42 }
 0x8cc   :  { %v4032_v25 = vmul.f32 -1.442695, %v3112_v7  ;;  %v4033_v54 = vmul.f32 -1.442695, %v3113_v16 }
 0x8ce   :  { %4241 = vpow2.f32 %v4032_v25  ;;  %v3097_v18 = vpop.f32.mrf.mxu3  ;;  %v3077_v0 = vpop.f32.mrf.mxu2 }
 0x8cf   :  { %4243 = vpow2.f32 %v4033_v54  ;;  %v3107_v12 = vrot.slane %v3097_v18, 2  ;;  %v3106_v46 = vrot.slane %v3077_v0, 2 }
 0x8d1   :  { %v3115_v56 = vadd.f32 %v3107_v12, %v7237_v24  ;;  %v3114_v25 = vadd.f32 %v3106_v46, %v7238_v61 }
 0x8d3   :  { %v4034_v6 = vmul.f32 -1.442695, %v3115_v56 }
 0x8d4   :  { %v4242_v37 = vpop.eup %4241 }
 0x8d5   :  { %v4244_v14 = vpop.eup %4243  ;;  %v3119_v36 = vadd.f32 1.0, %v4242_v37  ;;  %4245 = vpow2.f32 %v4034_v6 }
 0x8d6   :  { %v3138_v62 = vadd.f32 1.0, %v4244_v14 }
 0x8d7   :  { %4247 = vrcp.f32 %v3119_v36  ;;  %v3131_v18 = vand.u32 2147483648, %v3119_v36  ;;  %v3129_v14 = vand.u32 2147483647, %v3119_v36  ;;  %vm3125_vm3 = vweird.f32 %v3119_v36 }
 0x8d8   :  { %4249 = vrcp.f32 %v3138_v62  ;;  %v3150_v37 = vand.u32 2147483648, %v3138_v62  ;;  %v3148_v0 = vand.u32 2147483647, %v3138_v62  ;;  %vm3144_vm4 = vweird.f32 %v3138_v62 }
 0x8d9   :  { %v3132_v46 = vor.u32 1.1754944e-38, %v3131_v18  ;;  %vm3130_vm6 = vcmp.eq.f32.partialorder %v3129_v14, 8.507059e+37 }
 0x8da   :  { %vm3149_vm7 = vcmp.eq.f32.partialorder %v3148_v0, 8.507059e+37  ;;  %v7244_v0 = vld [vmem:[#allocation38_spill] sm:$0xff] }
 0x8db   :  { %v4246_v27 = vpop.eup %4245 }
 0x8dc   :  { %v3158_v42 = vadd.f32 1.0, %v4246_v27 }
 0x8dd   :  { %v4248_v7 = vpop.eup %4247 }
 0x8de   :  { %v4250_v15 = vpop.eup %4249  ;;  %v3121_v54 = vmul.f32 %v4248_v7, %v3119_v36  ;;  %4251 = vrcp.f32 %v3158_v42  ;;  %vm3126_vm0 = vweird.f32 %v4248_v7  ;;  %vm3164_vm9 = vweird.f32 %v3158_v42 }
 0x8df   :  { %v3140_v16 = vmul.f32 %v4250_v15, %v3138_v62  ;;  %4253 = vtanh.f32 %v3114_v25  ;;  %vm3145_vm2 = vweird.f32 %v4250_v15  ;;  %vm3127_vm5 = vmor %vm3125_vm3, %vm3126_vm0 }
 0x8e0   :  { %v3122_v24 = vsub.f32 1.0, %v3121_v54  ;;  %v3175_v54 = vrot.slane %v6493_v9, 6  ;;  %vm3146_vm11 = vmor %vm3144_vm4, %vm3145_vm2  ;;  %v3170_v9 = vand.u32 2147483648, %v3158_v42 }
 0x8e1   :  { %v3141_v12 = vsub.f32 1.0, %v3140_v16  ;;  %v3151_v16 = vor.u32 1.1754944e-38, %v3150_v37  ;;  %v3168_v37 = vand.u32 2147483647, %v3158_v42 }
 0x8e2   :  { %v3123_v6 = vmul.f32 %v4248_v7, %v3122_v24  ;;  %v3171_v14 = vor.u32 1.1754944e-38, %v3170_v9  ;;  %v7256_v9 = vld [vmem:[#allocation45_spill] sm:$0xff] }
 0x8e3   :  { %v3142_v56 = vmul.f32 %v4250_v15, %v3141_v12  ;;  %vm3169_vm10 = vcmp.eq.f32.partialorder %v3168_v37, 8.507059e+37  ;;  %v7257_v37 = vld [vmem:[#allocation46_spill] sm:$0xff] }
 0x8e4   :  { %v4252_v4 = vpop.eup %4251  ;;  %v3124_v27 = vadd.f32 %v4248_v7, %v3123_v6 }
 0x8e5   :  { %v3143_v61 = vadd.f32 %v4250_v15, %v3142_v56  ;;  %v3160_v10 = vmul.f32 %v4252_v4, %v3158_v42  ;;  %v4254_v24 = vpop.eup %4253  ;;  %vm3165_vm12 = vweird.f32 %v4252_v4  ;;  %v7243_v42 = vld [vmem:[#allocation37_spill] sm:$0xff] }
 0x8e6   :  { %v3128_v25 = vsel %vm3127_vm5, %v4248_v7, %v3124_v27  ;;  %vm3166_vm14 = vmor %vm3164_vm9, %vm3165_vm12  ;;  %v7245_v27 = vld [vmem:[#allocation39_spill] sm:$0xff] }
 0x8e7   :  { %v3133_v5 = vsel %vm3130_vm6, %v3132_v46, %v3128_v25  ;;  %v3147_v17 = vsel %vm3146_vm11, %v4250_v15, %v3143_v61  ;;  %v3161_v12 = vsub.f32 1.0, %v3160_v10  ;;  %v7246_v46 = vld [vmem:[#allocation40_spill] sm:$0xff]  ;;  %v7247_v61 = vld [vmem:[#allocation41_spill] sm:$0xff]  ;;  %v7250_v25 = vld [vmem:[#allocation23_spill] sm:$0xff] }
 0x8e8   :  { %v3152_v38 = vsel %vm3149_vm7, %v3151_v16, %v3147_v17  ;;  %v3178_v59 = vmul.f32 %v4254_v24, %v3133_v5  ;;  %v7241_v5 = vld [vmem:[#allocation35_spill] sm:$0xff]  ;;  %v7251_v24 = vld [vmem:[#allocation24_spill] sm:$0xff] }
 0x8e9   :  { %v3177_v6 = vmul.f32 %v3175_v54, %v3152_v38  ;;  %v3162_v36 = vmul.f32 %v4252_v4, %v3161_v12  ;;  %v7240_v38 = vld [vmem:[#allocation34_spill] sm:$0xff]  ;;  %v7249_v16 = vld [vmem:[#allocation43_spill] sm:$0xff]  ;;  %v7252_v12 = vld [vmem:[#allocation29_spill] sm:$0xff] }
 0x8ea   :  { %v7248_v54 = vld [vmem:[#allocation42_spill] sm:$0xff] }
 0x8eb   :  { %v6587_v62 = vadd.f32 %v3178_v59, %v3177_v6  ;;  %v3163_v18 = vadd.f32 %v4252_v4, %v3162_v36  ;;  %v7239_v59 = vld [vmem:[#allocation33_spill] sm:$0xff]  ;;  %v7253_v6 = vld [vmem:[#allocation32_spill] sm:$0xff]  ;;  %v7254_v36 = vld [vmem:[#allocation31_spill] sm:$0xff] }
 0x8ed   :  { %4255 = vtanh.f32 %v6587_v62  ;;  %v3167_v7 = vsel %vm3166_vm14, %v4252_v4, %v3163_v18  ;;  %v7242_v4 = vld [vmem:[#allocation36_spill] sm:$0xff] }
 0x8ee   :  { %v3172_v56 = vsel %vm3169_vm10, %v3171_v14, %v3167_v7  ;;  %v7255_v18 = vld [vmem:[#allocation44_spill] sm:$0xff]  ;;  %v7258_v7 = vld [vmem:[#allocation47_spill] sm:$0xff] }
 0x8ef   :  { %v7259_v14 = vld [vmem:[#allocation48_spill] sm:$0xff] }
 0x8f3   :  { %v4256_v15 = vpop.eup %4255 }
 0x8f4   :  { %v3181_v10 = vmul.f32 %v4256_v15, %v3172_v56  ;;  %v7260_v15 = vld [vmem:[#allocation49_spill] sm:$0xff]  ;;  %v7261_v56 = vld [vmem:[#allocation50_spill] sm:$0xff] }
 0x8f6   :  { %v3199_v17 = vrot.slane %v3181_v10, 6  ;;  %v7262_v10 = vld [vmem:[#allocation51_spill] sm:$0xff] }
 0x8f8   :  { %3217 = vmatmul.f32.vlgmr.msrb.gmra.mxu0 %v3199_v17  ;;  %3237 = vmatmul.f32.vlgmr.msrb.gmra.mxu1 %v3199_v17 }
 0x8f9   :  { %3257 = vmatmul.f32.vlgmr.msrb.gmra.mxu2 %v3199_v17  ;;  %3277 = vmatmul.f32.vlgmr.msra.gmra.mxu3 %v3199_v17  ;;  %v7263_v17 = vld [vmem:[#allocation52_spill] sm:$0xff] }
 0x8fa   :  { %3528 = vmatpush.msrb.mxu0 %v6318_v34  ;;  %3548 = vmatpush.msrb.mxu1 %v6321_v13 }
 0x8fb   :  { %3568 = vmatpush.msrb.mxu2 %v6324_v55  ;;  %3588 = vmatpush.msra.mxu3 %v6327_v47 }
 0x8fc   :  { %3529 = vmatpush.msrb.mxu0 %v6330_v35  ;;  %3549 = vmatpush.msrb.mxu1 %v6333_v57 }
 0x8fd   :  { %3569 = vmatpush.msrb.mxu2 %v6336_v52  ;;  %3589 = vmatpush.msra.mxu3 %v6339_v58 }
 0x8fe   :  { %3530 = vmatpush.msrb.mxu0 %v6342_v19  ;;  %3550 = vmatpush.msrb.mxu1 %v6345_v1 }
 0x8ff   :  { %3570 = vmatpush.msrb.mxu2 %v6348_v63  ;;  %3590 = vmatpush.msra.mxu3 %v6351_v23 }
 0x900   :  { %3531 = vmatpush.msrb.mxu0 %v6354_v50  ;;  %3551 = vmatpush.msrb.mxu1 %v6357_v41 }
 0x901   :  { %3571 = vmatpush.msrb.mxu2 %v6360_v20  ;;  %3591 = vmatpush.msra.mxu3 %v6363_v32 }
 0x902   :  { %3532 = vmatpush.msrb.mxu0 %v6366_v33  ;;  %3552 = vmatpush.msrb.mxu1 %v6369_v22 }
 0x903   :  { %3572 = vmatpush.msrb.mxu2 %v6372_v26  ;;  %3592 = vmatpush.msra.mxu3 %v6375_v28 }
 0x904   :  { %3533 = vmatpush.msrb.mxu0 %v6378_v29  ;;  %3553 = vmatpush.msrb.mxu1 %v6381_v31 }
 0x905   :  { %3573 = vmatpush.msrb.mxu2 %v6384_v44  ;;  %3593 = vmatpush.msra.mxu3 %v6387_v51 }
 0x906   :  { %3534 = vmatpush.msrb.mxu0 %v6390_v45  ;;  %3554 = vmatpush.msrb.mxu1 %v6393_v43 }
 0x907   :  { %3574 = vmatpush.msrb.mxu2 %v6396_v48  ;;  %3594 = vmatpush.msra.mxu3 %v6399_v49 }
 0x908   :  { %3535 = vmatpush.msrb.mxu0 %v6402_v53  ;;  %3555 = vmatpush.msrb.mxu1 %v6405_v39 }
 0x909   :  { %3575 = vmatpush.msrb.mxu2 %v6408_v2  ;;  %3595 = vmatpush.msra.mxu3 %v6411_v60 }
 0x90a   :  { %3536 = vmatpush.msrb.mxu0 %v6414_v8  ;;  %3556 = vmatpush.msrb.mxu1 %v6417_v11 }
 0x90b   :  { %3576 = vmatpush.msrb.mxu2 %v6420_v40  ;;  %3596 = vmatpush.msra.mxu3 %v6423_v3 }
 0x90c   :  { %3537 = vmatpush.msrb.mxu0 %v6426_v30  ;;  %3557 = vmatpush.msrb.mxu1 %v6429_v21 }
 0x90d   :  { %3577 = vmatpush.msrb.mxu2 %v7239_v59  ;;  %3597 = vmatpush.msra.mxu3 %v7240_v38 }
 0x90e   :  { %3538 = vmatpush.msrb.mxu0 %v7241_v5  ;;  %3558 = vmatpush.msrb.mxu1 %v7242_v4 }
 0x90f   :  { %3578 = vmatpush.msrb.mxu2 %v7243_v42  ;;  %3598 = vmatpush.msra.mxu3 %v7244_v0 }
 0x910   :  { %3539 = vmatpush.msrb.mxu0 %v7245_v27  ;;  %3559 = vmatpush.msrb.mxu1 %v7246_v46 }
 0x911   :  { %3579 = vmatpush.msrb.mxu2 %v7247_v61  ;;  %3599 = vmatpush.msra.mxu3 %v7248_v54 }
 0x912   :  { %3540 = vmatpush.msrb.mxu0 %v7249_v16  ;;  %3560 = vmatpush.msrb.mxu1 %v7250_v25 }
 0x913   :  { %3580 = vmatpush.msrb.mxu2 %v7251_v24  ;;  %3600 = vmatpush.msra.mxu3 %v7252_v12  ;;  %v7265_v12 = vld [vmem:[#allocation25_spill] sm:$0xff]  ;;  %v7266_v24 = vld [vmem:[#allocation18_spill] sm:$0xff] }
 0x914   :  { %3541 = vmatpush.msrb.mxu0 %v7253_v6  ;;  %3561 = vmatpush.msrb.mxu1 %v7254_v36  ;;  %v7264_v6 = vld [vmem:[#allocation19_spill] sm:$0xff] }
 0x915   :  { %3581 = vmatpush.msrb.mxu2 %v7255_v18  ;;  %3601 = vmatpush.msra.mxu3 %v7256_v9 }
 0x916   :  { %3542 = vmatpush.msrb.mxu0 %v7257_v37  ;;  %3562 = vmatpush.msrb.mxu1 %v7258_v7 }
 0x917   :  { %3582 = vmatpush.msrb.mxu2 %v7259_v14  ;;  %3602 = vmatpush.msra.mxu3 %v7260_v15  ;;  %v7267_v15 = vld [vmem:[#allocation22_spill] sm:$0xff] }
 0x918   :  { %3543 = vmatpush.msrb.mxu0 %v7261_v56  ;;  %3563 = vmatpush.msrb.mxu1 %v7262_v10 }
 0x919   :  { %3583 = vmatpush.msrb.mxu2 %v7263_v17  ;;  %3603 = vmatpush.msra.mxu3 %v7264_v6 }
 0x975   :  { %v3218_v36 = vpop.f32.mrf.mxu0  ;;  %v3238_v18 = vpop.f32.mrf.mxu1 }
 0x976   :  { %v3281_v9 = vadd.f32 %v3218_v36, %v7265_v12  ;;  %v3282_v37 = vadd.f32 %v3238_v18, %v7266_v24  ;;  %v7268_v18 = vld [vmem:[#allocation26_spill] sm:$0xff] }
 0x978   :  { %v4035_v25 = vmul.f32 -1.442695, %v3281_v9  ;;  %v4036_v7 = vmul.f32 -1.442695, %v3282_v37 }
 0x97a   :  { %4257 = vpow2.f32 %v4035_v25 }
 0x97b   :  { %4259 = vpow2.f32 %v4036_v7 }
 0x97c   :  { %v3278_v14 = vpop.f32.mrf.mxu3  ;;  %v3258_v6 = vpop.f32.mrf.mxu2 }
 0x97d   :  { %v3284_v16 = vadd.f32 %v3278_v14, %v7267_v15  ;;  %v3283_v9 = vadd.f32 %v3258_v6, %v7268_v18 }
 0x97f   :  { %v4037_v56 = vmul.f32 -1.442695, %v3284_v16 }
 0x980   :  { %v4258_v54 = vpop.eup %4257 }
 0x981   :  { %v4260_v10 = vpop.eup %4259  ;;  %v3288_v61 = vadd.f32 1.0, %v4258_v54  ;;  %4261 = vpow2.f32 %v4037_v56 }
 0x982   :  { %v3307_v17 = vadd.f32 1.0, %v4260_v10 }
 0x983   :  { %4263 = vrcp.f32 %v3288_v61  ;;  %v3300_v16 = vand.u32 2147483648, %v3288_v61  ;;  %v3298_v56 = vand.u32 2147483647, %v3288_v61  ;;  %vm3294_vm15 = vweird.f32 %v3288_v61 }
 0x984   :  { %4265 = vrcp.f32 %v3307_v17  ;;  %v3319_v15 = vand.u32 2147483648, %v3307_v17  ;;  %v3317_v27 = vand.u32 2147483647, %v3307_v17  ;;  %vm3313_vm0 = vweird.f32 %v3307_v17 }
 0x985   :  { %v3301_v6 = vor.u32 1.1754944e-38, %v3300_v16  ;;  %vm3299_vm4 = vcmp.eq.f32.partialorder %v3298_v56, 8.507059e+37 }
 0x986   :  { %vm3318_vm5 = vcmp.eq.f32.partialorder %v3317_v27, 8.507059e+37 }
 0x987   :  { %v4262_v46 = vpop.eup %4261 }
 0x988   :  { %v3327_v36 = vadd.f32 1.0, %v4262_v46 }
 0x989   :  { %v4264_v12 = vpop.eup %4263 }
 0x98a   :  { %v4266_v37 = vpop.eup %4265  ;;  %v3290_v25 = vmul.f32 %v4264_v12, %v3288_v61  ;;  %4267 = vrcp.f32 %v3327_v36  ;;  %vm3295_vm1 = vweird.f32 %v4264_v12  ;;  %vm3333_vm6 = vweird.f32 %v3327_v36 }
 0x98b   :  { %v3309_v7 = vmul.f32 %v4266_v37, %v3307_v17  ;;  %4269 = vtanh.f32 %v3283_v9  ;;  %vm3314_vm13 = vweird.f32 %v4266_v37  ;;  %vm3296_vm2 = vmor %vm3294_vm15, %vm3295_vm1  ;;  %v3344_v9 = vrot.slane %v6587_v62, 6 }
 0x98c   :  { %v3291_v24 = vsub.f32 1.0, %v3290_v25  ;;  %vm3315_vm3 = vmor %vm3313_vm0, %vm3314_vm13  ;;  %v3320_v25 = vor.u32 1.1754944e-38, %v3319_v15  ;;  %v3339_v15 = vand.u32 2147483648, %v3327_v36 }
 0x98d   :  { %v3310_v14 = vsub.f32 1.0, %v3309_v7 }
 0x98e   :  { %v3292_v54 = vmul.f32 %v4264_v12, %v3291_v24  ;;  %v3340_v56 = vor.u32 1.1754944e-38, %v3339_v15 }
 0x98f   :  { %v3311_v10 = vmul.f32 %v4266_v37, %v3310_v14 }
 0x990   :  { %v4268_v0 = vpop.eup %4267  ;;  %v3293_v46 = vadd.f32 %v4264_v12, %v3292_v54 }
 0x991   :  { %v3312_v18 = vadd.f32 %v4266_v37, %v3311_v10  ;;  %v3329_v42 = vmul.f32 %v4268_v0, %v3327_v36  ;;  %v4270_v24 = vpop.eup %4269  ;;  %vm3334_vm11 = vweird.f32 %v4268_v0 }
 0x992   :  { %v3297_v7 = vsel %vm3296_vm2, %v4264_v12, %v3293_v46  ;;  %v3337_v12 = vand.u32 2147483647, %v3327_v36  ;;  %vm3335_vm7 = vmor %vm3333_vm6, %vm3334_vm11 }
 0x993   :  { %v3302_v4 = vsel %vm3299_vm4, %v3301_v6, %v3297_v7  ;;  %v3316_v5 = vsel %vm3315_vm3, %v4266_v37, %v3312_v18  ;;  %v3330_v14 = vsub.f32 1.0, %v3329_v42 }
 0x994   :  { %v3321_v38 = vsel %vm3318_vm5, %v3320_v25, %v3316_v5  ;;  %v3347_v59 = vmul.f32 %v4270_v24, %v3302_v4  ;;  %vm3338_vm12 = vcmp.eq.f32.partialorder %v3337_v12, 8.507059e+37 }
 0x995   :  { %v3346_v54 = vmul.f32 %v3344_v9, %v3321_v38  ;;  %v3331_v61 = vmul.f32 %v4268_v0, %v3330_v14  ;;  %v7298_v9 = vld [vmem:[#allocation58_spill] sm:$0xff] }
 0x997   :  { %v6659_v17 = vadd.f32 %v3347_v59, %v3346_v54  ;;  %v3332_v16 = vadd.f32 %v4268_v0, %v3331_v61  ;;  %v7297_v59 = vld [vmem:[#allocation59_spill] sm:$0xff] }
 0x999   :  { %4271 = vtanh.f32 %v6659_v17  ;;  %v3336_v62 = vsel %vm3335_vm7, %v4268_v0, %v3332_v16 }
 0x99a   :  { %v3341_v27 = vsel %vm3338_vm12, %v3340_v56, %v3336_v62 }
 0x99f   :  { %v4272_v18 = vpop.eup %4271 }
 0x9a0   :  { %v3350_v42 = vmul.f32 %v4272_v18, %v3341_v27 }
 0x9a2   :  { %3379 = vmatmul.f32.vlgmr.msra.gmra.mxu0 %v3350_v42  ;;  %3399 = vmatmul.f32.vlgmr.msra.gmra.mxu1 %v3350_v42 }
 0x9a3   :  { %3419 = vmatmul.f32.vlgmr.msra.gmra.mxu2 %v3350_v42  ;;  %3439 = vmatmul.f32.vlgmr.msrb.gmra.mxu3 %v3350_v42 }
 0x9a4   :  { %3693 = vmatpush.msra.mxu0 %v6318_v34  ;;  %3713 = vmatpush.msra.mxu1 %v6321_v13  ;;  %v7269_v34 = vld [vmem:[#allocation33_spill] sm:$0xff]  ;;  %v7270_v13 = vld [vmem:[#allocation34_spill] sm:$0xff] }
 0x9a5   :  { %3733 = vmatpush.msra.mxu2 %v6324_v55  ;;  %3753 = vmatpush.msrb.mxu3 %v6327_v47  ;;  %v7271_v55 = vld [vmem:[#allocation35_spill] sm:$0xff]  ;;  %v7272_v47 = vld [vmem:[#allocation36_spill] sm:$0xff] }
 0x9a6   :  { %3694 = vmatpush.msra.mxu0 %v6330_v35  ;;  %3714 = vmatpush.msra.mxu1 %v6333_v57  ;;  %v7273_v35 = vld [vmem:[#allocation37_spill] sm:$0xff]  ;;  %v7274_v57 = vld [vmem:[#allocation38_spill] sm:$0xff] }
 0x9a7   :  { %3734 = vmatpush.msra.mxu2 %v6336_v52  ;;  %3754 = vmatpush.msrb.mxu3 %v6339_v58  ;;  %v7275_v52 = vld [vmem:[#allocation39_spill] sm:$0xff]  ;;  %v7276_v58 = vld [vmem:[#allocation40_spill] sm:$0xff] }
 0x9a8   :  { %3695 = vmatpush.msra.mxu0 %v6342_v19  ;;  %3715 = vmatpush.msra.mxu1 %v6345_v1  ;;  %v7277_v19 = vld [vmem:[#allocation41_spill] sm:$0xff]  ;;  %v7278_v1 = vld [vmem:[#allocation42_spill] sm:$0xff] }
 0x9a9   :  { %3735 = vmatpush.msra.mxu2 %v6348_v63  ;;  %3755 = vmatpush.msrb.mxu3 %v6351_v23  ;;  %v7279_v63 = vld [vmem:[#allocation43_spill] sm:$0xff] }
 0x9aa   :  { %3696 = vmatpush.msra.mxu0 %v6354_v50  ;;  %3716 = vmatpush.msra.mxu1 %v6357_v41  ;;  %v7280_v23 = vld [vmem:[#allocation23_spill] sm:$0xff]  ;;  %v7281_v50 = vld [vmem:[#allocation24_spill] sm:$0xff]  ;;  %v7282_v41 = vld [vmem:[#allocation29_spill] sm:$0xff] }
 0x9ab   :  { %3736 = vmatpush.msra.mxu2 %v6360_v20  ;;  %3756 = vmatpush.msrb.mxu3 %v6363_v32  ;;  %v7283_v20 = vld [vmem:[#allocation32_spill] sm:$0xff]  ;;  %v7284_v32 = vld [vmem:[#allocation31_spill] sm:$0xff] }
 0x9ac   :  { %3697 = vmatpush.msra.mxu0 %v6366_v33  ;;  %3717 = vmatpush.msra.mxu1 %v6369_v22  ;;  %v7285_v33 = vld [vmem:[#allocation44_spill] sm:$0xff]  ;;  %v7286_v22 = vld [vmem:[#allocation45_spill] sm:$0xff] }
 0x9ad   :  { %3737 = vmatpush.msra.mxu2 %v6372_v26  ;;  %3757 = vmatpush.msrb.mxu3 %v6375_v28  ;;  %v7287_v26 = vld [vmem:[#allocation46_spill] sm:$0xff]  ;;  %v7288_v28 = vld [vmem:[#allocation47_spill] sm:$0xff] }
 0x9ae   :  { %3698 = vmatpush.msra.mxu0 %v6378_v29  ;;  %3718 = vmatpush.msra.mxu1 %v6381_v31  ;;  %v7289_v29 = vld [vmem:[#allocation48_spill] sm:$0xff]  ;;  %v7290_v31 = vld [vmem:[#allocation49_spill] sm:$0xff] }
 0x9af   :  { %3738 = vmatpush.msra.mxu2 %v6384_v44  ;;  %3758 = vmatpush.msrb.mxu3 %v6387_v51  ;;  %v7291_v44 = vld [vmem:[#allocation50_spill] sm:$0xff]  ;;  %v7292_v51 = vld [vmem:[#allocation51_spill] sm:$0xff] }
 0x9b0   :  { %3699 = vmatpush.msra.mxu0 %v6390_v45  ;;  %3719 = vmatpush.msra.mxu1 %v6393_v43  ;;  %v7293_v45 = vld [vmem:[#allocation52_spill] sm:$0xff]  ;;  %v7294_v43 = vld [vmem:[#allocation19_spill] sm:$0xff] }
 0x9b1   :  { %3739 = vmatpush.msra.mxu2 %v6396_v48  ;;  %3759 = vmatpush.msrb.mxu3 %v6399_v49 }
 0x9b2   :  { %3700 = vmatpush.msra.mxu0 %v6402_v53  ;;  %3720 = vmatpush.msra.mxu1 %v6405_v39 }
 0x9b3   :  { %3740 = vmatpush.msra.mxu2 %v6408_v2  ;;  %3760 = vmatpush.msrb.mxu3 %v6411_v60  ;;  %v7295_v2 = vld [vmem:[#allocation28_spill] sm:$0xff] }
 0x9b4   :  { %3701 = vmatpush.msra.mxu0 %v6414_v8  ;;  %3721 = vmatpush.msra.mxu1 %v6417_v11  ;;  %v7296_v8 = vld [vmem:[#allocation53_spill] sm:$0xff] }
 0x9b5   :  { %3741 = vmatpush.msra.mxu2 %v6420_v40  ;;  %3761 = vmatpush.msrb.mxu3 %v6423_v3 }
 0x9b6   :  { %3702 = vmatpush.msra.mxu0 %v6426_v30  ;;  %3722 = vmatpush.msra.mxu1 %v6429_v21 }
 0x9b7   :  { %3742 = vmatpush.msra.mxu2 %v7269_v34  ;;  %3762 = vmatpush.msrb.mxu3 %v7270_v13 }
 0x9b8   :  { %3703 = vmatpush.msra.mxu0 %v7271_v55  ;;  %3723 = vmatpush.msra.mxu1 %v7272_v47 }
 0x9b9   :  { %3743 = vmatpush.msra.mxu2 %v7273_v35  ;;  %3763 = vmatpush.msrb.mxu3 %v7274_v57  ;;  %v3518_v57 = vrot.slane %v6659_v17, 6 }
 0x9ba   :  { %3704 = vmatpush.msra.mxu0 %v7275_v52  ;;  %3724 = vmatpush.msra.mxu1 %v7276_v58 }
 0x9bb   :  { %3744 = vmatpush.msra.mxu2 %v7277_v19  ;;  %3764 = vmatpush.msrb.mxu3 %v7278_v1 }
 0x9bc   :  { %3705 = vmatpush.msra.mxu0 %v7279_v63  ;;  %3725 = vmatpush.msra.mxu1 %v7280_v23 }
 0x9bd   :  { %3745 = vmatpush.msra.mxu2 %v7281_v50  ;;  %3765 = vmatpush.msrb.mxu3 %v7282_v41 }
 0x9be   :  { %3706 = vmatpush.msra.mxu0 %v7283_v20  ;;  %3726 = vmatpush.msra.mxu1 %v7284_v32 }
 0x9bf   :  { %3746 = vmatpush.msra.mxu2 %v7285_v33  ;;  %3766 = vmatpush.msrb.mxu3 %v7286_v22 }
 0x9c0   :  { %3707 = vmatpush.msra.mxu0 %v7287_v26  ;;  %3727 = vmatpush.msra.mxu1 %v7288_v28 }
 0x9c1   :  { %3747 = vmatpush.msra.mxu2 %v7289_v29  ;;  %3767 = vmatpush.msrb.mxu3 %v7290_v31 }
 0x9c2   :  { %3708 = vmatpush.msra.mxu0 %v7291_v44  ;;  %3728 = vmatpush.msra.mxu1 %v7292_v51 }
 0x9c3   :  { %3748 = vmatpush.msra.mxu2 %v7293_v45  ;;  %3768 = vmatpush.msrb.mxu3 %v7294_v43 }
 0xa1f   :  { %v3380_v48 = vpop.f32.mrf.mxu0  ;;  %v3400_v49 = vpop.f32.mrf.mxu1 }
 0xa20   :  { %v3447_v53 = vrot.slane %v3380_v48, 6  ;;  %v3448_v39 = vrot.slane %v3400_v49, 6 }
 0xa22   :  { %v3455_v60 = vadd.f32 %v3447_v53, %v7295_v2  ;;  %v3456_v11 = vadd.f32 %v3448_v39, %v7296_v8  ;;  %v7299_v39 = vld [vmem:[#allocation25_spill] sm:$0xff] }
 0xa24   :  { %v4038_v40 = vmul.f32 -1.442695, %v3455_v60  ;;  %v4039_v3 = vmul.f32 -1.442695, %v3456_v11  ;;  %v7300_v11 = vld [vmem:[#allocation18_spill] sm:$0xff] }
 0xa26   :  { %4273 = vpow2.f32 %v4038_v40  ;;  %v3440_v30 = vpop.f32.mrf.mxu3  ;;  %v3420_v10 = vpop.f32.mrf.mxu2 }
 0xa27   :  { %4275 = vpow2.f32 %v4039_v3  ;;  %v3450_v21 = vrot.slane %v3440_v30, 6  ;;  %v3449_v46 = vrot.slane %v3420_v10, 6  ;;  %v3867_v10 = vld [vmem:[%s6825_s9 + $0x20] sm:$0xff] }
 0xa29   :  { %v3458_v38 = vadd.f32 %v3450_v21, %v7297_v59  ;;  %v3457_v24 = vadd.f32 %v3449_v46, %v7298_v9  ;;  %v3870_v21 = vld [vmem:[%s6825_s9 + $0x38] sm:$0xff] }
 0xa2b   :  { %v4040_v5 = vmul.f32 -1.442695, %v3458_v38  ;;  %v3869_v38 = vld [vmem:[%s6825_s9 + $0x30] sm:$0xff] }
 0xa2c   :  { %v4274_v4 = vpop.eup %4273 }
 0xa2d   :  { %v4276_v0 = vpop.eup %4275  ;;  %v3462_v36 = vadd.f32 1.0, %v4274_v4  ;;  %4277 = vpow2.f32 %v4040_v5 }
 0xa2e   :  { %v3481_v37 = vadd.f32 1.0, %v4276_v0  ;;  %v3868_v0 = vld [vmem:[%s6825_s9 + $0x28] sm:$0xff] }
 0xa2f   :  { %4279 = vrcp.f32 %v3462_v36  ;;  %v3474_v12 = vand.u32 2147483648, %v3462_v36  ;;  %v3472_v18 = vand.u32 2147483647, %v3462_v36  ;;  %vm3468_vm10 = vweird.f32 %v3462_v36 }
 0xa30   :  { %4281 = vrcp.f32 %v3481_v37  ;;  %v3493_v62 = vand.u32 2147483648, %v3481_v37  ;;  %v3491_v42 = vand.u32 2147483647, %v3481_v37  ;;  %vm3487_vm1 = vweird.f32 %v3481_v37 }
 0xa31   :  { %v3475_v55 = vor.u32 1.1754944e-38, %v3474_v12  ;;  %vm3473_vm0 = vcmp.eq.f32.partialorder %v3472_v18, 8.507059e+37  ;;  %v3864_v12 = vld [vmem:[%s6825_s9 + $0x8] sm:$0xff] }
 0xa32   :  { %v3494_v52 = vor.u32 1.1754944e-38, %v3493_v62  ;;  %vm3492_vm2 = vcmp.eq.f32.partialorder %v3491_v42, 8.507059e+37  ;;  %v7302_v18 = vld [vmem:[#allocation26_spill] sm:$0xff]  ;;  %v3863_v42 = vld [vmem:[%s6825_s9] sm:$0xff] }
 0xa33   :  { %v4278_v6 = vpop.eup %4277 }
 0xa34   :  { %v3501_v25 = vadd.f32 1.0, %v4278_v6 }
 0xa35   :  { %v4280_v7 = vpop.eup %4279 }
 0xa36   :  { %v4282_v14 = vpop.eup %4281  ;;  %v3464_v54 = vmul.f32 %v4280_v7, %v3462_v36  ;;  %4283 = vrcp.f32 %v3501_v25  ;;  %vm3469_vm9 = vweird.f32 %v4280_v7  ;;  %v3513_v17 = vand.u32 2147483648, %v3501_v25  ;;  %v7301_v36 = vld [vmem:[#allocation22_spill] sm:$0xff] }
 0xa37   :  { %v3483_v61 = vmul.f32 %v4282_v14, %v3481_v37  ;;  %4285 = vtanh.f32 %v3457_v24  ;;  %vm3488_vm14 = vweird.f32 %v4282_v14  ;;  %vm3470_vm13 = vmor %vm3468_vm10, %vm3469_vm9  ;;  %vm3507_vm4 = vweird.f32 %v3501_v25 }
 0xa38   :  { %v3465_v16 = vsub.f32 1.0, %v3464_v54  ;;  %vm3489_vm15 = vmor %vm3487_vm1, %vm3488_vm14  ;;  %v3511_v26 = vand.u32 2147483647, %v3501_v25  ;;  %v3514_v29 = vor.u32 1.1754944e-38, %v3513_v17 }
 0xa39   :  { %v3484_v15 = vsub.f32 1.0, %v3483_v61  ;;  %v3866_v61 = vld [vmem:[%s6825_s9 + $0x18] sm:$0xff] }
 0xa3a   :  { %v3466_v56 = vmul.f32 %v4280_v7, %v3465_v16  ;;  %vm3512_vm11 = vcmp.eq.f32.partialorder %v3511_v26, 8.507059e+37  ;;  %v3865_v16 = vld [vmem:[%s6825_s9 + $0x10] sm:$0xff] }
 0xa3b   :  { %v3485_v27 = vmul.f32 %v4282_v14, %v3484_v15 }
 0xa3c   :  { %v4284_v34 = vpop.eup %4283  ;;  %v3467_v13 = vadd.f32 %v4280_v7, %v3466_v56 }
 0xa3d   :  { %v3486_v47 = vadd.f32 %v4282_v14, %v3485_v27  ;;  %v3503_v35 = vmul.f32 %v4284_v34, %v3501_v25  ;;  %v4286_v19 = vpop.eup %4285  ;;  %vm3508_vm3 = vweird.f32 %v4284_v34 }
 0xa3e   :  { %v3471_v58 = vsel %vm3470_vm13, %v4280_v7, %v3467_v13  ;;  %vm3509_vm5 = vmor %vm3507_vm4, %vm3508_vm3  ;;  %vm3874_vm4 = vcmask 523264  }
 0xa3f   :  { %v3476_v1 = vsel %vm3473_vm0, %v3475_v55, %v3471_v58  ;;  %v3490_v63 = vsel %vm3489_vm15, %v4282_v14, %v3486_v47  ;;  %v3504_v23 = vsub.f32 1.0, %v3503_v35 }
 0xa40   :  { %v3495_v50 = vsel %vm3492_vm2, %v3494_v52, %v3490_v63  ;;  %v3521_v41 = vmul.f32 %v4286_v19, %v3476_v1 }
 0xa41   :  { %v3520_v20 = vmul.f32 %v3518_v57, %v3495_v50  ;;  %v3505_v32 = vmul.f32 %v4284_v34, %v3504_v23 }
 0xa43   :  { %v6731_v33 = vadd.f32 %v3521_v41, %v3520_v20  ;;  %v3506_v22 = vadd.f32 %v4284_v34, %v3505_v32 }
 0xa45   :  { %4287 = vtanh.f32 %v6731_v33  ;;  %v3510_v28 = vsel %vm3509_vm5, %v4284_v34, %v3506_v22  ;;  %v3683_v22 = vrot.slane %v6731_v33, 6 }
 0xa46   :  { %v3515_v44 = vsel %vm3512_vm11, %v3514_v29, %v3510_v28 }
 0xa4b   :  { %v4288_v31 = vpop.eup %4287 }
 0xa4c   :  { %v3524_v51 = vmul.f32 %v4288_v31, %v3515_v44 }
 0xa4e   :  { %v3526_v45 = vrot.slane %v3524_v51, 2 }
 0xa50   :  { %3544 = vmatmul.f32.vlgmr.msrb.gmra.mxu0 %v3526_v45  ;;  %3564 = vmatmul.f32.vlgmr.msrb.gmra.mxu1 %v3526_v45 }
 0xa51   :  { %3584 = vmatmul.f32.vlgmr.msrb.gmra.mxu2 %v3526_v45  ;;  %3604 = vmatmul.f32.vlgmr.msra.gmra.mxu3 %v3526_v45 }
 0xa52   :  { %3885 = vmatpush.msrb.mxu0 %v3870_v21 }
 0xa54   :  { %3886 = vmatpush.msrb.mxu0 %v3869_v38  ;;  %v3873_v38 = vpop.permute.xlu2 %3872 }
 0xa56   :  { %3887 = vmatpush.msrb.mxu0 %v3868_v0 }
 0xa58   :  { %3888 = vmatpush.msrb.mxu0 %v3867_v10 }
 0xa5a   :  { %3889 = vmatpush.msrb.mxu0 %v3866_v61 }
 0xa5c   :  { %3890 = vmatpush.msrb.mxu0 %v3865_v16  ;;  %v3857_v16 = vld [vmem:[%s6824_s8 + $0x10] sm:$0xff] }
 0xa5e   :  { %3891 = vmatpush.msrb.mxu0 %v3864_v12  ;;  %v3856_v12 = vld [vmem:[%s6824_s8 + $0x8] sm:$0xff] }
 0xa60   :  { %3892 = vmatpush.msrb.mxu0 %v3863_v42 }
 0xacd   :  { %v3545_v43 = vpop.f32.mrf.mxu0  ;;  %v3565_v48 = vpop.f32.mrf.mxu1 }
 0xace   :  { %v3612_v49 = vrot.slane %v3545_v43, 4  ;;  %v3613_v53 = vrot.slane %v3565_v48, 4 }
 0xad0   :  { %v3620_v60 = vadd.f32 %v3612_v49, %v7299_v39  ;;  %v3621_v40 = vadd.f32 %v3613_v53, %v7300_v11 }
 0xad2   :  { %v4041_v3 = vmul.f32 -1.442695, %v3620_v60  ;;  %v4042_v30 = vmul.f32 -1.442695, %v3621_v40 }
 0xad4   :  { %4289 = vpow2.f32 %v4041_v3  ;;  %v3605_v5 = vpop.f32.mrf.mxu3  ;;  %v3585_v14 = vpop.f32.mrf.mxu2 }
 0xad5   :  { %4291 = vpow2.f32 %v4042_v30  ;;  %v3615_v4 = vrot.slane %v3605_v5, 4  ;;  %v3614_v54 = vrot.slane %v3585_v14, 4  ;;  %v3859_v14 = vld [vmem:[%s6824_s8 + $0x20] sm:$0xff] }
 0xad7   :  { %v3623_v37 = vadd.f32 %v3615_v4, %v7301_v36  ;;  %v3622_v27 = vadd.f32 %v3614_v54, %v7302_v18  ;;  %v3858_v54 = vld [vmem:[%s6824_s8 + $0x18] sm:$0xff] }
 0xad9   :  { %v4043_v46 = vmul.f32 -1.442695, %v3623_v37  ;;  %v3862_v37 = vld [vmem:[%s6824_s8 + $0x38] sm:$0xff] }
 0xada   :  { %v4290_v6 = vpop.eup %4289  ;;  %3909 = vmatpush.msrb.mxu1 %v3862_v37  ;;  %v3929_v37 = vld [vmem:[%s6827_s11 + $0x10] sm:$0xff] }
 0xadb   :  { %v4292_v25 = vpop.eup %4291  ;;  %v3627_v7 = vadd.f32 1.0, %v4290_v6  ;;  %4293 = vpow2.f32 %v4043_v46  ;;  %v3861_v6 = vld [vmem:[%s6824_s8 + $0x30] sm:$0xff] }
 0xadc   :  { %v3646_v24 = vadd.f32 1.0, %v4292_v25  ;;  %3910 = vmatpush.msrb.mxu1 %v3861_v6  ;;  %v4064_v6 = vld [vmem:[%s6826_s10] ss:$0 sm:$0xff] }
 0xadd   :  { %4295 = vrcp.f32 %v3627_v7  ;;  %v3639_v57 = vand.u32 2147483648, %v3627_v7  ;;  %v3637_v19 = vand.u32 2147483647, %v3627_v7  ;;  %vm3633_vm12 = vweird.f32 %v3627_v7 }
 0xade   :  { %4297 = vrcp.f32 %v3646_v24  ;;  %v3658_v52 = vand.u32 2147483648, %v3646_v24  ;;  %v3656_v63 = vand.u32 2147483647, %v3646_v24  ;;  %vm3652_vm9 = vweird.f32 %v3646_v24 }
 0xadf   :  { %v3640_v41 = vor.u32 1.1754944e-38, %v3639_v57  ;;  %vm3638_vm1 = vcmp.eq.f32.partialorder %v3637_v19, 8.507059e+37 }
 0xae0   :  { %v3659_v17 = vor.u32 1.1754944e-38, %v3658_v52  ;;  %vm3657_vm13 = vcmp.eq.f32.partialorder %v3656_v63, 8.507059e+37 }
 0xae1   :  { %v4294_v15 = vpop.eup %4293 }
 0xae2   :  { %v3666_v62 = vadd.f32 1.0, %v4294_v15 }
 0xae3   :  { %v4296_v56 = vpop.eup %4295 }
 0xae4   :  { %v4298_v34 = vpop.eup %4297  ;;  %v3629_v13 = vmul.f32 %v4296_v56, %v3627_v7  ;;  %4299 = vrcp.f32 %v3666_v62  ;;  %vm3634_vm6 = vweird.f32 %v4296_v56  ;;  %v3678_v33 = vand.u32 2147483648, %v3666_v62 }
 0xae5   :  { %v3648_v55 = vmul.f32 %v4298_v34, %v3646_v24  ;;  %4301 = vtanh.f32 %v3622_v27  ;;  %vm3653_vm7 = vweird.f32 %v4298_v34  ;;  %vm3635_vm14 = vmor %vm3633_vm12, %vm3634_vm6  ;;  %vm3672_vm0 = vweird.f32 %v3666_v62  ;;  %v3860_v24 = vld [vmem:[%s6824_s8 + $0x28] sm:$0xff]  ;;  %v3855_v27 = vld [vmem:[%s6824_s8] sm:$0xff] }
 0xae6   :  { %v3630_v47 = vsub.f32 1.0, %v3629_v13  ;;  %vm3654_vm10 = vmor %vm3652_vm9, %vm3653_vm7  ;;  %v3676_v39 = vand.u32 2147483647, %v3666_v62  ;;  %v3679_v11 = vor.u32 1.1754944e-38, %v3678_v33  ;;  %3911 = vmatpush.msrb.mxu1 %v3860_v24 }
 0xae7   :  { %v3649_v35 = vsub.f32 1.0, %v3648_v55 }
 0xae8   :  { %v3631_v58 = vmul.f32 %v4296_v56, %v3630_v47  ;;  %vm3677_vm3 = vcmp.eq.f32.partialorder %v3676_v39, 8.507059e+37  ;;  %3912 = vmatpush.msrb.mxu1 %v3859_v14 }
 0xae9   :  { %v3650_v1 = vmul.f32 %v4298_v34, %v3649_v35 }
 0xaea   :  { %v4300_v23 = vpop.eup %4299  ;;  %v3632_v50 = vadd.f32 %v4296_v56, %v3631_v58  ;;  %3913 = vmatpush.msrb.mxu1 %v3858_v54 }
 0xaeb   :  { %v3651_v20 = vadd.f32 %v4298_v34, %v3650_v1  ;;  %v3668_v32 = vmul.f32 %v4300_v23, %v3666_v62  ;;  %v4302_v28 = vpop.eup %4301  ;;  %vm3673_vm15 = vweird.f32 %v4300_v23 }
 0xaec   :  { %v3636_v26 = vsel %vm3635_vm14, %v4296_v56, %v3632_v50  ;;  %vm3674_vm2 = vmor %vm3672_vm0, %vm3673_vm15  ;;  %3914 = vmatpush.msrb.mxu1 %v3857_v16 }
 0xaed   :  { %v3641_v29 = vsel %vm3638_vm1, %v3640_v41, %v3636_v26  ;;  %v3655_v31 = vsel %vm3654_vm10, %v4298_v34, %v3651_v20  ;;  %v3669_v44 = vsub.f32 1.0, %v3668_v32 }
 0xaee   :  { %v3660_v51 = vsel %vm3657_vm13, %v3659_v17, %v3655_v31  ;;  %v3686_v45 = vmul.f32 %v4302_v28, %v3641_v29  ;;  %3915 = vmatpush.msrb.mxu1 %v3856_v12 }
 0xaef   :  { %v3685_v43 = vmul.f32 %v3683_v22, %v3660_v51  ;;  %v3670_v48 = vmul.f32 %v4300_v23, %v3669_v44 }
 0xaf0   :  { %3916 = vmatpush.msrb.mxu1 %v3855_v27 }
 0xaf1   :  { %v6763_v49 = vadd.f32 %v3686_v45, %v3685_v43  ;;  %v3671_v53 = vadd.f32 %v4300_v23, %v3670_v48 }
 0xaf3   :  { %4303 = vtanh.f32 %v6763_v49  ;;  %v3675_v60 = vsel %vm3674_vm2, %v4300_v23, %v3671_v53  ;;  %v3848_v29 = vrot.slane %v6763_v49, 6  ;;  %vm3954_vm2 = vcmask 58368  }
 0xaf4   :  { %v3680_v3 = vsel %vm3677_vm3, %v3679_v11, %v3675_v60 }
 0xaf9   :  { %v4304_v40 = vpop.eup %4303 }
 0xafa   :  { %v3689_v30 = vmul.f32 %v4304_v40, %v3680_v3 }
 0xafc   :  { %v3691_v21 = vrot.slane %v3689_v30, 4 }
 0xafe   :  { %3709 = vmatmul.f32.vlgmr.msra.gmra.mxu0 %v3691_v21  ;;  %3729 = vmatmul.f32.vlgmr.msra.gmra.mxu1 %v3691_v21 }
 0xaff   :  { %3749 = vmatmul.f32.vlgmr.msra.gmra.mxu2 %v3691_v21  ;;  %3769 = vmatmul.f32.vlgmr.msrb.gmra.mxu3 %v3691_v21 }
 0xb06   :  { %4047 = vmatmul.msk.f32.vlgmr.msrb.gmra.mxu0 %vm3874_vm4, %v3873_v38 }
 0xb7b   :  { %v3710_v5 = vpop.f32.mrf.mxu0  ;;  %v3730_v4 = vpop.f32.mrf.mxu1 }
 0xb7c   :  { %v3777_v0 = vrot.slane %v3710_v5, 2  ;;  %v3778_v36 = vrot.slane %v3730_v4, 2 }
 0xb7e   :  { %v3785_v10 = vadd.f32 %v3777_v0, %v7295_v2  ;;  %v3786_v46 = vadd.f32 %v3778_v36, %v7296_v8  ;;  %v3930_v36 = vld [vmem:[%s6827_s11 + $0x18] sm:$0xff] }
 0xb7f   :  { %3946 = vmatpush.msrb.mxu2 %v3930_v36 }
 0xb80   :  { %v4044_v25 = vmul.f32 -1.442695, %v3785_v10  ;;  %v4045_v7 = vmul.f32 -1.442695, %v3786_v46  ;;  %v3928_v10 = vld [vmem:[%s6827_s11 + $0x8] sm:$0xff]  ;;  %v3927_v46 = vld [vmem:[%s6827_s11] sm:$0xff] }
 0xb81   :  { %3947 = vmatpush.msrb.mxu2 %v3929_v37  ;;  %s3963_s11 = sshll.u32 %s6828_s12, 4  ;;  %s3964_s11 = int_to_ptr.hbm [resolvable:$true] %s3963_s11 }
 0xb82   :  { %4305 = vpow2.f32 %v4044_v25  ;;  %v3770_v2 = vpop.f32.mrf.mxu3  ;;  %v3750_v42 = vpop.f32.mrf.mxu2 }
 0xb83   :  { %4307 = vpow2.f32 %v4045_v7  ;;  %v3780_v8 = vrot.slane %v3770_v2, 2  ;;  %v3779_v34 = vrot.slane %v3750_v42, 2  ;;  %3948 = vmatpush.msrb.mxu2 %v3928_v10  ;;  %v3894_v25 = vpop.f32.mrf.mxu0 }
 0xb85   :  { %v3788_v61 = vadd.f32 %v3780_v8, %v7297_v59  ;;  %v3787_v35 = vadd.f32 %v3779_v34, %v7298_v9  ;;  %3949 = vmatpush.msrb.mxu2 %v3927_v46 }
 0xb87   :  { %v4046_v15 = vmul.f32 -1.442695, %v3788_v61 }
 0xb88   :  { %v4306_v62 = vpop.eup %4305 }
 0xb89   :  { %v4308_v56 = vpop.eup %4307  ;;  %v3792_v18 = vadd.f32 1.0, %v4306_v62  ;;  %4309 = vpow2.f32 %v4046_v15 }
 0xb8a   :  { %v3811_v59 = vadd.f32 1.0, %v4308_v56 }
 0xb8b   :  { %4311 = vrcp.f32 %v3792_v18  ;;  %v3804_v63 = vand.u32 2147483648, %v3792_v18  ;;  %v3802_v41 = vand.u32 2147483647, %v3792_v18  ;;  %vm3798_vm6 = vweird.f32 %v3792_v18 }
 0xb8c   :  { %4313 = vrcp.f32 %v3811_v59  ;;  %v3823_v23 = vand.u32 2147483648, %v3811_v59  ;;  %v3821_v32 = vand.u32 2147483647, %v3811_v59  ;;  %vm3817_vm7 = vweird.f32 %v3811_v59 }
 0xb8d   :  { %v3805_v9 = vor.u32 1.1754944e-38, %v3804_v63  ;;  %vm3803_vm14 = vcmp.eq.f32.partialorder %v3802_v41, 8.507059e+37 }
 0xb8e   :  { %v3824_v31 = vor.u32 1.1754944e-38, %v3823_v23  ;;  %vm3822_vm10 = vcmp.eq.f32.partialorder %v3821_v32, 8.507059e+37 }
 0xb8f   :  { %v4310_v13 = vpop.eup %4309 }
 0xb90   :  { %v3831_v55 = vadd.f32 1.0, %v4310_v13 }
 0xb91   :  { %v4312_v47 = vpop.eup %4311 }
 0xb92   :  { %v4314_v57 = vpop.eup %4313  ;;  %v3794_v52 = vmul.f32 %v4312_v47, %v3792_v18  ;;  %4315 = vrcp.f32 %v3831_v55  ;;  %vm3799_vm5 = vweird.f32 %v4312_v47  ;;  %v3843_v3 = vand.u32 2147483648, %v3831_v55 }
 0xb93   :  { %v3813_v58 = vmul.f32 %v4314_v57, %v3811_v59  ;;  %4317 = vtanh.f32 %v3787_v35  ;;  %vm3818_vm11 = vweird.f32 %v4314_v57  ;;  %vm3800_vm12 = vmor %vm3798_vm6, %vm3799_vm5  ;;  %vm3837_vm13 = vweird.f32 %v3831_v55 }
 0xb94   :  { %v3795_v19 = vsub.f32 1.0, %v3794_v52  ;;  %vm3819_vm9 = vmor %vm3817_vm7, %vm3818_vm11  ;;  %v3841_v49 = vand.u32 2147483647, %v3831_v55  ;;  %v3844_v21 = vor.u32 1.1754944e-38, %v3843_v3 }
 0xb95   :  { %v3814_v1 = vsub.f32 1.0, %v3813_v58 }
 0xb96   :  { %v3796_v50 = vmul.f32 %v4312_v47, %v3795_v19  ;;  %vm3842_vm0 = vcmp.eq.f32.partialorder %v3841_v49, 8.507059e+37 }
 0xb97   :  { %v3815_v20 = vmul.f32 %v4314_v57, %v3814_v1 }
 0xb98   :  { %v4316_v22 = vpop.eup %4315  ;;  %v3797_v17 = vadd.f32 %v4312_v47, %v3796_v50 }
 0xb99   :  { %v3816_v26 = vadd.f32 %v4314_v57, %v3815_v20  ;;  %v3833_v28 = vmul.f32 %v4316_v22, %v3831_v55  ;;  %v4318_v51 = vpop.eup %4317  ;;  %vm3838_vm1 = vweird.f32 %v4316_v22 }
 0xb9a   :  { %v3801_v44 = vsel %vm3800_vm12, %v4312_v47, %v3797_v17  ;;  %vm3839_vm15 = vmor %vm3837_vm13, %vm3838_vm1 }
 0xb9b   :  { %v3806_v45 = vsel %vm3803_vm14, %v3805_v9, %v3801_v44  ;;  %v3820_v43 = vsel %vm3819_vm9, %v4314_v57, %v3816_v26  ;;  %v3834_v48 = vsub.f32 1.0, %v3833_v28 }
 0xb9c   :  { %v3825_v53 = vsel %vm3822_vm10, %v3824_v31, %v3820_v43  ;;  %v3851_v33 = vmul.f32 %v4318_v51, %v3806_v45 }
 0xb9d   :  { %v3850_v39 = vmul.f32 %v3848_v29, %v3825_v53  ;;  %v3835_v60 = vmul.f32 %v4316_v22, %v3834_v48 }
 0xb9f   :  { %v3852_v11 = vadd.f32 %v3851_v33, %v3850_v39  ;;  %v3836_v40 = vadd.f32 %v4316_v22, %v3835_v60 }
 0xba1   :  { %4319 = vtanh.f32 %v3852_v11  ;;  %v3840_v30 = vsel %vm3839_vm15, %v4316_v22, %v3836_v40 }
 0xba2   :  { %v3845_v5 = vsel %vm3842_vm0, %v3844_v21, %v3840_v30 }
 0xba7   :  { %v4320_v38 = vpop.eup %4319 }
 0xba8   :  { %v3854_v4 = vmul.f32 %v4320_v38, %v3845_v5 }
 0xbaa   :  { %v3898_v0 = vrot.slane %v3854_v4, 6 }
 0xbac   :  { %4048 = vmatmul.msk.f32.vlgmr.msrb.gmra.mxu1 %vm3874_vm4, %v3898_v0 }
 0xc29   :  { %v3918_v7 = vpop.f32.mrf.mxu1 }
 0xc2a   :  { %v3919_v24 = vadd.f32 %v3918_v7, %v3894_v25 }
 0xc2c   :  { %v3925_v14 = vadd.f32 %v4064_v6, %v3919_v24 }
 0xc2e   :  { %4321 = vtanh.f32 %v3925_v14 }
 0xc34   :  { %v4322_v2 = vpop.eup %4321 }
 0xc35   :  { %4049 = vmatmul.msk.f32.vlgmr.msrb.gmra.mxu2 %vm2224_vm8, %v4322_v2 }
 0xcb8   :  { %v3951_v8 = vpop.f32.mrf.mxu2 }
 0xcb9   :  { %3955 = vst.msk [vmem:[#allocation12] sm:$0x3] %vm3954_vm2, %v3951_v8 }
 0xcba   :  { %3966 = dma.vmem_to_hbm [thread:$0]  %s3962_s26, 32, %s3964_s11, [#allocation6]  }
 0xcbb   :  { %4513 = dma.done.wait [#allocation6], 32  }
 0xcbc   :  { %4514 = vsyncadd [#allocation6], 4294967264 }
 0xcbd   :  { %3971 = vsyncpa [#allocation5], 1 }
 0xcbe   :  { %3972 = vsyncpa [#allocation8], 1 }
 0xcbf   :  { %3973 = vsyncpa [#allocation11], 1 }
 0xcc0   :  { %3974 = vsyncpa [#allocation6], 1 }

</bundles_post_ra>
